<compile_context>
chip_gen: v5e
topology: v5e:2x2
jax: 0.10.0
libtpu: 0.0.40
codegen_flags: <defaults>
</compile_context>

<pallas_src>
import jax
import jax.numpy as jnp
from jax.experimental import pallas as pl
from jax.experimental.pallas import tpu as pltpu

K = 2            # spatial kernel size == A.shape[0]
HID = 64         # out_channels of every st_gcn block
C_MID = HID * K  # 128 channels flowing between blocks
NUM_BLOCKS = 4


def prepare_kernel_params(p, TB, V):
    """One-time host-side prep: fold BNs, merge convs, build graph weights."""
    bf = jnp.bfloat16
    M = TB * V
    assert V >= 3, "ring decomposition assumes V >= 3"

    A_eff = p["A_eff"]                                         # (4, K, V, V)
    # Structural guards for the fast graph-aggregation path.
    eyeV = jnp.eye(V, dtype=jnp.float32)
    assert bool(jnp.all(jnp.where(eyeV == 0, A_eff[:, 0], 0.0) == 0)), \
        "partition 0 of A must be diagonal"
    dv = (jnp.arange(V)[:, None] - jnp.arange(V)[None, :]) % V
    band = (dv == 1) | (dv == V - 1)
    assert bool(jnp.all(jnp.where(band, 0.0, A_eff[:, 1]) == 0)), \
        "partition 1 of A must be ring-banded"

    # data_bn fold (exact in eval mode): y = (x*s + t) @ W + b
    w0 = p["bn_scale"][0][:, None] * p["w_gcn0"]               # (C_in, C_MID)
    b0 = p["bn_shift"][0] @ p["w_gcn0"] + p["b_gcn0"][0]       # (C_MID,)

    # Residual BN affine folded into the residual conv (f32, before bf16 cast).
    w_res_f = p["w_res"] * p["rbn_scale"]                      # (3, C, C)
    b_res_f = p["b_res"] * p["rbn_scale"] + p["rbn_shift"]     # (3, 1, C)

    # Merge gcn conv + folded residual conv into one 256-wide RHS per block.
    w_cat = jnp.concatenate([p["w_gcn"], w_res_f], axis=2).astype(bf)  # (3,128,256)
    b_cat = jnp.concatenate([p["b_gcn"], b_res_f], axis=2)             # (3,1,256) f32

    # Graph-aggregation weights (f32, lane masks baked in):
    #   gw[l, 0] : diagonal partition-0 scale  (lanes 0..63, paired with h)
    #   gw[l, 1] : ring weight for h[row-1]            (lanes 64..127)
    #   gw[l, 2] : ring wrap weight for h[row+V-1]     (w == 0 rows)
    #   gw[l, 3] : ring weight for h[row+1]
    #   gw[l, 4] : ring wrap weight for h[row-(V-1)]   (w == V-1 rows)
    w_ids = jnp.arange(M) % V
    lane = jnp.arange(C_MID)
    m_k0 = (lane < HID).astype(jnp.float32)[None, :]           # (1, 128)
    m_k1 = 1.0 - m_k0

    def block_gw(A0l, A1l):
        d = A0l[w_ids, w_ids]
        wm = jnp.where(w_ids >= 1, A1l[(w_ids - 1) % V, w_ids], 0.0)
        wmw = jnp.where(w_ids == 0, A1l[V - 1, w_ids], 0.0)
        wp = jnp.where(w_ids <= V - 2, A1l[(w_ids + 1) % V, w_ids], 0.0)
        wpw = jnp.where(w_ids == V - 1, A1l[0, w_ids], 0.0)
        return jnp.stack([d[:, None] * m_k0,
                          wm[:, None] * m_k1,
                          wmw[:, None] * m_k1,
                          wp[:, None] * m_k1,
                          wpw[:, None] * m_k1], axis=0)        # (5, M, 128)

    gw = jnp.stack([block_gw(A_eff[l, 0], A_eff[l, 1])
                    for l in range(NUM_BLOCKS)], axis=0)       # (4, 5, M, 128)

    # Per-sample mean-over-V pooling as a bf16 MXU matmul (1/V exact in bf16).
    pool = jnp.kron(jnp.eye(TB, dtype=jnp.float32),
                    jnp.full((1, V), 1.0 / V, jnp.float32)).astype(bf)  # (TB, M)

    return dict(
        gw=gw.astype(jnp.float32),
        pool=pool,
        w_gcn0=w0.astype(bf),
        b_gcn0=b0.reshape(1, C_MID),
        w_cat=w_cat,
        b_cat=b_cat,
        w_fcn=p["w_fcn"],
        b_fcn=p["b_fcn"],
    )


@jax.jit
def stgcn_forward(x, kp):
    """x: (N, V, C_in) f32 -> (N, num_class, 1) f32 (matches the PyTorch module)."""
    N, V, C_in = x.shape
    TB, M = kp["pool"].shape
    assert M == TB * V, "kernel params prepared for a different (TB, V)"
    NC = kp["w_fcn"].shape[1]

    n_pad = (-N) % TB
    if n_pad:
        x = jnp.concatenate([x, jnp.zeros((n_pad, V, C_in), x.dtype)], axis=0)
    Ntot = N + n_pad

    def kernel(x_ref, gw_ref, pool_ref, w0_ref, b0_ref, wc_ref, bc_ref, out_ref):
        # Static sublane-roll amounts (pltpu.roll == jnp.roll semantics:
        # out[i] = in[(i - shift) % M]); wraps never cross a sample because
        # the corresponding gw weights are zero outside their boundary rows.
        s_m1 = 1            # -> h[row - 1]
        s_p1 = M - 1        # -> h[row + 1]
        s_mw = M - (V - 1)  # -> h[row + V - 1]   (wrap partner, joint w == 0)
        s_pw = V - 1        # -> h[row - (V - 1)] (wrap partner, joint w == V-1)

        def graph_agg(h, l):
            # Diagonal partition 0 (lanes < 64): per-row VPU scale.
            g = h * gw_ref[l, 0]
            # Ring partition 1 (lanes >= 64): banded contraction via XLU rolls.
            g = g + pltpu.roll(h, shift=s_m1, axis=0) * gw_ref[l, 1]
            g = g + pltpu.roll(h, shift=s_mw, axis=0) * gw_ref[l, 2]
            g = g + pltpu.roll(h, shift=s_p1, axis=0) * gw_ref[l, 3]
            g = g + pltpu.roll(h, shift=s_pw, axis=0) * gw_ref[l, 4]
            return g

        # --- block 0: st_gcn(C_in, 64, K, residual=False); data_bn folded in.
        xb = x_ref[...].astype(jnp.bfloat16)                    # (M, C_in)
        h = jnp.dot(xb, w0_ref[...],
                    preferred_element_type=jnp.float32) + b0_ref[...]
        act = jnp.maximum(graph_agg(h, 0), 0.0)

        # --- blocks 1..3: one 256-wide dot gives [gcn conv | BN-folded residual].
        for i in range(3):
            ab = act.astype(jnp.bfloat16)
            hr = jnp.dot(ab, wc_ref[i],
                         preferred_element_type=jnp.float32) + bc_ref[i]
            act = jnp.maximum(graph_agg(hr[:, :C_MID], i + 1) + hr[:, C_MID:], 0.0)

        # avg_pool1d over V per sample as a bf16 MXU matmul -> lane-dense (TB, 128).
        out_ref[...] = jnp.dot(pool_ref[...], act.astype(jnp.bfloat16),
                               preferred_element_type=jnp.float32)

    # Constants use fixed index_maps (block index 0 every step), so Pallas
    # skips re-DMA across grid steps; only the x tile / output stream.
    def const_spec(a):
        nd = a.ndim
        return pl.BlockSpec(a.shape, lambda n, nd=nd: (0,) * nd)

    consts = (kp["gw"], kp["pool"], kp["w_gcn0"], kp["b_gcn0"],
              kp["w_cat"], kp["b_cat"])

    pooled = pl.pallas_call(
        kernel,
        out_shape=jax.ShapeDtypeStruct((Ntot, C_MID), jnp.float32),
        grid=(Ntot // TB,),
        in_specs=[pl.BlockSpec((M, C_in), lambda n: (n, 0))]
                 + [const_spec(a) for a in consts],
        out_specs=pl.BlockSpec((TB, C_MID), lambda n: (n, 0)),
        compiler_params=pltpu.CompilerParams(dimension_semantics=("parallel",)),
    )(x.reshape(Ntot * V, C_in), *consts)

    pooled = pooled[:N]                                   # drop batch padding
    out = pooled @ kp["w_fcn"] + kp["b_fcn"]              # fcn: Conv1d(128, NC, 1)
    return out.reshape(N, NC, 1)                          # matches PyTorch (N, NC, 1)


def init_params(key, C_in, V, NC):
    ks = jax.random.split(key, 12)

    def rnd(k, shape, scale=0.1):
        return scale * jax.random.normal(k, shape, dtype=jnp.float32)

    # Graph.A: (K, V, V) = [identity partition, row-normalized ring adjacency]
    eye = jnp.eye(V, dtype=jnp.float32)
    ring = jnp.roll(eye, 1, axis=1) + jnp.roll(eye, -1, axis=1)
    ring = ring / jnp.sum(ring, axis=1, keepdims=True)
    A = jnp.stack([eye, ring])                          # (K, V, V)
    edge_imp = jnp.ones((4, K, V, V), jnp.float32)      # nn.Parameter(torch.ones)
    A_eff = A[None] * edge_imp                          # A * importance per block

    eps = 1e-5
    bn_gamma = 1.0 + rnd(ks[0], (C_in,))
    bn_beta = rnd(ks[1], (C_in,))
    bn_scale = bn_gamma / jnp.sqrt(1.0 + eps)           # running_var = 1
    bn_shift = bn_beta                                  # running_mean = 0

    return dict(
        bn_scale=bn_scale.reshape(1, C_in),
        bn_shift=bn_shift.reshape(1, C_in),
        A_eff=A_eff,
        w_gcn0=rnd(ks[2], (C_in, C_MID)),               # Conv1d weight, stored (C_in, C_out)
        b_gcn0=rnd(ks[3], (1, C_MID)),
        w_gcn=rnd(ks[4], (3, C_MID, C_MID)),
        b_gcn=rnd(ks[5], (3, 1, C_MID)),
        w_res=rnd(ks[6], (3, C_MID, C_MID)),
        b_res=rnd(ks[7], (3, 1, C_MID)),
        rbn_scale=(1.0 + rnd(ks[8], (3, 1, C_MID))) / jnp.sqrt(1.0 + eps),
        rbn_shift=rnd(ks[9], (3, 1, C_MID)),
        w_fcn=rnd(ks[10], (C_MID, NC)),
        b_fcn=rnd(ks[11], (1, NC)),
    )


def reference_forward(x, p):
    """Pure-JAX f32 reference mirroring the PyTorch NCV forward pass."""
    N, V, C_in = x.shape
    xp = jnp.transpose(x, (0, 2, 1))                    # permute(0, 2, 1) -> (N, C, V)
    xp = xp * p["bn_scale"][0][None, :, None] + p["bn_shift"][0][None, :, None]
    A_eff = p["A_eff"]

    def conv1x1(x_ncv, w_cico, b):
        return jnp.einsum("ncv,co->nov", x_ncv, w_cico) + b[0][None, :, None]

    def gcn(x_ncv, w, b, A):
        h = conv1x1(x_ncv, w, b).reshape(N, K, HID, V)
        g = jnp.einsum("nkcv,kvw->nkcw", h, A)
        return g.reshape(N, K * HID, V)

    xp = jax.nn.relu(gcn(xp, p["w_gcn0"], p["b_gcn0"], A_eff[0]))
    for i in range(3):
        res = conv1x1(xp, p["w_res"][i], p["b_res"][i])
        res = res * p["rbn_scale"][i][0][None, :, None] + p["rbn_shift"][i][0][None, :, None]
        g = gcn(xp, p["w_gcn"][i], p["b_gcn"][i], A_eff[i + 1])
        xp = jax.nn.relu(g + res)
    pooled = jnp.mean(xp, axis=2, keepdims=True)        # F.avg_pool1d(x, num_joints)
    return jnp.einsum("ncv,co->nov", pooled, p["w_fcn"]) + p["b_fcn"][0][None, :, None]


if __name__ == "__main__":
    # batch, joints, in_channels, num_class.
    # TB=8 -> M = 128-row MXU tiles, grid length 4 (>= 2 pipelined steps per
    # v7x TensorCore). With the sparse graph-agg removed, TB=32 is also safe
    # for large batches to amortize per-step overhead.
    N, V, C_in, NC = 32, 16, 3, 10
    TB = 8
    key = jax.random.PRNGKey(0)
    kx, kparam = jax.random.split(key)
    x = jax.random.normal(kx, (N, V, C_in), dtype=jnp.float32)
    params = init_params(kparam, C_in, V, NC)

    kp = prepare_kernel_params(params, TB, V)   # hoisted one-time prep

    out = jax.block_until_ready(stgcn_forward(x, kp))
    ref = jax.block_until_ready(reference_forward(x, params))

    assert out.shape == (N, NC, 1), out.shape
    # bf16 MXU inputs (f32 accumulation) -> relaxed tolerance vs. the f32 reference.
    err = float(jnp.max(jnp.abs(out - ref)))
    assert err < 5e-2, f"max abs err {err}"
    print("KERNEL_OK")
</pallas_src>

<mosaic_0001>
module attributes {stable_mosaic.version = 11 : i64} {
  func.func @kernel(%arg0: i32, %arg1: memref<128x3xf32, #tpu.memory_space<vmem>>, %arg2: memref<4x5x128x128xf32, #tpu.memory_space<vmem>>, %arg3: memref<8x128xbf16, #tpu.memory_space<vmem>>, %arg4: memref<3x128xbf16, #tpu.memory_space<vmem>>, %arg5: memref<1x128xf32, #tpu.memory_space<vmem>>, %arg6: memref<3x128x256xbf16, #tpu.memory_space<vmem>>, %arg7: memref<3x1x256xf32, #tpu.memory_space<vmem>>, %arg8: memref<8x128xf32, #tpu.memory_space<vmem>>) attributes {dimension_semantics = [#tpu.dimension_semantics<parallel>], iteration_bounds = array<i64: 4>, scalar_prefetch = 0 : i64, scratch_operands = 0 : i64, tpu.core_type = #tpu.core_type<tc>, window_params = [{transform_indices = @transform_0, window_bounds = array<i64: 128, 3>}, {pipeline_mode = #tpu.pipeline_mode<synchronous>, transform_indices = @transform_1, window_bounds = array<i64: 4, 5, 128, 128>}, {pipeline_mode = #tpu.pipeline_mode<synchronous>, transform_indices = @transform_2, window_bounds = array<i64: 8, 128>}, {pipeline_mode = #tpu.pipeline_mode<synchronous>, transform_indices = @transform_3, window_bounds = array<i64: 3, 128>}, {pipeline_mode = #tpu.pipeline_mode<synchronous>, transform_indices = @transform_4, window_bounds = array<i64: 1, 128>}, {pipeline_mode = #tpu.pipeline_mode<synchronous>, transform_indices = @transform_5, window_bounds = array<i64: 3, 128, 256>}, {pipeline_mode = #tpu.pipeline_mode<synchronous>, transform_indices = @transform_6, window_bounds = array<i64: 3, 1, 256>}, {transform_indices = @transform_7, window_bounds = array<i64: 8, 128>}]} {
    %c0 = arith.constant 0 : index
    %c0_0 = arith.constant 0 : index
    %0 = vector.load %arg1[%c0, %c0_0] : memref<128x3xf32, #tpu.memory_space<vmem>>, vector<128x3xf32>
    %1 = arith.truncf %0 : vector<128x3xf32> to vector<128x3xbf16>
    %c0_1 = arith.constant 0 : index
    %c0_2 = arith.constant 0 : index
    %2 = vector.load %arg4[%c0_1, %c0_2] : memref<3x128xbf16, #tpu.memory_space<vmem>>, vector<3x128xbf16>
    %cst = arith.constant dense<0.000000e+00> : vector<128x128xf32>
    %3 = tpu.matmul %1, %2, %cst {dimension_numbers = #tpu.dot_dimension_numbers<[1], [0], [0], [1], [0, 0, 1, 1], [], []>} : vector<128x3xbf16>, vector<3x128xbf16>, vector<128x128xf32> -> vector<128x128xf32>
    %c0_3 = arith.constant 0 : index
    %c0_4 = arith.constant 0 : index
    %4 = vector.load %arg5[%c0_3, %c0_4] : memref<1x128xf32, #tpu.memory_space<vmem>>, vector<1x128xf32>
    %5 = vector.broadcast %4 : vector<1x128xf32> to vector<128x128xf32>
    %6 = arith.addf %3, %5 : vector<128x128xf32>
    %c0_5 = arith.constant 0 : index
    %c0_6 = arith.constant 0 : index
    %c0_7 = arith.constant 0 : index
    %c0_8 = arith.constant 0 : index
    %7 = vector.load %arg2[%c0_5, %c0_6, %c0_7, %c0_8] : memref<4x5x128x128xf32, #tpu.memory_space<vmem>>, vector<1x1x128x128xf32>
    %8 = vector.shape_cast %7 : vector<1x1x128x128xf32> to vector<128x128xf32>
    %9 = arith.mulf %6, %8 : vector<128x128xf32>
    %c1_i32 = arith.constant 1 : i32
    %10 = tpu.dynamic_rotate %6 by %c1_i32 dim 0 : vector<128x128xf32>, i32 -> vector<128x128xf32>
    %c0_9 = arith.constant 0 : index
    %c1 = arith.constant 1 : index
    %c0_10 = arith.constant 0 : index
    %c0_11 = arith.constant 0 : index
    %11 = vector.load %arg2[%c0_9, %c1, %c0_10, %c0_11] : memref<4x5x128x128xf32, #tpu.memory_space<vmem>>, vector<1x1x128x128xf32>
    %12 = vector.shape_cast %11 : vector<1x1x128x128xf32> to vector<128x128xf32>
    %13 = arith.mulf %10, %12 : vector<128x128xf32>
    %14 = arith.addf %9, %13 : vector<128x128xf32>
    %c113_i32 = arith.constant 113 : i32
    %15 = tpu.dynamic_rotate %6 by %c113_i32 dim 0 : vector<128x128xf32>, i32 -> vector<128x128xf32>
    %c0_12 = arith.constant 0 : index
    %c2 = arith.constant 2 : index
    %c0_13 = arith.constant 0 : index
    %c0_14 = arith.constant 0 : index
    %16 = vector.load %arg2[%c0_12, %c2, %c0_13, %c0_14] : memref<4x5x128x128xf32, #tpu.memory_space<vmem>>, vector<1x1x128x128xf32>
    %17 = vector.shape_cast %16 : vector<1x1x128x128xf32> to vector<128x128xf32>
    %18 = arith.mulf %15, %17 : vector<128x128xf32>
    %19 = arith.addf %14, %18 : vector<128x128xf32>
    %c127_i32 = arith.constant 127 : i32
    %20 = tpu.dynamic_rotate %6 by %c127_i32 dim 0 : vector<128x128xf32>, i32 -> vector<128x128xf32>
    %c0_15 = arith.constant 0 : index
    %c3 = arith.constant 3 : index
    %c0_16 = arith.constant 0 : index
    %c0_17 = arith.constant 0 : index
    %21 = vector.load %arg2[%c0_15, %c3, %c0_16, %c0_17] : memref<4x5x128x128xf32, #tpu.memory_space<vmem>>, vector<1x1x128x128xf32>
    %22 = vector.shape_cast %21 : vector<1x1x128x128xf32> to vector<128x128xf32>
    %23 = arith.mulf %20, %22 : vector<128x128xf32>
    %24 = arith.addf %19, %23 : vector<128x128xf32>
    %c15_i32 = arith.constant 15 : i32
    %25 = tpu.dynamic_rotate %6 by %c15_i32 dim 0 : vector<128x128xf32>, i32 -> vector<128x128xf32>
    %c0_18 = arith.constant 0 : index
    %c4 = arith.constant 4 : index
    %c0_19 = arith.constant 0 : index
    %c0_20 = arith.constant 0 : index
    %26 = vector.load %arg2[%c0_18, %c4, %c0_19, %c0_20] : memref<4x5x128x128xf32, #tpu.memory_space<vmem>>, vector<1x1x128x128xf32>
    %27 = vector.shape_cast %26 : vector<1x1x128x128xf32> to vector<128x128xf32>
    %28 = arith.mulf %25, %27 : vector<128x128xf32>
    %29 = arith.addf %24, %28 : vector<128x128xf32>
    %cst_21 = arith.constant 0.000000e+00 : f32
    %30 = vector.broadcast %cst_21 : f32 to vector<128x128xf32>
    %31 = arith.maximumf %29, %30 : vector<128x128xf32>
    %32 = arith.truncf %31 : vector<128x128xf32> to vector<128x128xbf16>
    %c0_22 = arith.constant 0 : index
    %c0_23 = arith.constant 0 : index
    %c0_24 = arith.constant 0 : index
    %33 = vector.load %arg6[%c0_22, %c0_23, %c0_24] : memref<3x128x256xbf16, #tpu.memory_space<vmem>>, vector<1x128x256xbf16>
    %34 = vector.shape_cast %33 : vector<1x128x256xbf16> to vector<128x256xbf16>
    %cst_25 = arith.constant dense<0.000000e+00> : vector<128x256xf32>
    %35 = tpu.matmul %32, %34, %cst_25 {dimension_numbers = #tpu.dot_dimension_numbers<[1], [0], [0], [1], [0, 0, 1, 1], [], []>} : vector<128x128xbf16>, vector<128x256xbf16>, vector<128x256xf32> -> vector<128x256xf32>
    %c0_26 = arith.constant 0 : index
    %c0_27 = arith.constant 0 : index
    %c0_28 = arith.constant 0 : index
    %36 = vector.load %arg7[%c0_26, %c0_27, %c0_28] : memref<3x1x256xf32, #tpu.memory_space<vmem>>, vector<1x1x256xf32>
    %37 = vector.shape_cast %36 : vector<1x1x256xf32> to vector<1x256xf32>
    %38 = vector.broadcast %37 : vector<1x256xf32> to vector<128x256xf32>
    %39 = arith.addf %35, %38 : vector<128x256xf32>
    %40 = vector.extract_strided_slice %39 {offsets = [0, 0], sizes = [128, 128], strides = [1, 1]} : vector<128x256xf32> to vector<128x128xf32>
    %c1_29 = arith.constant 1 : index
    %c0_30 = arith.constant 0 : index
    %c0_31 = arith.constant 0 : index
    %c0_32 = arith.constant 0 : index
    %41 = vector.load %arg2[%c1_29, %c0_30, %c0_31, %c0_32] : memref<4x5x128x128xf32, #tpu.memory_space<vmem>>, vector<1x1x128x128xf32>
    %42 = vector.shape_cast %41 : vector<1x1x128x128xf32> to vector<128x128xf32>
    %43 = arith.mulf %40, %42 : vector<128x128xf32>
    %c1_i32_33 = arith.constant 1 : i32
    %44 = tpu.dynamic_rotate %40 by %c1_i32_33 dim 0 : vector<128x128xf32>, i32 -> vector<128x128xf32>
    %c1_34 = arith.constant 1 : index
    %c1_35 = arith.constant 1 : index
    %c0_36 = arith.constant 0 : index
    %c0_37 = arith.constant 0 : index
    %45 = vector.load %arg2[%c1_34, %c1_35, %c0_36, %c0_37] : memref<4x5x128x128xf32, #tpu.memory_space<vmem>>, vector<1x1x128x128xf32>
    %46 = vector.shape_cast %45 : vector<1x1x128x128xf32> to vector<128x128xf32>
    %47 = arith.mulf %44, %46 : vector<128x128xf32>
    %48 = arith.addf %43, %47 : vector<128x128xf32>
    %c113_i32_38 = arith.constant 113 : i32
    %49 = tpu.dynamic_rotate %40 by %c113_i32_38 dim 0 : vector<128x128xf32>, i32 -> vector<128x128xf32>
    %c1_39 = arith.constant 1 : index
    %c2_40 = arith.constant 2 : index
    %c0_41 = arith.constant 0 : index
    %c0_42 = arith.constant 0 : index
    %50 = vector.load %arg2[%c1_39, %c2_40, %c0_41, %c0_42] : memref<4x5x128x128xf32, #tpu.memory_space<vmem>>, vector<1x1x128x128xf32>
    %51 = vector.shape_cast %50 : vector<1x1x128x128xf32> to vector<128x128xf32>
    %52 = arith.mulf %49, %51 : vector<128x128xf32>
    %53 = arith.addf %48, %52 : vector<128x128xf32>
    %c127_i32_43 = arith.constant 127 : i32
    %54 = tpu.dynamic_rotate %40 by %c127_i32_43 dim 0 : vector<128x128xf32>, i32 -> vector<128x128xf32>
    %c1_44 = arith.constant 1 : index
    %c3_45 = arith.constant 3 : index
    %c0_46 = arith.constant 0 : index
    %c0_47 = arith.constant 0 : index
    %55 = vector.load %arg2[%c1_44, %c3_45, %c0_46, %c0_47] : memref<4x5x128x128xf32, #tpu.memory_space<vmem>>, vector<1x1x128x128xf32>
    %56 = vector.shape_cast %55 : vector<1x1x128x128xf32> to vector<128x128xf32>
    %57 = arith.mulf %54, %56 : vector<128x128xf32>
    %58 = arith.addf %53, %57 : vector<128x128xf32>
    %c15_i32_48 = arith.constant 15 : i32
    %59 = tpu.dynamic_rotate %40 by %c15_i32_48 dim 0 : vector<128x128xf32>, i32 -> vector<128x128xf32>
    %c1_49 = arith.constant 1 : index
    %c4_50 = arith.constant 4 : index
    %c0_51 = arith.constant 0 : index
    %c0_52 = arith.constant 0 : index
    %60 = vector.load %arg2[%c1_49, %c4_50, %c0_51, %c0_52] : memref<4x5x128x128xf32, #tpu.memory_space<vmem>>, vector<1x1x128x128xf32>
    %61 = vector.shape_cast %60 : vector<1x1x128x128xf32> to vector<128x128xf32>
    %62 = arith.mulf %59, %61 : vector<128x128xf32>
    %63 = arith.addf %58, %62 : vector<128x128xf32>
    %64 = vector.extract_strided_slice %39 {offsets = [0, 128], sizes = [128, 128], strides = [1, 1]} : vector<128x256xf32> to vector<128x128xf32>
    %65 = arith.addf %63, %64 : vector<128x128xf32>
    %cst_53 = arith.constant 0.000000e+00 : f32
    %66 = vector.broadcast %cst_53 : f32 to vector<128x128xf32>
    %67 = arith.maximumf %65, %66 : vector<128x128xf32>
    %68 = arith.truncf %67 : vector<128x128xf32> to vector<128x128xbf16>
    %c1_54 = arith.constant 1 : index
    %c0_55 = arith.constant 0 : index
    %c0_56 = arith.constant 0 : index
    %69 = vector.load %arg6[%c1_54, %c0_55, %c0_56] : memref<3x128x256xbf16, #tpu.memory_space<vmem>>, vector<1x128x256xbf16>
    %70 = vector.shape_cast %69 : vector<1x128x256xbf16> to vector<128x256xbf16>
    %cst_57 = arith.constant dense<0.000000e+00> : vector<128x256xf32>
    %71 = tpu.matmul %68, %70, %cst_57 {dimension_numbers = #tpu.dot_dimension_numbers<[1], [0], [0], [1], [0, 0, 1, 1], [], []>} : vector<128x128xbf16>, vector<128x256xbf16>, vector<128x256xf32> -> vector<128x256xf32>
    %c1_58 = arith.constant 1 : index
    %c0_59 = arith.constant 0 : index
    %c0_60 = arith.constant 0 : index
    %72 = vector.load %arg7[%c1_58, %c0_59, %c0_60] : memref<3x1x256xf32, #tpu.memory_space<vmem>>, vector<1x1x256xf32>
    %73 = vector.shape_cast %72 : vector<1x1x256xf32> to vector<1x256xf32>
    %74 = vector.broadcast %73 : vector<1x256xf32> to vector<128x256xf32>
    %75 = arith.addf %71, %74 : vector<128x256xf32>
    %76 = vector.extract_strided_slice %75 {offsets = [0, 0], sizes = [128, 128], strides = [1, 1]} : vector<128x256xf32> to vector<128x128xf32>
    %c2_61 = arith.constant 2 : index
    %c0_62 = arith.constant 0 : index
    %c0_63 = arith.constant 0 : index
    %c0_64 = arith.constant 0 : index
    %77 = vector.load %arg2[%c2_61, %c0_62, %c0_63, %c0_64] : memref<4x5x128x128xf32, #tpu.memory_space<vmem>>, vector<1x1x128x128xf32>
    %78 = vector.shape_cast %77 : vector<1x1x128x128xf32> to vector<128x128xf32>
    %79 = arith.mulf %76, %78 : vector<128x128xf32>
    %c1_i32_65 = arith.constant 1 : i32
    %80 = tpu.dynamic_rotate %76 by %c1_i32_65 dim 0 : vector<128x128xf32>, i32 -> vector<128x128xf32>
    %c2_66 = arith.constant 2 : index
    %c1_67 = arith.constant 1 : index
    %c0_68 = arith.constant 0 : index
    %c0_69 = arith.constant 0 : index
    %81 = vector.load %arg2[%c2_66, %c1_67, %c0_68, %c0_69] : memref<4x5x128x128xf32, #tpu.memory_space<vmem>>, vector<1x1x128x128xf32>
    %82 = vector.shape_cast %81 : vector<1x1x128x128xf32> to vector<128x128xf32>
    %83 = arith.mulf %80, %82 : vector<128x128xf32>
    %84 = arith.addf %79, %83 : vector<128x128xf32>
    %c113_i32_70 = arith.constant 113 : i32
    %85 = tpu.dynamic_rotate %76 by %c113_i32_70 dim 0 : vector<128x128xf32>, i32 -> vector<128x128xf32>
    %c2_71 = arith.constant 2 : index
    %c2_72 = arith.constant 2 : index
    %c0_73 = arith.constant 0 : index
    %c0_74 = arith.constant 0 : index
    %86 = vector.load %arg2[%c2_71, %c2_72, %c0_73, %c0_74] : memref<4x5x128x128xf32, #tpu.memory_space<vmem>>, vector<1x1x128x128xf32>
    %87 = vector.shape_cast %86 : vector<1x1x128x128xf32> to vector<128x128xf32>
    %88 = arith.mulf %85, %87 : vector<128x128xf32>
    %89 = arith.addf %84, %88 : vector<128x128xf32>
    %c127_i32_75 = arith.constant 127 : i32
    %90 = tpu.dynamic_rotate %76 by %c127_i32_75 dim 0 : vector<128x128xf32>, i32 -> vector<128x128xf32>
    %c2_76 = arith.constant 2 : index
    %c3_77 = arith.constant 3 : index
    %c0_78 = arith.constant 0 : index
    %c0_79 = arith.constant 0 : index
    %91 = vector.load %arg2[%c2_76, %c3_77, %c0_78, %c0_79] : memref<4x5x128x128xf32, #tpu.memory_space<vmem>>, vector<1x1x128x128xf32>
    %92 = vector.shape_cast %91 : vector<1x1x128x128xf32> to vector<128x128xf32>
    %93 = arith.mulf %90, %92 : vector<128x128xf32>
    %94 = arith.addf %89, %93 : vector<128x128xf32>
    %c15_i32_80 = arith.constant 15 : i32
    %95 = tpu.dynamic_rotate %76 by %c15_i32_80 dim 0 : vector<128x128xf32>, i32 -> vector<128x128xf32>
    %c2_81 = arith.constant 2 : index
    %c4_82 = arith.constant 4 : index
    %c0_83 = arith.constant 0 : index
    %c0_84 = arith.constant 0 : index
    %96 = vector.load %arg2[%c2_81, %c4_82, %c0_83, %c0_84] : memref<4x5x128x128xf32, #tpu.memory_space<vmem>>, vector<1x1x128x128xf32>
    %97 = vector.shape_cast %96 : vector<1x1x128x128xf32> to vector<128x128xf32>
    %98 = arith.mulf %95, %97 : vector<128x128xf32>
    %99 = arith.addf %94, %98 : vector<128x128xf32>
    %100 = vector.extract_strided_slice %75 {offsets = [0, 128], sizes = [128, 128], strides = [1, 1]} : vector<128x256xf32> to vector<128x128xf32>
    %101 = arith.addf %99, %100 : vector<128x128xf32>
    %cst_85 = arith.constant 0.000000e+00 : f32
    %102 = vector.broadcast %cst_85 : f32 to vector<128x128xf32>
    %103 = arith.maximumf %101, %102 : vector<128x128xf32>
    %104 = arith.truncf %103 : vector<128x128xf32> to vector<128x128xbf16>
    %c2_86 = arith.constant 2 : index
    %c0_87 = arith.constant 0 : index
    %c0_88 = arith.constant 0 : index
    %105 = vector.load %arg6[%c2_86, %c0_87, %c0_88] : memref<3x128x256xbf16, #tpu.memory_space<vmem>>, vector<1x128x256xbf16>
    %106 = vector.shape_cast %105 : vector<1x128x256xbf16> to vector<128x256xbf16>
    %cst_89 = arith.constant dense<0.000000e+00> : vector<128x256xf32>
    %107 = tpu.matmul %104, %106, %cst_89 {dimension_numbers = #tpu.dot_dimension_numbers<[1], [0], [0], [1], [0, 0, 1, 1], [], []>} : vector<128x128xbf16>, vector<128x256xbf16>, vector<128x256xf32> -> vector<128x256xf32>
    %c2_90 = arith.constant 2 : index
    %c0_91 = arith.constant 0 : index
    %c0_92 = arith.constant 0 : index
    %108 = vector.load %arg7[%c2_90, %c0_91, %c0_92] : memref<3x1x256xf32, #tpu.memory_space<vmem>>, vector<1x1x256xf32>
    %109 = vector.shape_cast %108 : vector<1x1x256xf32> to vector<1x256xf32>
    %110 = vector.broadcast %109 : vector<1x256xf32> to vector<128x256xf32>
    %111 = arith.addf %107, %110 : vector<128x256xf32>
    %112 = vector.extract_strided_slice %111 {offsets = [0, 0], sizes = [128, 128], strides = [1, 1]} : vector<128x256xf32> to vector<128x128xf32>
    %c3_93 = arith.constant 3 : index
    %c0_94 = arith.constant 0 : index
    %c0_95 = arith.constant 0 : index
    %c0_96 = arith.constant 0 : index
    %113 = vector.load %arg2[%c3_93, %c0_94, %c0_95, %c0_96] : memref<4x5x128x128xf32, #tpu.memory_space<vmem>>, vector<1x1x128x128xf32>
    %114 = vector.shape_cast %113 : vector<1x1x128x128xf32> to vector<128x128xf32>
    %115 = arith.mulf %112, %114 : vector<128x128xf32>
    %c1_i32_97 = arith.constant 1 : i32
    %116 = tpu.dynamic_rotate %112 by %c1_i32_97 dim 0 : vector<128x128xf32>, i32 -> vector<128x128xf32>
    %c3_98 = arith.constant 3 : index
    %c1_99 = arith.constant 1 : index
    %c0_100 = arith.constant 0 : index
    %c0_101 = arith.constant 0 : index
    %117 = vector.load %arg2[%c3_98, %c1_99, %c0_100, %c0_101] : memref<4x5x128x128xf32, #tpu.memory_space<vmem>>, vector<1x1x128x128xf32>
    %118 = vector.shape_cast %117 : vector<1x1x128x128xf32> to vector<128x128xf32>
    %119 = arith.mulf %116, %118 : vector<128x128xf32>
    %120 = arith.addf %115, %119 : vector<128x128xf32>
    %c113_i32_102 = arith.constant 113 : i32
    %121 = tpu.dynamic_rotate %112 by %c113_i32_102 dim 0 : vector<128x128xf32>, i32 -> vector<128x128xf32>
    %c3_103 = arith.constant 3 : index
    %c2_104 = arith.constant 2 : index
    %c0_105 = arith.constant 0 : index
    %c0_106 = arith.constant 0 : index
    %122 = vector.load %arg2[%c3_103, %c2_104, %c0_105, %c0_106] : memref<4x5x128x128xf32, #tpu.memory_space<vmem>>, vector<1x1x128x128xf32>
    %123 = vector.shape_cast %122 : vector<1x1x128x128xf32> to vector<128x128xf32>
    %124 = arith.mulf %121, %123 : vector<128x128xf32>
    %125 = arith.addf %120, %124 : vector<128x128xf32>
    %c127_i32_107 = arith.constant 127 : i32
    %126 = tpu.dynamic_rotate %112 by %c127_i32_107 dim 0 : vector<128x128xf32>, i32 -> vector<128x128xf32>
    %c3_108 = arith.constant 3 : index
    %c3_109 = arith.constant 3 : index
    %c0_110 = arith.constant 0 : index
    %c0_111 = arith.constant 0 : index
    %127 = vector.load %arg2[%c3_108, %c3_109, %c0_110, %c0_111] : memref<4x5x128x128xf32, #tpu.memory_space<vmem>>, vector<1x1x128x128xf32>
    %128 = vector.shape_cast %127 : vector<1x1x128x128xf32> to vector<128x128xf32>
    %129 = arith.mulf %126, %128 : vector<128x128xf32>
    %130 = arith.addf %125, %129 : vector<128x128xf32>
    %c15_i32_112 = arith.constant 15 : i32
    %131 = tpu.dynamic_rotate %112 by %c15_i32_112 dim 0 : vector<128x128xf32>, i32 -> vector<128x128xf32>
    %c3_113 = arith.constant 3 : index
    %c4_114 = arith.constant 4 : index
    %c0_115 = arith.constant 0 : index
    %c0_116 = arith.constant 0 : index
    %132 = vector.load %arg2[%c3_113, %c4_114, %c0_115, %c0_116] : memref<4x5x128x128xf32, #tpu.memory_space<vmem>>, vector<1x1x128x128xf32>
    %133 = vector.shape_cast %132 : vector<1x1x128x128xf32> to vector<128x128xf32>
    %134 = arith.mulf %131, %133 : vector<128x128xf32>
    %135 = arith.addf %130, %134 : vector<128x128xf32>
    %136 = vector.extract_strided_slice %111 {offsets = [0, 128], sizes = [128, 128], strides = [1, 1]} : vector<128x256xf32> to vector<128x128xf32>
    %137 = arith.addf %135, %136 : vector<128x128xf32>
    %cst_117 = arith.constant 0.000000e+00 : f32
    %138 = vector.broadcast %cst_117 : f32 to vector<128x128xf32>
    %139 = arith.maximumf %137, %138 : vector<128x128xf32>
    %c0_118 = arith.constant 0 : index
    %c0_119 = arith.constant 0 : index
    %140 = vector.load %arg3[%c0_118, %c0_119] : memref<8x128xbf16, #tpu.memory_space<vmem>>, vector<8x128xbf16>
    %141 = arith.truncf %139 : vector<128x128xf32> to vector<128x128xbf16>
    %cst_120 = arith.constant dense<0.000000e+00> : vector<8x128xf32>
    %142 = tpu.matmul %140, %141, %cst_120 {dimension_numbers = #tpu.dot_dimension_numbers<[1], [0], [0], [1], [0, 0, 1, 1], [], []>} : vector<8x128xbf16>, vector<128x128xbf16>, vector<8x128xf32> -> vector<8x128xf32>
    %c0_121 = arith.constant 0 : index
    %c0_122 = arith.constant 0 : index
    %143 = vector.load %arg8[%c0_121, %c0_122] : memref<8x128xf32, #tpu.memory_space<vmem>>, vector<8x128xf32>
    tpu.vector_store %arg8[%c0_121, %c0_122], %142 {strides = array<i32>} : memref<8x128xf32, #tpu.memory_space<vmem>>, vector<8x128xf32>,
    return
  }
  func.func @transform_0(%arg0: i32) -> (i32, i32) {
    %c0_i32 = arith.constant 0 : i32
    %c0_i32_0 = arith.constant 0 : i32
    return %arg0, %c0_i32 : i32, i32
  }
  func.func @transform_1(%arg0: i32) -> (i32, i32, i32, i32) {
    %c0_i32 = arith.constant 0 : i32
    %c0_i32_0 = arith.constant 0 : i32
    %c0_i32_1 = arith.constant 0 : i32
    %c0_i32_2 = arith.constant 0 : i32
    %c0_i32_3 = arith.constant 0 : i32
    return %c0_i32, %c0_i32_0, %c0_i32_1, %c0_i32_2 : i32, i32, i32, i32
  }
  func.func @transform_2(%arg0: i32) -> (i32, i32) {
    %c0_i32 = arith.constant 0 : i32
    %c0_i32_0 = arith.constant 0 : i32
    %c0_i32_1 = arith.constant 0 : i32
    return %c0_i32, %c0_i32_0 : i32, i32
  }
  func.func @transform_3(%arg0: i32) -> (i32, i32) {
    %c0_i32 = arith.constant 0 : i32
    %c0_i32_0 = arith.constant 0 : i32
    %c0_i32_1 = arith.constant 0 : i32
    return %c0_i32, %c0_i32_0 : i32, i32
  }
  func.func @transform_4(%arg0: i32) -> (i32, i32) {
    %c0_i32 = arith.constant 0 : i32
    %c0_i32_0 = arith.constant 0 : i32
    %c0_i32_1 = arith.constant 0 : i32
    return %c0_i32, %c0_i32_0 : i32, i32
  }
  func.func @transform_5(%arg0: i32) -> (i32, i32, i32) {
    %c0_i32 = arith.constant 0 : i32
    %c0_i32_0 = arith.constant 0 : i32
    %c0_i32_1 = arith.constant 0 : i32
    %c0_i32_2 = arith.constant 0 : i32
    return %c0_i32, %c0_i32_0, %c0_i32_1 : i32, i32, i32
  }
  func.func @transform_6(%arg0: i32) -> (i32, i32, i32) {
    %c0_i32 = arith.constant 0 : i32
    %c0_i32_0 = arith.constant 0 : i32
    %c0_i32_1 = arith.constant 0 : i32
    %c0_i32_2 = arith.constant 0 : i32
    return %c0_i32, %c0_i32_0, %c0_i32_1 : i32, i32, i32
  }
  func.func @transform_7(%arg0: i32) -> (i32, i32) {
    %c0_i32 = arith.constant 0 : i32
    %c0_i32_0 = arith.constant 0 : i32
    return %arg0, %c0_i32 : i32, i32
  }
}

</mosaic_0001>

<bundles_post_ra>
// kernel: stgcn_forward.1
= control target key start
LH: loop header
LB: loop body
LE: loop exit
PB: predicated region body
PF: predicated region fallthrough
CT: control target
= control target key end

     0   :  { %12 = vsyncpa [#allocation3], 0  ;;  %s4356_s0 = inlined_call_operand.vmem [shape: f32[512,3], index: 0, kind: input, shape index: {}]   ;;  %s4357_s1 = inlined_call_operand.hbm [shape: f32[4,5,128,128], index: 1, kind: input, shape index: {}]   ;;  %s4358_s2 = inlined_call_operand.hbm [shape: bf16[8,128], index: 2, kind: input, shape index: {}]   ;;  %s4359_s3 = inlined_call_operand.hbm [shape: bf16[3,128], index: 3, kind: input, shape index: {}]   ;;  %s4360_s4 = inlined_call_operand.hbm [shape: f32[1,128], index: 4, kind: input, shape index: {}]   ;;  %s4361_s5 = inlined_call_operand.hbm [shape: bf16[3,128,256], index: 5, kind: input, shape index: {}]   ;;  %s4362_s6 = inlined_call_operand.hbm [shape: f32[3,1,256], index: 6, kind: input, shape index: {}]   ;;  %s4363_s7 = inlined_call_operand.vmem [shape: f32[32,128], index: 7, kind: output, shape index: {}]  }
   0x1   :  { %13 = vsyncpa [#allocation5], 0 }
   0x2   :  { %14 = vsyncpa [#allocation8], 0 }
   0x3   :  { %15 = vsyncpa [#allocation11], 0  ;;  %s3151_s24 = smov 0  }
   0x4 LB: > { %s230_s27 = sshll.u32 %s4358_s2, 4  ;;  %s3160_s28 = sadd.s32 4294967295, %s3098_s24   ;;  %s3098_s24 = sphi %s3151_s24, %s21_s24   ;;  %s231_s27 = int_to_ptr.hbm [resolvable:$true] %s230_s27 }
   0x5   : > { %p2537_p0 = scmp.ge.s32.totalorder %s3098_s24, 1  ;;  %p204_p1 = scmp.lt.s32.totalorder %s3098_s24, 5 }
   0x6   : > { %p2864_p2 = scmp.eq.s32.totalorder %s3160_s28, 0  ;;  %s3100_s30 = smov [#allocation4]  }
   0x7   : > { %p3165_p3 = pnand %p2537_p0, %p204_p1  ;;  %s232_s8 = sshll.u32 %s3100_s30, 4  ;;  %s233_s8 = int_to_ptr.vmem [resolvable:$true] %s232_s8 }
   0x8   : > { %s254_s11 = sshll.u32 %s4360_s4, 4  ;;  %s215_s14 = sshll.u32 %s4357_s1, 4  ;;  %s255_s11 = int_to_ptr.hbm [resolvable:$true] %s254_s11  ;;  %s216_s14 = int_to_ptr.hbm [resolvable:$true] %s215_s14 }
   0x9   : > { %p2845_p4 = pneg %p3165_p3  ;;  %s3101_s16 = smov [#allocation7]  }
   0xa   : > { %s256_s17 = sshll.u32 %s3101_s16, 4  ;;  %s3102_s18 = smov [#allocation2]   ;;  %s257_s17 = int_to_ptr.vmem [resolvable:$true] %s256_s17 }
   0xb   : > { %p3179_p5 = pnand %p2864_p2, %p2845_p4  ;;  %s217_s19 = sshll.u32 %s3102_s18, 4  ;;  %s218_s19 = int_to_ptr.vmem [resolvable:$true] %s217_s19 }
   0xc   : > { %s3103_s20 = smov 128   ;;  %s3104_s21 = smov 8  }
   0xd   : > { %2851 = dma.hbm_to_vmem [thread:$0]  (!%p3179_p5), %s231_s27, 64, %s233_s8, [#allocation5]  }
   0xe   : > { %2857 = dma.hbm_to_vmem [thread:$0]  (!%p3179_p5), %s255_s11, 16, %s257_s17, [#allocation8]  }
   0xf   : > { %2848 = dma.hbm_to_vmem [thread:$0]  (!%p3179_p5), %s216_s14, 40960, %s218_s19, [#allocation3], %s3103_s20, %s3103_s20, %s3104_s21  }
  0x10   : > { %s242_s25 = sshll.u32 %s4359_s3, 4  ;;  %s3105_s26 = smov [#allocation6]   ;;  %s243_s25 = int_to_ptr.hbm [resolvable:$true] %s242_s25 }
  0x11   : > { %s244_s30 = sshll.u32 %s3105_s26, 4  ;;  %s265_s9 = sshll.u32 %s4361_s5, 4  ;;  %s245_s30 = int_to_ptr.vmem [resolvable:$true] %s244_s30  ;;  %s266_s9 = int_to_ptr.hbm [resolvable:$true] %s265_s9 }
  0x12   : > { %2854 = dma.hbm_to_vmem [thread:$0]  (!%p3179_p5), %s243_s25, 32, %s245_s30, [#allocation5]  }
  0x13   : > { %s3106_s10 = smov [#allocation9]   ;;  %s279_s14 = sshll.u32 %s4362_s6, 4  ;;  %s280_s14 = int_to_ptr.hbm [resolvable:$true] %s279_s14 }
  0x14   : > { %s267_s11 = sshll.u32 %s3106_s10, 4  ;;  %s3107_s16 = smov [#allocation10]   ;;  %s268_s11 = int_to_ptr.vmem [resolvable:$true] %s267_s11 }
  0x15   : > { %2860 = dma.hbm_to_vmem [thread:$0]  (!%p3179_p5), %s266_s9, 6144, %s268_s11, [#allocation8], %s3103_s20, %s3103_s20, %s3104_s21  }
  0x16   : > { %s281_s17 = sshll.u32 %s3107_s16, 4  ;;  %s3108_s18 = smov 32   ;;  %s282_s17 = int_to_ptr.vmem [resolvable:$true] %s281_s17 }
  0x17   : > { %s3109_s19 = smov 2   ;;  %306 = sbr.rel (%p3165_p3) target bundleno = 1195 (0x4ab), region = 48 }
  0x18   : > { %2863 = dma.hbm_to_vmem [thread:$0]  (!%p3179_p5), %s280_s14, 96, %s282_s17, [#allocation11], %s3108_s18, %s3108_s18, %s3109_s19  }
  0x1c   : > { %3081 = dma.done.wait (%p2864_p2), [#allocation3], 40960  }
  0x1d   : > { %3083 = vsyncadd (%p2864_p2), [#allocation3], 4294926336 }
  0x1e   : > { %3085 = dma.done.wait (%p2864_p2), [#allocation5], 96  }
  0x1f   : > { %3087 = vsyncadd (%p2864_p2), [#allocation5], 4294967200 }
  0x20   : > { %3089 = dma.done.wait (%p2864_p2), [#allocation8], 6160  }
  0x21   : > { %3091 = vsyncadd (%p2864_p2), [#allocation8], 4294961136 }
  0x22   : > { %3093 = dma.done.wait (%p2864_p2), [#allocation11], 96  }
  0x23   : > { %3095 = vsyncadd (%p2864_p2), [#allocation11], 4294967200  ;;  %vm428_vm0 = vcmask 1040384   ;;  %s2552_s29 = sshll.u32 %s3160_s28, 4  ;;  %vm429_vm1 = vcmask 1041408   ;;  %v3110_v0 = vmov 65535   ;;  %v532_v31 = vlaneseq }
  0x24   : > { %p364_p6 = scmp.lt.s32.totalorder %s2552_s29, 63  ;;  %v430_v1 = vsel %vm428_vm0, 4294967295, %v3110_v0  ;;  %v398_v3 = vld [vmem:[#allocation6] sm:$0x3]  ;;  %vm403_vm2 = vcmask 23552   ;;  %v553_v41 = vld [vmem:[#allocation2 + $0x88] sm:$0xff] }
  0x25   : > { %v431_v2 = vsel %vm429_vm1, %v430_v1, 0  ;;  %v3252_v32 = vld [vmem:[#allocation7] ss:$0 sm:$0xff]  ;;  %v3255_v34 = vshrl.u32 %v532_v31, 7  ;;  %v485_v43 = vld [vmem:[#allocation2 + $0x8] sm:$0xff]  ;;  %v554_v58 = vld [vmem:[#allocation2 + $0x90] sm:$0xff] }
  0x26   : > { %s4367_s29 = smov (!%p364_p6, %s2552_s29), 63  ;;  %v433_v6 = vand.u32 %v431_v2, %v398_v3  ;;  %v602_v50 = vld [vmem:[#allocation2 + $0x108] sm:$0xff]  ;;  %v486_v62 = vld [vmem:[#allocation2 + $0x10] sm:$0xff]  ;;  %p369_p7 = scmp.lt.s32.totalorder %s3160_s28, 3 }
  0x27   : > { %s2553_s15 = sshll.u32 %s4367_s29, 3  ;;  %vm534_vm3 = vcmp.lt.s32.totalorder %v3255_v34, 1  ;;  %vm665_vm4 = vcmp.lt.s32.totalorder %v3255_v34, 7  ;;  %v684_v54 = vld [vmem:[#allocation2 + $0x188] sm:$0xff] }
  0x28   : > { %s3226_s22 = scalar_lea.vmem %s4356_s0, %s2553_s15  ;;  %442 = vmatpush.bf16.msra.mxu0 %v433_v6  ;;  %s4369_s28 = smov (!%p369_p7, %s3160_s28), 3 }
  0x29   : > { %v374_v4 = vld [vmem:[%s3226_s22] sm:$0xff]  ;;  %v375_v5 = vld [vmem:[%s3226_s22 + $0x8] sm:$0xff]  ;;  %v376_v8 = vld [vmem:[%s3226_s22 + $0x10] sm:$0xff]  ;;  %s2554_s23 = sshll.u32 %s4369_s28, 3 }
  0x2a   : > { %v390_v7 = vpack.c.bf16 %v375_v5, %v374_v4  ;;  %v377_v9 = vld [vmem:[%s3226_s22 + $0x18] sm:$0xff]  ;;  %v378_v11 = vld [vmem:[%s3226_s22 + $0x20] sm:$0xff]  ;;  %v379_v12 = vld [vmem:[%s3226_s22 + $0x28] sm:$0xff]  ;;  %s372_s30 = scalar_lea.vmem %s4363_s7, %s2554_s23 }
  0x2b   : > { %v391_v10 = vpack.c.bf16 %v377_v9, %v376_v8  ;;  %v392_v13 = vpack.c.bf16 %v379_v12, %v378_v11  ;;  %v380_v14 = vld [vmem:[%s3226_s22 + $0x30] sm:$0xff]  ;;  %v381_v15 = vld [vmem:[%s3226_s22 + $0x38] sm:$0xff]  ;;  %v382_v17 = vld [vmem:[%s3226_s22 + $0x40] sm:$0xff] }
  0x2c   : > { %2555 = vmatmul.msk.bf16.vlgmr.msra.gmra.mxu0 %vm403_vm2, %v390_v7  ;;  %v393_v16 = vpack.c.bf16 %v381_v15, %v380_v14  ;;  %v383_v18 = vld [vmem:[%s3226_s22 + $0x48] sm:$0xff]  ;;  %v384_v20 = vld [vmem:[%s3226_s22 + $0x50] sm:$0xff]  ;;  %v385_v21 = vld [vmem:[%s3226_s22 + $0x58] sm:$0xff] }
  0x2d   : > { %v394_v19 = vpack.c.bf16 %v383_v18, %v382_v17  ;;  %v395_v22 = vpack.c.bf16 %v385_v21, %v384_v20  ;;  %v386_v23 = vld [vmem:[%s3226_s22 + $0x60] sm:$0xff]  ;;  %v387_v24 = vld [vmem:[%s3226_s22 + $0x68] sm:$0xff]  ;;  %v388_v26 = vld [vmem:[%s3226_s22 + $0x70] sm:$0xff] }
  0x2e   : > { %v396_v25 = vpack.c.bf16 %v387_v24, %v386_v23  ;;  %v389_v27 = vld [vmem:[%s3226_s22 + $0x78] sm:$0xff]  ;;  %v603_v4 = vld [vmem:[#allocation2 + $0x110] sm:$0xff] }
  0x2f   : > { %v397_v28 = vpack.c.bf16 %v389_v27, %v388_v26  ;;  %v685_v9 = vld [vmem:[#allocation2 + $0x190] sm:$0xff]  ;;  %v555_v12 = vld [vmem:[#allocation2 + $0x98] sm:$0xff] }
  0x30   : > { %v734_v14 = vld [vmem:[#allocation2 + $0x210] sm:$0xff]  ;;  %v487_v18 = vld [vmem:[#allocation2 + $0x18] sm:$0xff] }
  0x3c   : > { %2556 = vmatmul.msk.bf16.gmra.mxu0 %vm403_vm2, %v391_v10 }
  0x4c   : > { %2557 = vmatmul.msk.bf16.gmra.mxu0 %vm403_vm2, %v392_v13 }
  0x5c   : > { %2558 = vmatmul.msk.bf16.gmra.mxu0 %vm403_vm2, %v393_v16 }
  0x6c   : > { %2559 = vmatmul.msk.bf16.gmra.mxu0 %vm403_vm2, %v394_v19 }
  0x7c   : > { %2560 = vmatmul.msk.bf16.gmra.mxu0 %vm403_vm2, %v395_v22 }
  0x8c   : > { %2561 = vmatmul.msk.bf16.gmra.mxu0 %vm403_vm2, %v396_v25  ;;  %v604_v25 = vld [vmem:[#allocation2 + $0x118] sm:$0xff] }
  0x9c   : > { %2562 = vmatmul.msk.bf16.gmra.mxu0 %vm403_vm2, %v397_v28 }
  0xa9   : > { %v444_v29 = vpop.f32.mrf.mxu0 }
  0xaa   : > { %v3258_v36 = vadd.f32 %v3252_v32, %v444_v29 }
  0xac   : > { %v516_v38 = vrot.slane %v3258_v36, 7  ;;  %v649_v6 = vrot.slane %v3258_v36, 1 }
  0xb1   : > { %v446_v30 = vpop.f32.mrf.mxu0 }
  0xb2   : > { %v447_v33 = vadd.f32 %v3252_v32, %v446_v30  ;;  %v686_v30 = vld [vmem:[#allocation2 + $0x198] sm:$0xff] }
  0xb4   : > { %v517_v37 = vrot.slane %v447_v33, 7  ;;  %v650_v47 = vrot.slane %v447_v33, 1  ;;  %v501_v51 = vmul.f32 %v485_v43, %v447_v33  ;;  %v488_v43 = vld [vmem:[#allocation2 + $0x20] sm:$0xff] }
  0xb6   : > { %v3267_v40 = vsel %vm534_vm3, %v516_v38, %v517_v37  ;;  %v3293_v13 = vsel %vm665_vm4, %v649_v6, %v650_v47 }
  0xb7   : > { %v569_v46 = vmul.f32 %v553_v41, %v3267_v40  ;;  %v750_v23 = vmul.f32 %v734_v14, %v3293_v13  ;;  %v606_v14 = vld [vmem:[#allocation2 + $0x128] sm:$0xff] }
  0xb9   : > { %v449_v35 = vpop.f32.mrf.mxu0  ;;  %v585_v55 = vadd.f32 %v569_v46, %v501_v51 }
  0xba   : > { %v450_v39 = vadd.f32 %v3252_v32, %v449_v35  ;;  %v556_v35 = vld [vmem:[#allocation2 + $0xa0] sm:$0xff] }
  0xbc   : > { %v651_v44 = vrot.slane %v450_v39, 1  ;;  %v518_v48 = vrot.slane %v450_v39, 7  ;;  %v502_v5 = vmul.f32 %v486_v62, %v450_v39  ;;  %v557_v62 = vld [vmem:[#allocation2 + $0xa8] sm:$0xff] }
  0xbe   : > { %v679_v53 = vsel %vm665_vm4, %v650_v47, %v651_v44  ;;  %v3278_v57 = vsel %vm534_vm3, %v517_v37, %v518_v48  ;;  %v735_v37 = vld [vmem:[#allocation2 + $0x218] sm:$0xff] }
  0xbf   : > { %v700_v61 = vmul.f32 %v684_v54, %v679_v53  ;;  %v570_v1 = vmul.f32 %v554_v58, %v3278_v57 }
  0xc1   : > { %v451_v42 = vpop.f32.mrf.mxu0  ;;  %v586_v10 = vadd.f32 %v570_v1, %v502_v5 }
  0xc2   : > { %v452_v45 = vadd.f32 %v3252_v32, %v451_v42 }
  0xc4   : > { %v519_v49 = vrot.slane %v452_v45, 7  ;;  %v652_v63 = vrot.slane %v452_v45, 1  ;;  %v503_v26 = vmul.f32 %v487_v18, %v452_v45 }
  0xc6   : > { %v547_v52 = vsel %vm534_vm3, %v518_v48, %v519_v49  ;;  %v678_v8 = vsel %vm665_vm4, %v651_v44, %v652_v63  ;;  %v751_v48 = vmul.f32 %v735_v37, %v679_v53  ;;  %v607_v37 = vld [vmem:[#allocation2 + $0x130] sm:$0xff] }
  0xc7   : > { %v618_v56 = vmul.f32 %v602_v50, %v547_v52  ;;  %v701_v17 = vmul.f32 %v685_v9, %v678_v8  ;;  %v571_v21 = vmul.f32 %v555_v12, %v547_v52  ;;  %v605_v50 = vld [vmem:[#allocation2 + $0x120] sm:$0xff] }
  0xc9   : > { %v454_v59 = vpop.f32.mrf.mxu0  ;;  %v634_v60 = vadd.f32 %v618_v56, %v585_v55  ;;  %v587_v31 = vadd.f32 %v571_v21, %v503_v26  ;;  %v687_v56 = vld [vmem:[#allocation2 + $0x1a0] sm:$0xff] }
  0xca   : > { %v455_v0 = vadd.f32 %v3252_v32, %v454_v59 }
  0xcb   : > { %v3282_v2 = vadd.f32 %v700_v61, %v634_v60 }
  0xcc   : > { %v520_v3 = vrot.slane %v455_v0, 7  ;;  %v653_v19 = vrot.slane %v455_v0, 1  ;;  %v504_v51 = vmul.f32 %v488_v43, %v455_v0 }
  0xce   : > { %v546_v7 = vsel %vm534_vm3, %v519_v49, %v520_v3  ;;  %v677_v29 = vsel %vm665_vm4, %v652_v63, %v653_v19  ;;  %v736_v63 = vld [vmem:[#allocation2 + $0x220] sm:$0xff] }
  0xcf   : > { %v619_v11 = vmul.f32 %v603_v4, %v546_v7  ;;  %v702_v42 = vmul.f32 %v686_v30, %v677_v29  ;;  %v572_v45 = vmul.f32 %v556_v35, %v546_v7  ;;  %v489_v4 = vld [vmem:[#allocation2 + $0x28] sm:$0xff] }
  0xd1   : > { %v456_v15 = vpop.f32.mrf.mxu0  ;;  %v635_v16 = vadd.f32 %v619_v11, %v586_v10  ;;  %v588_v58 = vadd.f32 %v572_v45, %v504_v51  ;;  %v752_v11 = vmul.f32 %v736_v63, %v678_v8  ;;  %v738_v51 = vld [vmem:[#allocation2 + $0x230] sm:$0xff] }
  0xd2   : > { %v457_v20 = vadd.f32 %v3252_v32, %v456_v15 }
  0xd3   : > { %v717_v22 = vadd.f32 %v701_v17, %v635_v16 }
  0xd4   : > { %v521_v24 = vrot.slane %v457_v20, 7  ;;  %v654_v44 = vrot.slane %v457_v20, 1  ;;  %v505_v15 = vmul.f32 %v489_v4, %v457_v20 }
  0xd5   : > { %v766_v27 = vadd.f32 %v750_v23, %v717_v22  ;;  %v558_v23 = vld [vmem:[#allocation2 + $0xb0] sm:$0xff] }
  0xd6   : > { %v545_v28 = vsel %vm534_vm3, %v520_v3, %v521_v24  ;;  %v3306_v55 = vsel %vm665_vm4, %v653_v19, %v654_v44  ;;  %v688_v19 = vld [vmem:[#allocation2 + $0x1a8] sm:$0xff] }
  0xd7   : > { %v620_v33 = vmul.f32 %v604_v25, %v545_v28  ;;  %v782_v59 = vmax.f32 %v766_v27, 0.0  ;;  %v703_v0 = vmul.f32 %v687_v56, %v3306_v55  ;;  %v573_v9 = vmul.f32 %v557_v62, %v545_v28  ;;  %v490_v27 = vld [vmem:[#allocation2 + $0x30] sm:$0xff] }
  0xd8   : > { %v754_v4 = vmul.f32 %v738_v51, %v3306_v55 }
  0xd9   : > { %v459_v39 = vpop.f32.mrf.mxu0  ;;  %v636_v41 = vadd.f32 %v620_v33, %v587_v31  ;;  %v589_v21 = vadd.f32 %v573_v9, %v505_v15 }
  0xda   : > { %v460_v46 = vadd.f32 %v3252_v32, %v459_v39 }
  0xdb   : > { %v718_v47 = vadd.f32 %v702_v42, %v636_v41 }
  0xdc   : > { %v522_v49 = vrot.slane %v460_v46, 7  ;;  %v655_v5 = vrot.slane %v460_v46, 1  ;;  %v506_v39 = vmul.f32 %v490_v27, %v460_v46  ;;  %v2769_v27 = vld [vmem:[#allocation9 + $0x64] sm:$0xf] }
  0xdd   : > { %v767_v52 = vadd.f32 %v751_v48, %v718_v47 }
  0xde   : > { %v544_v54 = vsel %vm534_vm3, %v521_v24, %v522_v49  ;;  %v3319_v18 = vsel %vm665_vm4, %v654_v44, %v655_v5  ;;  %v737_v24 = vld [vmem:[#allocation2 + $0x228] sm:$0xff]  ;;  %v689_v44 = vld [vmem:[#allocation2 + $0x1b0] sm:$0xff] }
  0xdf   : > { %v783_v60 = vmax.f32 %v767_v52, 0.0  ;;  %v621_v61 = vmul.f32 %v605_v50, %v544_v54  ;;  %v704_v8 = vmul.f32 %v688_v19, %v3319_v18  ;;  %v574_v30 = vmul.f32 %v558_v23, %v544_v54  ;;  %v559_v50 = vld [vmem:[#allocation2 + $0xb8] sm:$0xff]  ;;  %v2772_v54 = vld [vmem:[#allocation9 + $0x74] sm:$0xf0] }
  0xe0   : > { %v753_v33 = vmul.f32 %v737_v24, %v677_v29  ;;  %v2621_v52 = vld [vmem:[#allocation9 + $0x70] sm:$0xf] }
  0xe1   : > { %v461_v1 = vpop.f32.mrf.mxu0  ;;  %v3308_v53 = vpack.c.bf16 %v783_v60, %v782_v59  ;;  %v637_v3 = vadd.f32 %v621_v61, %v588_v58  ;;  %v590_v45 = vadd.f32 %v574_v30, %v506_v39  ;;  %v491_v59 = vld [vmem:[#allocation2 + $0x38] sm:$0xff]  ;;  %v2622_v62 = vor.u32 %v2772_v54, %v2621_v52  ;;  %v2615_v30 = vld [vmem:[#allocation9 + $0x68] sm:$0xf0]  ;;  %v2607_v52 = vld [vmem:[#allocation9 + $0x58] sm:$0xf0] }
  0xe2   : > { %v3312_v7 = vadd.f32 %v3252_v32, %v461_v1  ;;  %v2771_v1 = vld [vmem:[#allocation9 + $0x74] sm:$0xf] }
  0xe3   : > { %v719_v10 = vadd.f32 %v703_v0, %v637_v3  ;;  %v2623_v3 = vld [vmem:[#allocation9 + $0x78] sm:$0xf0]  ;;  %2805 = vmatpush.bf16.msra.mxu3 %v2622_v62  ;;  %906 = vmatpush.bf16.msra.mxu1 %v2622_v62  ;;  %v690_v24 = vld [vmem:[#allocation2 + $0x1b8] sm:$0xff] }
  0xe4   : > { %v523_v12 = vrot.slane %v3312_v7, 7  ;;  %v656_v20 = vrot.slane %v3312_v7, 1  ;;  %v507_v15 = vmul.f32 %v491_v59, %v3312_v7  ;;  %v562_v59 = vld [vmem:[#allocation2 + $0xd0] sm:$0xff]  ;;  %v609_v62 = vld [vmem:[#allocation2 + $0x140] sm:$0xff] }
  0xe5   : > { %v768_v16 = vadd.f32 %v752_v11, %v719_v10  ;;  %v561_v10 = vld [vmem:[#allocation2 + $0xc8] sm:$0xff] }
  0xe6   : > { %v543_v17 = vsel %vm534_vm3, %v522_v49, %v523_v12  ;;  %v3331_v43 = vsel %vm665_vm4, %v655_v5, %v656_v20  ;;  %v493_v5 = vld [vmem:[#allocation2 + $0x48] sm:$0xff] }
  0xe7   : > { %v622_v22 = vmul.f32 %v606_v14, %v543_v17  ;;  %v784_v47 = vmax.f32 %v768_v16, 0.0  ;;  %v705_v58 = vmul.f32 %v689_v44, %v3331_v43  ;;  %v575_v63 = vmul.f32 %v559_v50, %v543_v17  ;;  %v608_v14 = vld [vmem:[#allocation2 + $0x138] sm:$0xff]  ;;  %v2613_v16 = vld [vmem:[#allocation9 + $0x60] sm:$0xf]  ;;  %v2770_v17 = vld [vmem:[#allocation9 + $0x64] sm:$0xf0] }
  0xe8   : > { %v2605_v44 = vld [vmem:[#allocation9 + $0x50] sm:$0xf] }
  0xe9   : > { %v464_v25 = vpop.f32.mrf.mxu0  ;;  %v638_v26 = vadd.f32 %v622_v22, %v589_v21  ;;  %v560_v21 = vld [vmem:[#allocation2 + $0xc0] sm:$0xff]  ;;  %v2614_v22 = vor.u32 %v2770_v17, %v2613_v16  ;;  %v591_v7 = vadd.f32 %v575_v63, %v507_v15  ;;  %v2765_v16 = vld [vmem:[#allocation9 + $0x44] sm:$0xf]  ;;  %v2599_v17 = vld [vmem:[#allocation9 + $0x48] sm:$0xf0] }
  0xea   : > { %v3324_v28 = vadd.f32 %v3252_v32, %v464_v25 }
  0xeb   : > { %v720_v31 = vadd.f32 %v704_v8, %v638_v26  ;;  %2806 = vmatpush.bf16.msra.mxu3 %v2614_v22  ;;  %907 = vmatpush.bf16.msra.mxu1 %v2614_v22  ;;  %v740_v22 = vld [vmem:[#allocation2 + $0x240] sm:$0xff] }
  0xec   : > { %v524_v35 = vrot.slane %v3324_v28, 7  ;;  %v657_v60 = vrot.slane %v3324_v28, 1 }
  0xed   : > { %v769_v41 = vadd.f32 %v753_v33, %v720_v31  ;;  %v492_v33 = vld [vmem:[#allocation2 + $0x40] sm:$0xff] }
  0xee   : > { %v542_v42 = vsel %vm534_vm3, %v523_v12, %v524_v35  ;;  %v3343_v12 = vor.u32 %v2771_v1, %v2623_v3  ;;  %v3353_v23 = vsel %vm665_vm4, %v656_v20, %v657_v60  ;;  %v508_v51 = vmul.f32 %v492_v33, %v3324_v28  ;;  %v2597_v1 = vld [vmem:[#allocation9 + $0x40] sm:$0xf]  ;;  %v2766_v3 = vld [vmem:[#allocation9 + $0x44] sm:$0xf0]  ;;  %v2763_v33 = vld [vmem:[#allocation9 + $0x34] sm:$0xf] }
  0xef   : > { %v785_v48 = vmax.f32 %v769_v41, 0.0  ;;  %v623_v49 = vmul.f32 %v607_v37, %v542_v42  ;;  %v739_v37 = vld [vmem:[#allocation2 + $0x238] sm:$0xff]  ;;  %v576_v20 = vmul.f32 %v560_v21, %v542_v42 }
  0xf0   : > { %955 = vmatpush.bf16.msra.mxu2 %v3343_v12  ;;  %v755_v42 = vmul.f32 %v739_v37, %v3319_v18  ;;  %v2598_v18 = vor.u32 %v2766_v3, %v2597_v1  ;;  %v2591_v37 = vld [vmem:[#allocation9 + $0x38] sm:$0xf0] }
  0xf1   : > { %v466_v29 = vpop.f32.mrf.mxu0  ;;  %v3333_v56 = vpack.c.bf16 %v785_v48, %v784_v47  ;;  %v639_v46 = vadd.f32 %v623_v49, %v590_v45  ;;  %v2768_v45 = vld [vmem:[#allocation9 + $0x54] sm:$0xf0]  ;;  %v706_v48 = vmul.f32 %v690_v24, %v3353_v23  ;;  %v592_v63 = vadd.f32 %v576_v20, %v508_v51  ;;  %v2581_v51 = vld [vmem:[#allocation9 + $0x20] sm:$0xf] }
  0xf2   : > { %v3338_v61 = vadd.f32 %v3252_v32, %v466_v29  ;;  %v2606_v50 = vor.u32 %v2768_v45, %v2605_v44  ;;  %v2767_v29 = vld [vmem:[#allocation9 + $0x54] sm:$0xf] }
  0xf3   : > { %v721_v0 = vadd.f32 %v705_v58, %v639_v46  ;;  %v494_v46 = vld [vmem:[#allocation2 + $0x50] sm:$0xff]  ;;  %v495_v44 = vld [vmem:[#allocation2 + $0x58] sm:$0xff] }
  0xf4   : > { %v525_v9 = vrot.slane %v3338_v61, 7  ;;  %v658_v11 = vrot.slane %v3338_v61, 1  ;;  %v509_v26 = vmul.f32 %v493_v5, %v3338_v61  ;;  %2807 = vmatpush.bf16.msra.mxu3 %v2606_v50  ;;  %908 = vmatpush.bf16.msra.mxu1 %v2606_v50  ;;  %v3373_v61 = vor.u32 %v2767_v29, %v2607_v52  ;;  %v610_v50 = vld [vmem:[#allocation2 + $0x148] sm:$0xff]  ;;  %v2762_v29 = vld [vmem:[#allocation9 + $0x24] sm:$0xf0] }
  0xf5   : > { %v3346_v19 = vadd.f32 %v754_v4, %v721_v0 }
  0xf6   : > { %v541_v55 = vsel %vm534_vm3, %v524_v35, %v525_v9  ;;  %v3357_v25 = vsel %vm665_vm4, %v657_v60, %v658_v11  ;;  %v3360_v35 = vor.u32 %v2769_v27, %v2615_v30 }
  0xf7   : > { %v577_v8 = vmul.f32 %v561_v10, %v541_v55  ;;  %v624_v31 = vmul.f32 %v608_v14, %v541_v55  ;;  %v786_v4 = vmax.f32 %v3346_v19, 0.0  ;;  %v691_v10 = vld [vmem:[#allocation2 + $0x1c0] sm:$0xff] }
  0xf8   : > { %956 = vmatpush.bf16.msra.mxu2 %v3360_v35  ;;  %2808 = vmatpush.bf16.msra.mxu3 %v2598_v18  ;;  %v707_v27 = vmul.f32 %v691_v10, %v3357_v25  ;;  %v2760_v10 = vld [vmem:[#allocation9 + $0x14] sm:$0xf0] }
  0xf9   : > { %v3362_v39 = vadd.f32 %v577_v8, %v509_v26  ;;  %v469_v41 = vpop.f32.mrf.mxu0  ;;  %v640_v47 = vadd.f32 %v624_v31, %v591_v7  ;;  %909 = vmatpush.bf16.msra.mxu1 %v2598_v18  ;;  %v2589_v7 = vld [vmem:[#allocation9 + $0x30] sm:$0xf]  ;;  %v2764_v26 = vld [vmem:[#allocation9 + $0x34] sm:$0xf0] }
  0xfa   : > { %v3366_v49 = vadd.f32 %v3252_v32, %v469_v41  ;;  %v2590_v31 = vor.u32 %v2764_v26, %v2589_v7  ;;  %v756_v41 = vmul.f32 %v740_v22, %v3331_v43  ;;  %v2565_v22 = vld [vmem:[#allocation9] sm:$0xf]  ;;  %v2757_v26 = vld [vmem:[#allocation9 + $0x4] sm:$0xf] }
  0xfb   : > { %v722_v54 = vadd.f32 %v706_v48, %v640_v47  ;;  %v563_v47 = vld [vmem:[#allocation2 + $0xd8] sm:$0xff]  ;;  %v3399_v48 = vor.u32 %v2763_v33, %v2591_v37  ;;  %v611_v33 = vld [vmem:[#allocation2 + $0x150] sm:$0xff] }
  0xfc   : > { %v526_v58 = vrot.slane %v3366_v49, 7  ;;  %v659_v60 = vrot.slane %v3366_v49, 1  ;;  %957 = vmatpush.bf16.msra.mxu2 %v3373_v61  ;;  %v510_v14 = vmul.f32 %v494_v46, %v3366_v49  ;;  %2809 = vmatpush.bf16.msra.mxu3 %v2590_v31  ;;  %v692_v46 = vld [vmem:[#allocation2 + $0x1c8] sm:$0xff] }
  0xfd   : > { %v771_v28 = vadd.f32 %v755_v42, %v722_v54  ;;  %910 = vmatpush.bf16.msra.mxu1 %v2590_v31  ;;  %v2582_v42 = vor.u32 %v2762_v29, %v2581_v51  ;;  %v742_v29 = vld [vmem:[#allocation2 + $0x250] sm:$0xff] }
  0xfe   : > { %v540_v0 = vsel %vm534_vm3, %v525_v9, %v526_v58  ;;  %v3383_v5 = vsel %vm665_vm4, %v658_v11, %v659_v60  ;;  %v3386_v9 = vor.u32 %v2765_v16, %v2599_v17 }
  0xff   : > { %v578_v15 = vmul.f32 %v562_v59, %v540_v0  ;;  %v787_v21 = vmax.f32 %v771_v28, 0.0  ;;  %v625_v55 = vmul.f32 %v609_v62, %v540_v0  ;;  %v2761_v62 = vld [vmem:[#allocation9 + $0x24] sm:$0xf]  ;;  %v708_v16 = vmul.f32 %v692_v46, %v3383_v5 }
 0x100   : > { %958 = vmatpush.bf16.msra.mxu2 %v3386_v9  ;;  %2810 = vmatpush.bf16.msra.mxu3 %v2582_v42  ;;  %v741_v0 = vld [vmem:[#allocation2 + $0x248] sm:$0xff] }
 0x101   : > { %v3388_v19 = vadd.f32 %v578_v15, %v510_v14  ;;  %v471_v24 = vpop.f32.mrf.mxu0  ;;  %v3390_v11 = vpack.c.bf16 %v787_v21, %v786_v4  ;;  %v641_v8 = vadd.f32 %v625_v55, %v592_v63  ;;  %v2583_v63 = vld [vmem:[#allocation9 + $0x28] sm:$0xf0]  ;;  %911 = vmatpush.bf16.msra.mxu1 %v2582_v42  ;;  %v2759_v14 = vld [vmem:[#allocation9 + $0x14] sm:$0xf]  ;;  %v2575_v55 = vld [vmem:[#allocation9 + $0x18] sm:$0xf0] }
 0x102   : > { %v3394_v30 = vadd.f32 %v3252_v32, %v471_v24  ;;  %v3406_v28 = vor.u32 %v2761_v62, %v2583_v63  ;;  %v2758_v24 = vld [vmem:[#allocation9 + $0x4] sm:$0xf0]  ;;  %v3414_v7 = vor.u32 %v2759_v14, %v2575_v55  ;;  %v612_v62 = vld [vmem:[#allocation2 + $0x158] sm:$0xff]  ;;  %v564_v14 = vld [vmem:[#allocation2 + $0xe0] sm:$0xff] }
 0x103   : > { %v723_v20 = vadd.f32 %v707_v27, %v641_v8  ;;  %v2567_v8 = vld [vmem:[#allocation9 + $0x8] sm:$0xf0]  ;;  %v2566_v31 = vor.u32 %v2758_v24, %v2565_v22  ;;  %v613_v55 = vld [vmem:[#allocation2 + $0x160] sm:$0xff] }
 0x104   : > { %v527_v45 = vrot.slane %v3394_v30, 7  ;;  %959 = vmatpush.bf16.msra.mxu2 %v3399_v48  ;;  %v511_v43 = vmul.f32 %v495_v44, %v3394_v30  ;;  %v660_v3 = vrot.slane %v3394_v30, 1  ;;  %v757_v30 = vmul.f32 %v741_v0, %v3353_v23  ;;  %v693_v23 = vld [vmem:[#allocation2 + $0x1d0] sm:$0xff] }
 0x105   : > { %v772_v52 = vadd.f32 %v756_v41, %v723_v20  ;;  %v3421_v41 = vor.u32 %v2757_v26, %v2567_v8 }
 0x106   : > { %v539_v54 = vsel %vm534_vm3, %v526_v58, %v527_v45  ;;  %v2573_v58 = vld [vmem:[#allocation9 + $0x10] sm:$0xf]  ;;  %v3427_v44 = vsel %vm665_vm4, %v659_v60, %v660_v3 }
 0x107   : > { %v579_v59 = vmul.f32 %v563_v47, %v539_v54  ;;  %v626_v1 = vmul.f32 %v610_v50, %v539_v54  ;;  %v2574_v21 = vor.u32 %v2760_v10, %v2573_v58  ;;  %v788_v47 = vmax.f32 %v772_v52, 0.0 }
 0x108   : > { %960 = vmatpush.bf16.msra.mxu2 %v3406_v28  ;;  %v709_v49 = vmul.f32 %v693_v23, %v3427_v44 }
 0x109   : > { %v595_v18 = vadd.f32 %v579_v59, %v511_v43  ;;  %v474_v4 = vpop.f32.mrf.mxu0  ;;  %v642_v15 = vadd.f32 %v626_v1, %v3362_v39  ;;  %2811 = vmatpush.bf16.msra.mxu3 %v2574_v21  ;;  %912 = vmatpush.bf16.msra.mxu1 %v2574_v21  ;;  %v758_v43 = vmul.f32 %v742_v29, %v3357_v25  ;;  %v694_v1 = vld [vmem:[#allocation2 + $0x1d8] sm:$0xff]  ;;  %v496_v21 = vld [vmem:[#allocation2 + $0x60] sm:$0xff] }
 0x10a   : > { %v3411_v17 = vadd.f32 %v3252_v32, %v474_v4  ;;  %v743_v4 = vld [vmem:[#allocation2 + $0x258] sm:$0xff] }
 0x10b   : > { %v724_v27 = vadd.f32 %v708_v16, %v642_v15  ;;  %v759_v16 = vmul.f32 %v743_v4, %v3383_v5 }
 0x10c   : > { %v528_v39 = vrot.slane %v3411_v17, 7  ;;  %961 = vmatpush.bf16.msra.mxu2 %v3414_v7  ;;  %v661_v46 = vrot.slane %v3411_v17, 1 }
 0x10d   : > { %v773_v37 = vadd.f32 %v757_v30, %v724_v27  ;;  %2812 = vmatpush.bf16.msra.mxu3 %v2566_v31  ;;  %913 = vmatpush.bf16.msra.mxu1 %v2566_v31  ;;  %v565_v27 = vld [vmem:[#allocation2 + $0xe8] sm:$0xff] }
 0x10e   : > { %v538_v20 = vsel %vm534_vm3, %v527_v45, %v528_v39 }
 0x10f   : > { %v789_v50 = vmax.f32 %v773_v37, 0.0  ;;  %v627_v51 = vmul.f32 %v611_v33, %v538_v20  ;;  %v580_v22 = vmul.f32 %v564_v14, %v538_v20  ;;  %v484_v33 = vld [vmem:[#allocation2] sm:$0xff]  ;;  %v497_v37 = vld [vmem:[#allocation2 + $0x68] sm:$0xff] }
 0x110   : > { %962 = vmatpush.bf16.msra.mxu2 %v3421_v41  ;;  %v683_v14 = vld [vmem:[#allocation2 + $0x180] sm:$0xff] }
 0x111   : > { %v476_v54 = vpop.f32.mrf.mxu0  ;;  %2813 = vmatpush.bf16.msrb.mxu3 %v3343_v12  ;;  %v3430_v45 = vpack.c.bf16 %v789_v50, %v788_v47  ;;  %v643_v42 = vadd.f32 %v627_v51, %v3388_v19  ;;  %v3443_v19 = vsel %vm665_vm4, %v660_v3, %v661_v46  ;;  %v695_v47 = vld [vmem:[#allocation2 + $0x1e0] sm:$0xff] }
 0x112   : > { %v477_v60 = vadd.f32 %v3252_v32, %v476_v54  ;;  %v710_v25 = vmul.f32 %v694_v1, %v3443_v19  ;;  %v552_v54 = vld [vmem:[#allocation2 + $0x80] sm:$0xff] }
 0x113   : > { %v725_v52 = vadd.f32 %v709_v49, %v643_v42  ;;  %v614_v49 = vld [vmem:[#allocation2 + $0x168] sm:$0xff] }
 0x114   : > { %v529_v59 = vrot.slane %v477_v60, 7  ;;  %v662_v26 = vrot.slane %v477_v60, 1 }
 0x115   : > { %2814 = vmatpush.bf16.msrb.mxu3 %v3360_v35  ;;  %v774_v12 = vadd.f32 %v758_v43, %v725_v52  ;;  %v513_v52 = vmul.f32 %v497_v37, %v477_v60  ;;  %v696_v60 = vld [vmem:[#allocation2 + $0x1e8] sm:$0xff]  ;;  %v615_v37 = vld [vmem:[#allocation2 + $0x170] sm:$0xff] }
 0x116   : > { %v537_v63 = vsel %vm534_vm3, %v528_v39, %v529_v59  ;;  %v3461_v23 = vsel %vm665_vm4, %v661_v46, %v662_v26 }
 0x117   : > { %v628_v0 = vmul.f32 %v612_v62, %v537_v63  ;;  %v790_v30 = vmax.f32 %v774_v12, 0.0  ;;  %v581_v50 = vmul.f32 %v565_v27, %v537_v63  ;;  %v711_v43 = vmul.f32 %v695_v47, %v3461_v23  ;;  %v733_v62 = vld [vmem:[#allocation2 + $0x208] sm:$0xff]  ;;  %v567_v63 = vld [vmem:[#allocation2 + $0xf8] sm:$0xff]  ;;  %v498_v27 = vld [vmem:[#allocation2 + $0x70] sm:$0xff] }
 0x119   : > { %v479_v58 = vpop.f32.mrf.mxu0  ;;  %2815 = vmatpush.bf16.msrb.mxu3 %v3373_v61  ;;  %v644_v10 = vadd.f32 %v628_v0, %v595_v18  ;;  %v512_v18 = vmul.f32 %v496_v21, %v3411_v17  ;;  %v597_v4 = vadd.f32 %v581_v50, %v513_v52 }
 0x11a   : > { %v3448_v35 = vadd.f32 %v3252_v32, %v479_v58 }
 0x11b   : > { %v726_v15 = vadd.f32 %v710_v25, %v644_v10  ;;  %v596_v31 = vadd.f32 %v580_v22, %v512_v18  ;;  %v745_v25 = vld [vmem:[#allocation2 + $0x268] sm:$0xff]  ;;  %v699_v18 = vmul.f32 %v683_v14, %v3293_v13  ;;  %v2687_v14 = vld [vmem:[#allocation9 + $0xf8] sm:$0xf0] }
 0x11c   : > { %v530_v3 = vrot.slane %v3448_v35, 7  ;;  %v663_v20 = vrot.slane %v3448_v35, 1 }
 0x11d   : > { %2816 = vmatpush.bf16.msrb.mxu3 %v3386_v9  ;;  %v775_v24 = vadd.f32 %v759_v16, %v726_v15  ;;  %v499_v15 = vld [vmem:[#allocation2 + $0x78] sm:$0xff] }
 0x11e   : > { %v536_v61 = vsel %vm534_vm3, %v529_v59, %v530_v3  ;;  %v744_v59 = vld [vmem:[#allocation2 + $0x260] sm:$0xff]  ;;  %v667_v1 = vsel %vm665_vm4, %v662_v26, %v663_v20 }
 0x11f   : > { %v629_v8 = vmul.f32 %v613_v55, %v536_v61  ;;  %v791_v39 = vmax.f32 %v775_v24, 0.0  ;;  %v760_v16 = vmul.f32 %v744_v59, %v3427_v44  ;;  %v712_v24 = vmul.f32 %v696_v60, %v667_v1 }
 0x121   : > { %v481_v5 = vpop.f32.mrf.mxu0  ;;  %2817 = vmatpush.bf16.msrb.mxu3 %v3399_v48  ;;  %v3463_v17 = vpack.c.bf16 %v791_v39, %v790_v30  ;;  %v645_v51 = vadd.f32 %v629_v8, %v596_v31  ;;  %v500_v48 = vmul.f32 %v484_v33, %v3258_v36  ;;  %v732_v8 = vld [vmem:[#allocation2 + $0x200] sm:$0xff] }
 0x122   : > { %v482_v9 = vadd.f32 %v3252_v32, %v481_v5  ;;  %v601_v32 = vld [vmem:[#allocation2 + $0x100] sm:$0xff]  ;;  %v616_v5 = vld [vmem:[#allocation2 + $0x178] sm:$0xff] }
 0x123   : > { %v727_v10 = vadd.f32 %v711_v43, %v645_v51  ;;  %v632_v13 = vmul.f32 %v616_v5, %v3267_v40  ;;  %v697_v43 = vld [vmem:[#allocation2 + $0x1f0] sm:$0xff] }
 0x124   : > { %v531_v29 = vrot.slane %v482_v9, 7  ;;  %v664_v42 = vrot.slane %v482_v9, 1 }
 0x125   : > { %2818 = vmatpush.bf16.msrb.mxu3 %v3406_v28  ;;  %v776_v39 = vadd.f32 %v760_v16, %v727_v10  ;;  %v2786_v16 = vld [vmem:[#allocation9 + $0xe4] sm:$0xf0] }
 0x126   : > { %v535_v46 = vsel %vm534_vm3, %v530_v3, %v531_v29  ;;  %v550_v12 = vsel %vm534_vm3, %v531_v29, %v516_v38  ;;  %v681_v0 = vsel %vm665_vm4, %v664_v42, %v649_v6  ;;  %v617_v38 = vmul.f32 %v601_v32, %v3278_v57  ;;  %v566_v3 = vld [vmem:[#allocation2 + $0xf0] sm:$0xff] }
 0x127   : > { %v568_v28 = vmul.f32 %v552_v54, %v550_v12  ;;  %v630_v58 = vmul.f32 %v614_v49, %v535_v46  ;;  %v749_v21 = vmul.f32 %v733_v62, %v681_v0  ;;  %v583_v55 = vmul.f32 %v567_v63, %v535_v46  ;;  %v746_v46 = vld [vmem:[#allocation2 + $0x270] sm:$0xff] }
 0x128   : > { %v761_v6 = vmul.f32 %v745_v25, %v3443_v19  ;;  %v666_v26 = vsel %vm665_vm4, %v663_v20, %v664_v42  ;;  %v515_v57 = vmul.f32 %v499_v15, %v482_v9  ;;  %v582_v33 = vmul.f32 %v566_v3, %v536_v61  ;;  %v698_v42 = vld [vmem:[#allocation2 + $0x1f8] sm:$0xff] }
 0x129   : > { %v646_v22 = vadd.f32 %v630_v58, %v597_v4  ;;  %v584_v36 = vadd.f32 %v568_v28, %v500_v48  ;;  %2819 = vmatpush.bf16.msrb.mxu3 %v3414_v7  ;;  %v765_v44 = vadd.f32 %v749_v21, %v3282_v2  ;;  %v748_v19 = vmul.f32 %v732_v8, %v666_v26  ;;  %v2679_v21 = vld [vmem:[#allocation9 + $0xe8] sm:$0xf0] }
 0x12a   : > { %v599_v47 = vadd.f32 %v583_v55, %v515_v57  ;;  %v514_v20 = vmul.f32 %v498_v27, %v3448_v35  ;;  %v792_v51 = vmax.f32 %v776_v39, 0.0  ;;  %v631_v9 = vmul.f32 %v615_v37, %v550_v12  ;;  %v2784_v55 = vld [vmem:[#allocation9 + $0xd4] sm:$0xf0]  ;;  %v2655_v37 = vld [vmem:[#allocation9 + $0xb8] sm:$0xf0] }
 0x12b   : > { %v728_v30 = vadd.f32 %v712_v24, %v646_v22  ;;  %v633_v31 = vadd.f32 %v617_v38, %v584_v36  ;;  %v781_v61 = vmax.f32 %v765_v44, 0.0  ;;  %v714_v62 = vmul.f32 %v698_v42, %v681_v0  ;;  %v2785_v38 = vld [vmem:[#allocation9 + $0xe4] sm:$0xf]  ;;  %v2783_v22 = vld [vmem:[#allocation9 + $0xd4] sm:$0xf] }
 0x12c   : > { %v598_v54 = vadd.f32 %v582_v33, %v514_v20  ;;  %v648_v52 = vadd.f32 %v632_v13, %v599_v47  ;;  %v713_v35 = vmul.f32 %v697_v43, %v666_v26  ;;  %v762_v12 = vmul.f32 %v746_v46, %v3461_v23  ;;  %v2685_v23 = vld [vmem:[#allocation9 + $0xf0] sm:$0xf]  ;;  %v2671_v24 = vld [vmem:[#allocation9 + $0xd8] sm:$0xf0]  ;;  %v2782_v26 = vld [vmem:[#allocation9 + $0xc4] sm:$0xf0] }
 0x12d   : > { %v777_v7 = vadd.f32 %v761_v6, %v728_v30  ;;  %v715_v50 = vadd.f32 %v699_v18, %v633_v31  ;;  %2820 = vmatpush.bf16.msrb.mxu3 %v3421_v41  ;;  %v747_v41 = vld [vmem:[#allocation2 + $0x278] sm:$0xff]  ;;  %v2682_v3 = vor.u32 %v2785_v38, %v2679_v21  ;;  %v2674_v36 = vor.u32 %v2783_v22, %v2671_v24  ;;  %v2661_v6 = vld [vmem:[#allocation9 + $0xc0] sm:$0xf]  ;;  %v2781_v18 = vld [vmem:[#allocation9 + $0xc4] sm:$0xf] }
 0x12e   : > { %v647_v32 = vadd.f32 %v631_v9, %v598_v54  ;;  %v730_v40 = vadd.f32 %v714_v62, %v648_v52  ;;  %v763_v60 = vmul.f32 %v747_v41, %v667_v1  ;;  %v2787_v1 = vld [vmem:[#allocation9 + $0xf4] sm:$0xf]  ;;  %v2662_v8 = vor.u32 %v2782_v26, %v2661_v6  ;;  %v2663_v44 = vld [vmem:[#allocation9 + $0xc8] sm:$0xf0]  ;;  %v2653_v30 = vld [vmem:[#allocation9 + $0xb0] sm:$0xf] }
 0x12f   : > { %v793_v2 = vmax.f32 %v777_v7, 0.0  ;;  %v764_v29 = vadd.f32 %v748_v19, %v715_v50  ;;  %v2690_v15 = vor.u32 %v2787_v1, %v2687_v14  ;;  %v2666_v57 = vor.u32 %v2781_v18, %v2663_v44  ;;  %v2780_v39 = vld [vmem:[#allocation9 + $0xb4] sm:$0xf0]  ;;  %v2779_v31 = vld [vmem:[#allocation9 + $0xb4] sm:$0xf]  ;;  %v1018_v6 = vld [vmem:[#allocation2 + $0x2e8] sm:$0xff] }
 0x130   : > { %v729_v63 = vadd.f32 %v713_v35, %v647_v32  ;;  %v779_v4 = vadd.f32 %v763_v60, %v730_v40  ;;  %v2654_v5 = vor.u32 %v2780_v39, %v2653_v30  ;;  %v2658_v47 = vor.u32 %v2779_v31, %v2655_v37  ;;  %v2645_v50 = vld [vmem:[#allocation9 + $0xa0] sm:$0xf]  ;;  %v2778_v19 = vld [vmem:[#allocation9 + $0xa4] sm:$0xf0]  ;;  %v2777_v20 = vld [vmem:[#allocation9 + $0xa4] sm:$0xf] }
 0x131   : > { %v802_v49 = vpack.c.bf16 %v793_v2, %v792_v51  ;;  %v780_v48 = vmax.f32 %v764_v29, 0.0  ;;  %1490 = vmatpush.bf16.msrb.mxu0 %v2690_v15  ;;  %v2647_v13 = vld [vmem:[#allocation9 + $0xa8] sm:$0xf0]  ;;  %v2646_v2 = vor.u32 %v2778_v19, %v2645_v50  ;;  %v820_v9 = vld [vmem:[#allocation10] sm:$0x3]  ;;  %v1200_v22 = vld [vmem:[#allocation2 + $0x400] sm:$0xff] }
 0x132   : > { %v778_v28 = vadd.f32 %v762_v12, %v729_v63  ;;  %v795_v58 = vmax.f32 %v779_v4, 0.0  ;;  %v2650_v29 = vor.u32 %v2777_v20, %v2647_v13  ;;  %v2637_v54 = vld [vmem:[#allocation9 + $0x90] sm:$0xf]  ;;  %v2776_v42 = vld [vmem:[#allocation9 + $0x94] sm:$0xf0]  ;;  %v3524_v15 = vperm.slane %v820_v9, 1 }
 0x133   : > { %944 = vmatmul.bf16.vlgmr.msra.gmra.mxu3 %v802_v49  ;;  %v796_v59 = vpack.c.bf16 %v781_v61, %v780_v48  ;;  %v2775_v48 = vld [vmem:[#allocation9 + $0x94] sm:$0xf]  ;;  %v2639_v61 = vld [vmem:[#allocation9 + $0x98] sm:$0xf0]  ;;  %v2629_v32 = vld [vmem:[#allocation9 + $0x80] sm:$0xf] }
 0x134   : > { %v794_v10 = vmax.f32 %v778_v28, 0.0  ;;  %v2642_v43 = vor.u32 %v2775_v48, %v2639_v61  ;;  %v2774_v62 = vld [vmem:[#allocation9 + $0x84] sm:$0xf0]  ;;  %v2773_v41 = vld [vmem:[#allocation9 + $0x84] sm:$0xf] }
 0x135   : > { %914 = vmatmul.bf16.vlgmr.msra.gmra.mxu1 %v796_v59  ;;  %963 = vmatmul.bf16.vlgmr.msra.gmra.mxu2 %v796_v59  ;;  %v3504_v59 = vperm.slane %v820_v9, 0  ;;  %v2631_v46 = vld [vmem:[#allocation9 + $0x88] sm:$0xf0]  ;;  %v2630_v60 = vor.u32 %v2774_v62, %v2629_v32  ;;  %v1083_v37 = vld [vmem:[#allocation2 + $0x368] sm:$0xff] }
 0x136   : > { %v803_v25 = vpack.c.bf16 %v795_v58, %v794_v10  ;;  %1491 = vmatpush.bf16.msrb.mxu0 %v2682_v3  ;;  %v2634_v12 = vor.u32 %v2773_v41, %v2631_v46  ;;  %v1120_v50 = vld [vmem:[#allocation2 + $0x388] sm:$0xff]  ;;  %v1263_v19 = vld [vmem:[#allocation2 + $0x4f0] sm:$0xff] }
 0x137   : > { %v1019_v48 = vld [vmem:[#allocation2 + $0x2f0] sm:$0xff] }
 0x13a   : > { %1492 = vmatpush.bf16.msrb.mxu0 %v2674_v36 }
 0x13e   : > { %1493 = vmatpush.bf16.msrb.mxu0 %v2666_v57 }
 0x142   : > { %1494 = vmatpush.bf16.msrb.mxu0 %v2658_v47 }
 0x143   : > { %949 = vmatmul.bf16.gmra.mxu3 %v803_v25 }
 0x145   : > { %919 = vmatmul.bf16.gmra.mxu1 %v3308_v53  ;;  %968 = vmatmul.bf16.gmra.mxu2 %v3308_v53  ;;  %v2788_v53 = vld [vmem:[#allocation9 + $0xf4] sm:$0xf0] }
 0x146   : > { %v2686_v0 = vor.u32 %v2788_v53, %v2685_v23  ;;  %1495 = vmatpush.bf16.msrb.mxu0 %v2650_v29  ;;  %v1119_v29 = vld [vmem:[#allocation2 + $0x380] sm:$0xff] }
 0x148   : > { %1441 = vmatpush.bf16.msra.mxu3 %v2686_v0 }
 0x14a   : > { %1496 = vmatpush.bf16.msrb.mxu0 %v2642_v43 }
 0x14e   : > { %1497 = vmatpush.bf16.msrb.mxu0 %v2634_v12 }
 0x153   : > { %993 = vmatmul.bf16.vlgmr.msrb.gmra.mxu3 %v802_v49  ;;  %v2638_v49 = vor.u32 %v2776_v42, %v2637_v54 }
 0x155   : > { %924 = vmatmul.bf16.gmra.mxu1 %v3333_v56  ;;  %973 = vmatmul.bf16.gmra.mxu2 %v3333_v56  ;;  %v2677_v56 = vld [vmem:[#allocation9 + $0xe0] sm:$0xf] }
 0x163   : > { %998 = vmatmul.bf16.gmra.mxu3 %v803_v25 }
 0x165   : > { %929 = vmatmul.bf16.gmra.mxu1 %v3390_v11  ;;  %978 = vmatmul.bf16.gmra.mxu2 %v3390_v11  ;;  %v2678_v11 = vor.u32 %v2786_v16, %v2677_v56  ;;  %v1005_v56 = vld [vmem:[#allocation2 + $0x280] sm:$0xff]  ;;  %v1006_v16 = vld [vmem:[#allocation2 + $0x288] sm:$0xff] }
 0x167   : > { %1442 = vmatpush.bf16.msra.mxu3 %v2678_v11  ;;  %v1071_v11 = vld [vmem:[#allocation2 + $0x308] sm:$0xff] }
 0x175   : > { %934 = vmatmul.bf16.gmra.mxu1 %v3430_v45  ;;  %983 = vmatmul.bf16.gmra.mxu2 %v3430_v45  ;;  %v2669_v45 = vld [vmem:[#allocation9 + $0xd0] sm:$0xf] }
 0x185   : > { %939 = vmatmul.bf16.gmra.mxu1 %v3463_v17  ;;  %988 = vmatmul.bf16.gmra.mxu2 %v3463_v17  ;;  %v2670_v17 = vor.u32 %v2784_v55, %v2669_v45 }
 0x187   : > { %1443 = vmatpush.bf16.msra.mxu3 %v2670_v17 }
 0x18b   : > { %1444 = vmatpush.bf16.msra.mxu3 %v2662_v8 }
 0x18f   : > { %1445 = vmatpush.bf16.msra.mxu3 %v2654_v5 }
 0x193   : > { %1446 = vmatpush.bf16.msra.mxu3 %v2646_v2 }
 0x197   : > { %1447 = vmatpush.bf16.msra.mxu3 %v2638_v49  ;;  %v1201_v49 = vld [vmem:[#allocation2 + $0x408] sm:$0xff] }
 0x19b   : > { %1448 = vmatpush.bf16.msra.mxu3 %v2630_v60 }
 0x1b2   : > { %v915_v27 = vpop.f32.mrf.mxu1 }
 0x1b3   : > { %v3508_v4 = vadd.f32 %v915_v27, %v3504_v59  ;;  %v1134_v27 = vld [vmem:[#allocation2 + $0x3f8] sm:$0xff] }
 0x1b5   : > { %v1037_v1 = vrot.slane %v3508_v4, 7  ;;  %v1167_v14 = vrot.slane %v3508_v4, 1  ;;  %v1021_v57 = vmul.f32 %v1005_v56, %v3508_v4 }
 0x1b6   : > { %v945_v33 = vpop.f32.mrf.mxu3 }
 0x1b7   : > { %v3514_v10 = vadd.f32 %v945_v33, %v3504_v59 }
 0x1b8   : > { %v3502_v7 = vpop.f32.mrf.mxu2 }
 0x1b9   : > { %v1049_v45 = vrot.slane %v3514_v10, 7  ;;  %v1179_v36 = vrot.slane %v3514_v10, 1  ;;  %v3551_v30 = vadd.f32 %v3502_v7, %v3524_v15 }
 0x1ba   : > { %v917_v51 = vpop.f32.mrf.mxu1 }
 0x1bb   : > { %v918_v35 = vadd.f32 %v917_v51, %v3504_v59  ;;  %v1007_v51 = vld [vmem:[#allocation2 + $0x290] sm:$0xff] }
 0x1bd   : > { %v1038_v28 = vrot.slane %v918_v35, 7  ;;  %v1168_v25 = vrot.slane %v918_v35, 1  ;;  %v1022_v39 = vmul.f32 %v1006_v16, %v918_v35 }
 0x1be   : > { %v947_v52 = vpop.f32.mrf.mxu3 }
 0x1bf   : > { %v3511_v58 = vadd.f32 %v947_v52, %v3504_v59  ;;  %v1067_v38 = vsel %vm534_vm3, %v1037_v1, %v1038_v28  ;;  %v3537_v55 = vsel %vm665_vm4, %v1167_v14, %v1168_v25  ;;  %v1084_v52 = vld [vmem:[#allocation2 + $0x370] sm:$0xff] }
 0x1c0   : > { %v966_v40 = vpop.f32.mrf.mxu2  ;;  %v1087_v31 = vmul.f32 %v1071_v11, %v1067_v38  ;;  %v3554_v5 = vmul.f32 %v1200_v22, %v3537_v55  ;;  %v1150_v54 = vmul.f32 %v1134_v27, %v1067_v38  ;;  %v1250_v22 = vld [vmem:[#allocation2 + $0x488] sm:$0xff] }
 0x1c1   : > { %v1050_v21 = vrot.slane %v3511_v58, 7  ;;  %v1180_v3 = vrot.slane %v3511_v58, 1  ;;  %v1034_v20 = vmul.f32 %v1018_v6, %v3511_v58  ;;  %v3573_v13 = vadd.f32 %v966_v40, %v3524_v15  ;;  %v1020_v40 = vld [vmem:[#allocation2 + $0x2f8] sm:$0xff] }
 0x1c2   : > { %v920_v63 = vpop.f32.mrf.mxu1  ;;  %v1103_v62 = vadd.f32 %v1087_v31, %v1022_v39 }
 0x1c3   : > { %v3517_v23 = vadd.f32 %v920_v63, %v3504_v59  ;;  %v3560_v33 = vsel %vm534_vm3, %v1049_v45, %v1050_v21  ;;  %v3569_v7 = vsel %vm665_vm4, %v1179_v36, %v1180_v3 }
 0x1c4   : > { %v1099_v41 = vmul.f32 %v1083_v37, %v3560_v33  ;;  %v3594_v46 = vmul.f32 %v1263_v19, %v3569_v7  ;;  %v1072_v37 = vld [vmem:[#allocation2 + $0x310] sm:$0xff] }
 0x1c5   : > { %v1039_v17 = vrot.slane %v3517_v23, 7  ;;  %v1169_v26 = vrot.slane %v3517_v23, 1  ;;  %v3597_v63 = vmul.f32 %v1007_v51, %v3517_v23 }
 0x1c6   : > { %v950_v53 = vpop.f32.mrf.mxu3 }
 0x1c7   : > { %v3521_v0 = vadd.f32 %v950_v53, %v3504_v59  ;;  %v1066_v2 = vsel %vm534_vm3, %v1038_v28, %v1039_v17  ;;  %v3581_v42 = vsel %vm665_vm4, %v1168_v25, %v1169_v26  ;;  %v1070_v28 = vld [vmem:[#allocation2 + $0x300] sm:$0xff]  ;;  %v1085_v25 = vld [vmem:[#allocation2 + $0x378] sm:$0xff]  ;;  %v1132_v53 = vld [vmem:[#allocation2 + $0x3e8] sm:$0xff] }
 0x1c8   : > { %v3543_v8 = vpop.f32.mrf.mxu2  ;;  %v1135_v60 = vmul.f32 %v1119_v29, %v1066_v2  ;;  %v1217_v16 = vmul.f32 %v1201_v49, %v3581_v42 }
 0x1c9   : > { %v1051_v18 = vrot.slane %v3521_v0, 7  ;;  %v1035_v38 = vmul.f32 %v1019_v48, %v3521_v0  ;;  %v1181_v6 = vrot.slane %v3521_v0, 1 }
 0x1ca   : > { %v922_v24 = vpop.f32.mrf.mxu1 }
 0x1cb   : > { %v3546_v44 = vadd.f32 %v922_v24, %v3504_v59  ;;  %v3585_v61 = vsel %vm534_vm3, %v1050_v21, %v1051_v18  ;;  %v1133_v24 = vld [vmem:[#allocation2 + $0x3f0] sm:$0xff] }
 0x1cc   : > { %v1100_v11 = vmul.f32 %v1084_v52, %v3585_v61 }
 0x1cd   : > { %v1040_v47 = vrot.slane %v3546_v44, 7 }
 0x1ce   : > { %v952_v9 = vpop.f32.mrf.mxu3  ;;  %v1116_v52 = vadd.f32 %v1100_v11, %v1035_v38 }
 0x1cf   : > { %v1065_v43 = vsel %vm534_vm3, %v1039_v17, %v1040_v47  ;;  %v953_v32 = vadd.f32 %v952_v9, %v3504_v59 }
 0x1d0   : > { %v1136_v35 = vmul.f32 %v1120_v50, %v1065_v43  ;;  %v3613_v0 = vpop.f32.mrf.mxu2 }
 0x1d1   : > { %v1052_v12 = vrot.slane %v953_v32, 7  ;;  %v1182_v56 = vrot.slane %v953_v32, 1  ;;  %v1036_v50 = vmul.f32 %v1020_v40, %v953_v32  ;;  %v1214_v32 = vld [vmem:[#allocation2 + $0x470] sm:$0xff]  ;;  %v1115_v40 = vadd.f32 %v1099_v41, %v1034_v20 }
 0x1d2   : > { %v1152_v21 = vadd.f32 %v1136_v35, %v1103_v62  ;;  %v925_v17 = vpop.f32.mrf.mxu1  ;;  %v1215_v35 = vld [vmem:[#allocation2 + $0x478] sm:$0xff]  ;;  %v1121_v20 = vld [vmem:[#allocation2 + $0x390] sm:$0xff] }
 0x1d3   : > { %v1053_v27 = vsel %vm534_vm3, %v1051_v18, %v1052_v12  ;;  %v1068_v39 = vsel %vm534_vm3, %v1052_v12, %v1037_v1  ;;  %v1198_v31 = vsel %vm665_vm4, %v1182_v56, %v1167_v14  ;;  %v3616_v18 = vadd.f32 %v925_v17, %v3504_v59 }
 0x1d4   : > { %v1086_v19 = vmul.f32 %v1070_v28, %v1068_v39  ;;  %v1101_v51 = vmul.f32 %v1085_v25, %v1053_v27  ;;  %v1148_v29 = vmul.f32 %v1132_v53, %v1053_v27  ;;  %v1266_v9 = vmul.f32 %v1250_v22, %v1198_v31  ;;  %v1073_v28 = vld [vmem:[#allocation2 + $0x318] sm:$0xff]  ;;  %v1249_v25 = vld [vmem:[#allocation2 + $0x480] sm:$0xff] }
 0x1d5   : > { %v1233_v49 = vadd.f32 %v1217_v16, %v1152_v21  ;;  %v1149_v48 = vmul.f32 %v1133_v24, %v1068_v39  ;;  %v1183_v4 = vsel %vm665_vm4, %v1181_v6, %v1182_v56  ;;  %v1088_v12 = vmul.f32 %v1072_v37, %v1066_v2  ;;  %v1264_v22 = vld [vmem:[#allocation2 + $0x4f8] sm:$0xff] }
 0x1d6   : > { %v1102_v1 = vadd.f32 %v1086_v19, %v1021_v57  ;;  %v1117_v62 = vadd.f32 %v1101_v51, %v1036_v50  ;;  %v3620_v14 = vpop.f32.mrf.mxu3  ;;  %v1041_v53 = vrot.slane %v3616_v18, 7  ;;  %v1184_v16 = vsel %vm665_vm4, %v1180_v3, %v1181_v6  ;;  %v1008_v24 = vld [vmem:[#allocation2 + $0x298] sm:$0xff] }
 0x1d7   : > { %v1282_v38 = vadd.f32 %v1266_v9, %v1233_v49  ;;  %v1165_v11 = vadd.f32 %v1149_v48, %v1116_v52  ;;  %v1230_v2 = vmul.f32 %v1214_v32, %v1183_v4  ;;  %v1231_v41 = vmul.f32 %v1215_v35, %v1198_v31  ;;  %v1122_v49 = vld [vmem:[#allocation2 + $0x398] sm:$0xff] }
 0x1d8   : > { %v1151_v57 = vadd.f32 %v1135_v60, %v1102_v1  ;;  %v1166_v21 = vadd.f32 %v1150_v54, %v1117_v62  ;;  %v3631_v56 = vsel %vm534_vm3, %v1040_v47, %v1041_v53  ;;  %v1164_v17 = vadd.f32 %v1148_v29, %v1115_v40  ;;  %v1213_v54 = vld [vmem:[#allocation2 + $0x468] sm:$0xff]  ;;  %v1203_v32 = vld [vmem:[#allocation2 + $0x418] sm:$0xff] }
 0x1d9   : > { %v1089_v58 = vmul.f32 %v1073_v28, %v1065_v43  ;;  %v1170_v27 = vrot.slane %v3546_v44, 1  ;;  %v1265_v3 = vmul.f32 %v1249_v25, %v1183_v4  ;;  %v1171_v39 = vrot.slane %v3616_v18, 1  ;;  %v1252_v25 = vld [vmem:[#allocation2 + $0x498] sm:$0xff] }
 0x1da   : > { %v927_v60 = vpop.f32.mrf.mxu1  ;;  %v1232_v6 = vadd.f32 %v3554_v5, %v1151_v57  ;;  %v1246_v47 = vadd.f32 %v1230_v2, %v1165_v11  ;;  %v1247_v50 = vadd.f32 %v1231_v41, %v1166_v21  ;;  %v1137_v31 = vmul.f32 %v1121_v20, %v3631_v56 }
 0x1db   : > { %v3637_v37 = vadd.f32 %v927_v60, %v3504_v59  ;;  %v1298_v51 = vadd.f32 %v1282_v38, %v3573_v13  ;;  %v1280_v43 = vmul.f32 %v1264_v22, %v1184_v16  ;;  %v1024_v29 = vmul.f32 %v1008_v24, %v3546_v44 }
 0x1dc   : > { %v1281_v19 = vadd.f32 %v1265_v3, %v1232_v6  ;;  %v3644_v5 = vadd.f32 %v3594_v46, %v1246_v47  ;;  %v1229_v48 = vmul.f32 %v1213_v54, %v1184_v16  ;;  %v1104_v52 = vadd.f32 %v1088_v12, %v3597_v63  ;;  %v3664_v63 = vpop.f32.mrf.mxu2  ;;  %v1074_v3 = vld [vmem:[#allocation2 + $0x320] sm:$0xff]  ;;  %v1075_v47 = vld [vmem:[#allocation2 + $0x328] sm:$0xff] }
 0x1dd   : > { %v1042_v9 = vrot.slane %v3637_v37, 7  ;;  %v3651_v1 = vsel %vm665_vm4, %v1169_v26, %v1170_v27  ;;  %v3656_v44 = vadd.f32 %v1280_v43, %v1247_v50  ;;  %v1105_v4 = vadd.f32 %v1089_v58, %v1024_v29  ;;  %v1202_v26 = vld [vmem:[#allocation2 + $0x410] sm:$0xff]  ;;  %v1009_v54 = vld [vmem:[#allocation2 + $0x2a0] sm:$0xff] }
 0x1de   : > { %v3653_v62 = vpop.f32.mrf.mxu3  ;;  %v1297_v13 = vadd.f32 %v1281_v19, %v3551_v30  ;;  %v3662_v46 = vsel %vm665_vm4, %v1170_v27, %v1171_v39  ;;  %v3668_v35 = vadd.f32 %v1229_v48, %v1164_v17  ;;  %v1314_v12 = vmax.f32 %v1298_v51, 0.0  ;;  %v1123_v19 = vld [vmem:[#allocation2 + $0x3a0] sm:$0xff] }
 0x1df   : > { %v1063_v23 = vsel %vm534_vm3, %v1041_v53, %v1042_v9  ;;  %v1153_v28 = vadd.f32 %v1137_v31, %v1104_v52  ;;  %v1218_v11 = vmul.f32 %v1202_v26, %v3651_v1  ;;  %v1219_v21 = vmul.f32 %v1203_v32, %v3662_v46  ;;  %v1251_v53 = vld [vmem:[#allocation2 + $0x490] sm:$0xff] }
 0x1e0   : > { %v1138_v40 = vmul.f32 %v1122_v49, %v1063_v23  ;;  %v1313_v30 = vmax.f32 %v1297_v13, 0.0  ;;  %v1268_v22 = vmul.f32 %v1252_v25, %v3581_v42  ;;  %v1267_v58 = vmul.f32 %v1251_v53, %v3537_v55  ;;  %v1010_v49 = vld [vmem:[#allocation2 + $0x2a8] sm:$0xff] }
 0x1e1   : > { %v1234_v2 = vadd.f32 %v1218_v11, %v1153_v28  ;;  %v972_v60 = vadd.f32 %v3613_v0, %v3524_v15  ;;  %v970_v42 = vadd.f32 %v3543_v8, %v3524_v15  ;;  %v1090_v51 = vmul.f32 %v1074_v3, %v3631_v56  ;;  %v1124_v56 = vld [vmem:[#allocation2 + $0x3a8] sm:$0xff] }
 0x1e2   : > { %v930_v16 = vpop.f32.mrf.mxu1  ;;  %v1329_v57 = vpack.c.bf16 %v1314_v12, %v1313_v30  ;;  %v1154_v38 = vadd.f32 %v1138_v40, %v1105_v4  ;;  %v1172_v55 = vrot.slane %v3637_v37, 1  ;;  %v1091_v13 = vmul.f32 %v1075_v47, %v1063_v23 }
 0x1e3   : > { %v3673_v20 = vadd.f32 %v930_v16, %v3504_v59  ;;  %v1283_v6 = vadd.f32 %v1267_v58, %v1234_v2  ;;  %v1026_v40 = vmul.f32 %v1010_v49, %v3637_v37  ;;  %v1254_v2 = vld [vmem:[#allocation2 + $0x4a8] sm:$0xff]  ;;  %v1011_v49 = vld [vmem:[#allocation2 + $0x2b0] sm:$0xff] }
 0x1e4   : > { %1449 = vmatmul.bf16.vlgmr.msra.gmra.mxu3 %v1329_v57  ;;  %1498 = vmatmul.bf16.vlgmr.msrb.gmra.mxu0 %v1329_v57  ;;  %v1235_v41 = vadd.f32 %v1219_v21, %v1154_v38  ;;  %v976_v50 = vpop.f32.mrf.mxu2  ;;  %v3698_v30 = vsel %vm665_vm4, %v1171_v39, %v1172_v55  ;;  %v1205_v57 = vld [vmem:[#allocation2 + $0x428] sm:$0xff]  ;;  %v1270_v47 = vmul.f32 %v1254_v2, %v3662_v46 }
 0x1e5   : > { %v1043_v17 = vrot.slane %v3673_v20, 7  ;;  %v1173_v0 = vrot.slane %v3673_v20, 1  ;;  %v1299_v26 = vadd.f32 %v1283_v6, %v970_v42  ;;  %v1107_v38 = vadd.f32 %v1091_v13, %v1026_v40  ;;  %v1253_v6 = vld [vmem:[#allocation2 + $0x4a0] sm:$0xff] }
 0x1e6   : > { %v999_v24 = vpop.f32.mrf.mxu3  ;;  %v1284_v27 = vadd.f32 %v1268_v22, %v1235_v41  ;;  %v975_v46 = vadd.f32 %v3664_v63, %v3524_v15  ;;  %v1126_v63 = vld [vmem:[#allocation2 + $0x3b8] sm:$0xff] }
 0x1e7   : > { %v1062_v31 = vsel %vm534_vm3, %v1042_v9, %v1043_v17  ;;  %v1000_v48 = vadd.f32 %v999_v24, %v3524_v15  ;;  %v1025_v9 = vmul.f32 %v1009_v54, %v3616_v18  ;;  %v3704_v23 = vsel %vm665_vm4, %v1172_v55, %v1173_v0  ;;  %v1204_v18 = vld [vmem:[#allocation2 + $0x420] sm:$0xff] }
 0x1e8   : > { %v1300_v29 = vadd.f32 %v1284_v27, %v972_v60  ;;  %v1139_v4 = vmul.f32 %v1123_v19, %v1062_v31  ;;  %v1315_v11 = vmax.f32 %v1299_v26, 0.0  ;;  %v1220_v58 = vmul.f32 %v1204_v18, %v3698_v30  ;;  %v1077_v26 = vld [vmem:[#allocation2 + $0x338] sm:$0xff] }
 0x1e9   : > { %v1106_v32 = vadd.f32 %v1090_v51, %v1025_v9  ;;  %v1311_v25 = vadd.f32 %v3644_v5, %v1000_v48  ;;  %v1221_v5 = vmul.f32 %v1205_v57, %v3704_v23  ;;  %v1076_v51 = vld [vmem:[#allocation2 + $0x330] sm:$0xff]  ;;  %v1269_v55 = vmul.f32 %v1253_v6, %v3651_v1 }
 0x1ea   : > { %v932_v43 = vpop.f32.mrf.mxu1  ;;  %v1316_v28 = vmax.f32 %v1300_v29, 0.0  ;;  %v977_v29 = vadd.f32 %v976_v50, %v3524_v15  ;;  %v1125_v9 = vld [vmem:[#allocation2 + $0x3b0] sm:$0xff]  ;;  %v1027_v1 = vmul.f32 %v1011_v49, %v3673_v20 }
 0x1eb   : > { %v3689_v52 = vadd.f32 %v932_v43, %v3504_v59  ;;  %v1155_v21 = vadd.f32 %v1139_v4, %v1106_v32  ;;  %v1327_v27 = vmax.f32 %v1311_v25, 0.0  ;;  %v1092_v4 = vmul.f32 %v1076_v51, %v1062_v31  ;;  %v1255_v6 = vld [vmem:[#allocation2 + $0x4b0] sm:$0xff] }
 0x1ec   : > { %v1330_v22 = vpack.c.bf16 %v1316_v28, %v1315_v11 }
 0x1ed   : > { %v1044_v8 = vrot.slane %v3689_v52, 7  ;;  %v1236_v54 = vadd.f32 %v1220_v58, %v1155_v21  ;;  %v1108_v31 = vadd.f32 %v1092_v4, %v1027_v1  ;;  %v1206_v21 = vld [vmem:[#allocation2 + $0x430] sm:$0xff] }
 0x1ee   : > { %v1001_v12 = vpop.f32.mrf.mxu3 }
 0x1ef   : > { %v1061_v16 = vsel %vm534_vm3, %v1043_v17, %v1044_v8  ;;  %v1002_v37 = vadd.f32 %v1001_v12, %v3524_v15  ;;  %v3713_v17 = vpop.f32.mrf.mxu2  ;;  %v1285_v13 = vadd.f32 %v1269_v55, %v1236_v54  ;;  %v1012_v12 = vld [vmem:[#allocation2 + $0x2b8] sm:$0xff]  ;;  %v1271_v55 = vmul.f32 %v1255_v6, %v3698_v30  ;;  %v1258_v6 = vld [vmem:[#allocation2 + $0x4c8] sm:$0xff] }
 0x1f0   : > { %v1140_v39 = vmul.f32 %v1124_v56, %v1061_v16  ;;  %v1174_v56 = vrot.slane %v3689_v52, 1 }
 0x1f1   : > { %v1312_v53 = vadd.f32 %v3656_v44, %v1002_v37  ;;  %v1301_v37 = vadd.f32 %v1285_v13, %v975_v46  ;;  %v1013_v46 = vld [vmem:[#allocation2 + $0x2c0] sm:$0xff] }
 0x1f2   : > { %v935_v41 = vpop.f32.mrf.mxu1  ;;  %v1156_v24 = vadd.f32 %v1140_v39, %v1107_v38  ;;  %v1028_v38 = vmul.f32 %v1012_v12, %v3689_v52  ;;  %v3740_v39 = vsel %vm665_vm4, %v1173_v0, %v1174_v56  ;;  %v1256_v0 = vld [vmem:[#allocation2 + $0x4b8] sm:$0xff] }
 0x1f3   : > { %v1328_v3 = vmax.f32 %v1312_v53, 0.0  ;;  %v3716_v60 = vadd.f32 %v935_v41, %v3504_v59  ;;  %v1207_v41 = vld [vmem:[#allocation2 + $0x438] sm:$0xff]  ;;  %v1317_v20 = vmax.f32 %v1301_v37, 0.0 }
 0x1f4   : > { %1454 = vmatmul.bf16.gmra.mxu3 %v1330_v22  ;;  %1503 = vmatmul.bf16.gmra.mxu0 %v1330_v22  ;;  %v1237_v44 = vadd.f32 %v1221_v5, %v1156_v24  ;;  %v1222_v24 = vmul.f32 %v1206_v21, %v3740_v39  ;;  %v1128_v21 = vld [vmem:[#allocation2 + $0x3c8] sm:$0xff] }
 0x1f5   : > { %v1045_v19 = vrot.slane %v3716_v60, 7  ;;  %v3720_v42 = vpack.c.bf16 %v1328_v3, %v1327_v27  ;;  %v1175_v50 = vrot.slane %v3716_v60, 1 }
 0x1f6   : > { %v1286_v43 = vadd.f32 %v1270_v47, %v1237_v44 }
 0x1f7   : > { %v1060_v48 = vsel %vm534_vm3, %v1044_v8, %v1045_v19  ;;  %v1093_v8 = vmul.f32 %v1077_v26, %v1061_v16  ;;  %v981_v18 = vpop.f32.mrf.mxu2  ;;  %v3746_v16 = vsel %vm665_vm4, %v1174_v56, %v1175_v50  ;;  %v980_v26 = vadd.f32 %v3713_v17, %v3524_v15  ;;  %v1014_v56 = vld [vmem:[#allocation2 + $0x2c8] sm:$0xff] }
 0x1f8   : > { %v1302_v40 = vadd.f32 %v1286_v43, %v977_v29  ;;  %v1141_v28 = vmul.f32 %v1125_v9, %v1060_v48  ;;  %v1223_v3 = vmul.f32 %v1207_v41, %v3746_v16  ;;  %v1078_v29 = vld [vmem:[#allocation2 + $0x340] sm:$0xff]  ;;  %v1079_v9 = vld [vmem:[#allocation2 + $0x348] sm:$0xff]  ;;  %v982_v4 = vadd.f32 %v981_v18, %v3524_v15 }
 0x1f9   : > { %v1109_v52 = vadd.f32 %v1093_v8, %v1028_v38  ;;  %v1094_v30 = vmul.f32 %v1078_v29, %v1060_v48  ;;  %v1029_v17 = vmul.f32 %v1013_v46, %v3716_v60  ;;  %v1082_v48 = vld [vmem:[#allocation2 + $0x360] sm:$0xff] }
 0x1fa   : > { %v937_v32 = vpop.f32.mrf.mxu1  ;;  %v1318_v11 = vmax.f32 %v1302_v40, 0.0  ;;  %v1157_v2 = vadd.f32 %v1141_v28, %v1108_v31  ;;  %v1017_v40 = vld [vmem:[#allocation2 + $0x2e0] sm:$0xff] }
 0x1fb   : > { %v3732_v25 = vadd.f32 %v937_v32, %v3504_v59  ;;  %v1127_v32 = vld [vmem:[#allocation2 + $0x3c0] sm:$0xff]  ;;  %v1033_v38 = vmul.f32 %v1017_v40, %v3514_v10  ;;  %v1274_v10 = vmul.f32 %v1258_v6, %v3746_v16  ;;  %v997_v16 = vadd.f32 %v3653_v62, %v3524_v15 }
 0x1fc   : > { %v1331_v5 = vpack.c.bf16 %v1318_v11, %v1317_v20  ;;  %v1238_v44 = vadd.f32 %v1222_v24, %v1157_v2  ;;  %v1110_v2 = vadd.f32 %v1094_v30, %v1029_v17  ;;  %v1016_v30 = vld [vmem:[#allocation2 + $0x2d8] sm:$0xff] }
 0x1fd   : > { %v1046_v57 = vrot.slane %v3732_v25, 7  ;;  %v1176_v12 = vrot.slane %v3732_v25, 1 }
 0x1fe   : > { %v1287_v13 = vadd.f32 %v1271_v55, %v1238_v44 }
 0x1ff   : > { %v1059_v53 = vsel %vm534_vm3, %v1045_v19, %v1046_v57  ;;  %v1272_v19 = vmul.f32 %v1256_v0, %v3704_v23  ;;  %v3758_v49 = vpop.f32.mrf.mxu2  ;;  %v1209_v0 = vld [vmem:[#allocation2 + $0x448] sm:$0xff] }
 0x200   : > { %v1142_v22 = vmul.f32 %v1126_v63, %v1059_v53  ;;  %v1095_v1 = vmul.f32 %v1079_v9, %v1059_v53  ;;  %v1303_v18 = vadd.f32 %v1287_v13, %v980_v26  ;;  %v1030_v63 = vmul.f32 %v1014_v56, %v3732_v25  ;;  %v1081_v13 = vld [vmem:[#allocation2 + $0x358] sm:$0xff] }
 0x202   : > { %v940_v58 = vpop.f32.mrf.mxu1  ;;  %v1158_v27 = vadd.f32 %v1142_v22, %v1109_v52  ;;  %v1111_v41 = vadd.f32 %v1095_v1, %v1030_v63  ;;  %v1208_v22 = vld [vmem:[#allocation2 + $0x440] sm:$0xff]  ;;  %v1319_v60 = vmax.f32 %v1303_v18, 0.0  ;;  %v1080_v18 = vld [vmem:[#allocation2 + $0x350] sm:$0xff] }
 0x203   : > { %v3753_v54 = vadd.f32 %v940_v58, %v3504_v59  ;;  %v1131_v58 = vld [vmem:[#allocation2 + $0x3e0] sm:$0xff] }
 0x204   : > { %1459 = vmatmul.bf16.gmra.mxu3 %v1331_v5  ;;  %1508 = vmatmul.bf16.gmra.mxu0 %v1331_v5  ;;  %v1239_v47 = vadd.f32 %v1223_v3, %v1158_v27  ;;  %v1147_v9 = vmul.f32 %v1131_v58, %v3585_v61 }
 0x205   : > { %v1047_v51 = vrot.slane %v3753_v54, 7  ;;  %v1177_v37 = vrot.slane %v3753_v54, 1 }
 0x206   : > { %v1288_v43 = vadd.f32 %v1272_v19, %v1239_v47  ;;  %v1212_v19 = vld [vmem:[#allocation2 + $0x460] sm:$0xff] }
 0x207   : > { %v3765_v23 = vsel %vm534_vm3, %v1046_v57, %v1047_v51  ;;  %v3788_v24 = vsel %vm665_vm4, %v1176_v12, %v1177_v37  ;;  %v986_v44 = vpop.f32.mrf.mxu2  ;;  %v1228_v40 = vmul.f32 %v1212_v19, %v3569_v7  ;;  %v995_v7 = vadd.f32 %v3620_v14, %v3524_v15  ;;  %v1260_v19 = vld [vmem:[#allocation2 + $0x4d8] sm:$0xff] }
 0x208   : > { %v1304_v8 = vadd.f32 %v1288_v43, %v982_v4  ;;  %v1143_v57 = vmul.f32 %v1127_v32, %v3765_v23  ;;  %v1257_v4 = vld [vmem:[#allocation2 + $0x4c0] sm:$0xff]  ;;  %v987_v63 = vadd.f32 %v986_v44, %v3524_v15  ;;  %v1096_v62 = vmul.f32 %v1080_v18, %v3765_v23 }
 0x209   : > { %v1261_v32 = vld [vmem:[#allocation2 + $0x4e0] sm:$0xff] }
 0x20a   : > { %v942_v28 = vpop.f32.mrf.mxu1  ;;  %v1320_v52 = vmax.f32 %v1304_v8, 0.0  ;;  %v1159_v3 = vadd.f32 %v1143_v57, %v1110_v2 }
 0x20b   : > { %v943_v31 = vadd.f32 %v942_v28, %v3504_v59  ;;  %v3778_v59 = vsel %vm665_vm4, %v1175_v50, %v1176_v12  ;;  %v1273_v28 = vmul.f32 %v1257_v4, %v3740_v39  ;;  %v985_v39 = vadd.f32 %v3758_v49, %v3524_v15 }
 0x20c   : > { %v1224_v47 = vmul.f32 %v1208_v22, %v3778_v59  ;;  %v1332_v55 = vpack.c.bf16 %v1320_v52, %v1319_v60  ;;  %v1211_v60 = vld [vmem:[#allocation2 + $0x458] sm:$0xff] }
 0x20d   : > { %v1048_v11 = vrot.slane %v943_v31, 7  ;;  %v1178_v53 = vrot.slane %v943_v31, 1  ;;  %v1032_v57 = vmul.f32 %v1016_v30, %v943_v31 }
 0x20e   : > { %v1240_v46 = vadd.f32 %v1224_v47, %v1159_v3 }
 0x20f   : > { %v1056_v25 = vsel %vm534_vm3, %v1048_v11, %v1049_v45  ;;  %v1057_v20 = vsel %vm534_vm3, %v1047_v51, %v1048_v11  ;;  %v1186_v27 = vsel %vm665_vm4, %v1178_v53, %v1179_v36  ;;  %v1262_v45 = vld [vmem:[#allocation2 + $0x4e8] sm:$0xff]  ;;  %v1225_v51 = vmul.f32 %v1209_v0, %v3788_v24  ;;  %v1015_v11 = vld [vmem:[#allocation2 + $0x2d0] sm:$0xff]  ;;  %v989_v52 = vpop.f32.mrf.mxu2 }
 0x210   : > { %v1098_v5 = vmul.f32 %v1082_v48, %v1056_v25  ;;  %v1144_v50 = vmul.f32 %v1128_v21, %v1057_v20  ;;  %v1278_v26 = vmul.f32 %v1262_v45, %v1186_v27  ;;  %v1187_v36 = vsel %vm665_vm4, %v1177_v37, %v1178_v53  ;;  %v1129_v48 = vld [vmem:[#allocation2 + $0x3d0] sm:$0xff] }
 0x211   : > { %v1097_v61 = vmul.f32 %v1081_v13, %v1057_v20  ;;  %v1277_v17 = vmul.f32 %v1261_v32, %v1187_v36  ;;  %v1031_v31 = vmul.f32 %v1015_v11, %v3753_v54  ;;  %v1145_v20 = vmul.f32 %v1129_v48, %v1056_v25  ;;  %v1210_v45 = vld [vmem:[#allocation2 + $0x450] sm:$0xff] }
 0x212   : > { %v1160_v43 = vadd.f32 %v1144_v50, %v1111_v41  ;;  %v1114_v29 = vadd.f32 %v1098_v5, %v1033_v38  ;;  %v1294_v12 = vadd.f32 %v1278_v26, %v3668_v35  ;;  %v1289_v38 = vadd.f32 %v1273_v28, %v1240_v46  ;;  %v1130_v35 = vld [vmem:[#allocation2 + $0x3d8] sm:$0xff]  ;;  %v1259_v54 = vld [vmem:[#allocation2 + $0x4d0] sm:$0xff] }
 0x213   : > { %v1113_v2 = vadd.f32 %v1097_v61, %v1032_v57  ;;  %v1146_v0 = vmul.f32 %v1130_v35, %v3560_v33  ;;  %v1112_v50 = vadd.f32 %v1096_v62, %v1031_v31  ;;  %v1227_v44 = vmul.f32 %v1211_v60, %v1186_v27  ;;  %v1607_v62 = vld [vmem:[#allocation2 + $0x590] sm:$0xff] }
 0x214   : > { %1464 = vmatmul.bf16.gmra.mxu3 %v1332_v55  ;;  %1513 = vmatmul.bf16.gmra.mxu0 %v1332_v55  ;;  %v1241_v56 = vadd.f32 %v1225_v51, %v1160_v43  ;;  %v1163_v1 = vadd.f32 %v1147_v9, %v1114_v29  ;;  %v1310_v53 = vadd.f32 %v1294_v12, %v997_v16  ;;  %v1541_v16 = vld [vmem:[#allocation2 + $0x508] sm:$0xff] }
 0x215   : > { %v1305_v14 = vadd.f32 %v1289_v38, %v985_v39  ;;  %v1162_v3 = vadd.f32 %v1146_v0, %v1113_v2  ;;  %v1161_v47 = vadd.f32 %v1145_v20, %v1112_v50  ;;  %v1226_v43 = vmul.f32 %v1210_v45, %v1187_v36  ;;  %v1608_v50 = vld [vmem:[#allocation2 + $0x598] sm:$0xff]  ;;  %v1736_v45 = vld [vmem:[#allocation2 + $0x688] sm:$0xff] }
 0x216   : > { %v1290_v8 = vadd.f32 %v1274_v10, %v1241_v56  ;;  %v1244_v37 = vadd.f32 %v1228_v40, %v1163_v1  ;;  %v1326_v5 = vmax.f32 %v1310_v53, 0.0  ;;  %v1276_v25 = vmul.f32 %v1260_v19, %v3788_v24  ;;  %v3821_v40 = vld [vmem:[#allocation10 + $0x2] sm:$0x3]  ;;  %v1542_v53 = vld [vmem:[#allocation2 + $0x510] sm:$0xff] }
 0x217   : > { %v1321_v23 = vmax.f32 %v1305_v14, 0.0  ;;  %v1243_v51 = vadd.f32 %v1227_v44, %v1162_v3  ;;  %v1242_v33 = vadd.f32 %v1226_v43, %v1161_v47  ;;  %v991_v29 = vpop.f32.mrf.mxu2  ;;  %v1275_v13 = vmul.f32 %v1259_v54, %v3778_v59  ;;  %v1655_v3 = vld [vmem:[#allocation2 + $0x608] sm:$0xff] }
 0x218   : > { %v1293_v21 = vadd.f32 %v1277_v17, %v1244_v37  ;;  %v1306_v41 = vadd.f32 %v1290_v8, %v987_v63  ;;  %v992_v4 = vadd.f32 %v991_v29, %v3524_v15  ;;  %v990_v27 = vadd.f32 %v989_v52, %v3524_v15  ;;  %v1606_v37 = vld [vmem:[#allocation2 + $0x588] sm:$0xff] }
 0x219   : > { %v1292_v9 = vadd.f32 %v1276_v25, %v1243_v51  ;;  %v1291_v10 = vadd.f32 %v1275_v13, %v1242_v33  ;;  %v3826_v15 = vperm.slane %v3821_v40, 0 }
 0x21a   : > { %v1309_v22 = vadd.f32 %v1293_v21, %v995_v7  ;;  %v1322_v6 = vmax.f32 %v1306_v41, 0.0 }
 0x21b   : > { %v1308_v26 = vadd.f32 %v1292_v9, %v992_v4  ;;  %v1307_v46 = vadd.f32 %v1291_v10, %v990_v27  ;;  %v1544_v9 = vld [vmem:[#allocation2 + $0x520] sm:$0xff]  ;;  %v1656_v10 = vld [vmem:[#allocation2 + $0x610] sm:$0xff] }
 0x21c   : > { %v1325_v58 = vmax.f32 %v1309_v22, 0.0  ;;  %v1333_v55 = vpack.c.bf16 %v1322_v6, %v1321_v23  ;;  %v1609_v4 = vld [vmem:[#allocation2 + $0x5a0] sm:$0xff] }
 0x21d   : > { %v1324_v56 = vmax.f32 %v1308_v26, 0.0  ;;  %v1323_v32 = vmax.f32 %v1307_v46, 0.0 }
 0x21e   : > { %v1335_v49 = vpack.c.bf16 %v1326_v5, %v1325_v58  ;;  %v1543_v58 = vld [vmem:[#allocation2 + $0x518] sm:$0xff] }
 0x21f   : > { %v1334_v36 = vpack.c.bf16 %v1324_v56, %v1323_v32  ;;  %v1737_v56 = vld [vmem:[#allocation2 + $0x690] sm:$0xff] }
 0x224   : > { %1469 = vmatmul.bf16.gmra.mxu3 %v1333_v55  ;;  %1518 = vmatmul.bf16.gmra.mxu0 %v1333_v55 }
 0x234   : > { %1474 = vmatmul.bf16.gmra.mxu3 %v1334_v36  ;;  %1523 = vmatmul.bf16.gmra.mxu0 %v1334_v36 }
 0x244   : > { %1479 = vmatmul.bf16.gmra.mxu3 %v1335_v49  ;;  %1528 = vmatmul.bf16.gmra.mxu0 %v1335_v49 }
 0x254   : > { %1484 = vmatmul.bf16.gmra.mxu3 %v3720_v42  ;;  %1533 = vmatmul.bf16.gmra.mxu0 %v3720_v42 }
 0x261   : > { %v3819_v24 = vpop.f32.mrf.mxu0 }
 0x267   : > { %v1450_v59 = vpop.f32.mrf.mxu3 }
 0x268   : > { %v3829_v1 = vadd.f32 %v1450_v59, %v3826_v15 }
 0x269   : > { %v3823_v30 = vpop.f32.mrf.mxu0 }
 0x26a   : > { %v1572_v42 = vrot.slane %v3829_v1, 7  ;;  %v1702_v8 = vrot.slane %v3829_v1, 1 }
 0x26f   : > { %v1452_v12 = vpop.f32.mrf.mxu3 }
 0x270   : > { %v1453_v61 = vadd.f32 %v1452_v12, %v3826_v15  ;;  %v1786_v12 = vld [vmem:[#allocation2 + $0x710] sm:$0xff] }
 0x271   : > { %v3832_v28 = vpop.f32.mrf.mxu0 }
 0x272   : > { %v1573_v18 = vrot.slane %v1453_v61, 7  ;;  %v1703_v17 = vrot.slane %v1453_v61, 1  ;;  %v1557_v38 = vmul.f32 %v1541_v16, %v1453_v61 }
 0x274   : > { %v3840_v63 = vsel %vm534_vm3, %v1572_v42, %v1573_v18  ;;  %v3846_v57 = vsel %vm665_vm4, %v1702_v8, %v1703_v17 }
 0x275   : > { %v1622_v7 = vmul.f32 %v1606_v37, %v3840_v63 }
 0x277   : > { %v1638_v11 = vadd.f32 %v1622_v7, %v1557_v38  ;;  %v1455_v48 = vpop.f32.mrf.mxu3 }
 0x278   : > { %v1456_v35 = vadd.f32 %v1455_v48, %v3826_v15  ;;  %v1545_v48 = vld [vmem:[#allocation2 + $0x528] sm:$0xff] }
 0x279   : > { %v3850_v21 = vpop.f32.mrf.mxu0 }
 0x27a   : > { %v1574_v39 = vrot.slane %v1456_v35, 7  ;;  %v1704_v2 = vrot.slane %v1456_v35, 1  ;;  %v1558_v22 = vmul.f32 %v1542_v53, %v1456_v35  ;;  %v1610_v53 = vld [vmem:[#allocation2 + $0x5a8] sm:$0xff] }
 0x27c   : > { %v3854_v41 = vsel %vm534_vm3, %v1573_v18, %v1574_v39  ;;  %v3858_v52 = vsel %vm665_vm4, %v1703_v17, %v1704_v2 }
 0x27d   : > { %v1623_v31 = vmul.f32 %v1607_v62, %v3854_v41  ;;  %v1752_v51 = vmul.f32 %v1736_v45, %v3858_v52 }
 0x27f   : > { %v1639_v20 = vadd.f32 %v1623_v31, %v1558_v22  ;;  %v1457_v0 = vpop.f32.mrf.mxu3 }
 0x280   : > { %v1458_v14 = vadd.f32 %v1457_v0, %v3826_v15 }
 0x281   : > { %v3862_v60 = vpop.f32.mrf.mxu0 }
 0x282   : > { %v1575_v5 = vrot.slane %v1458_v14, 7  ;;  %v1705_v6 = vrot.slane %v1458_v14, 1  ;;  %v1559_v23 = vmul.f32 %v1543_v58, %v1458_v14 }
 0x284   : > { %v1600_v49 = vsel %vm534_vm3, %v1574_v39, %v1575_v5  ;;  %v3868_v44 = vsel %vm665_vm4, %v1704_v2, %v1705_v6  ;;  %v1657_v39 = vld [vmem:[#allocation2 + $0x618] sm:$0xff] }
 0x285   : > { %v1624_v47 = vmul.f32 %v1608_v50, %v1600_v49  ;;  %v1671_v19 = vmul.f32 %v1655_v3, %v1600_v49  ;;  %v1753_v37 = vmul.f32 %v1737_v56, %v3868_v44  ;;  %v3894_v50 = vperm.slane %v3821_v40, 1 }
 0x287   : > { %v1640_v55 = vadd.f32 %v1624_v47, %v1559_v23  ;;  %v1460_v43 = vpop.f32.mrf.mxu3  ;;  %v1687_v54 = vadd.f32 %v1671_v19, %v1638_v11  ;;  %v1802_v11 = vmul.f32 %v1786_v12, %v3846_v57  ;;  %v1505_v47 = vadd.f32 %v3832_v28, %v3894_v50  ;;  %v1788_v12 = vld [vmem:[#allocation2 + $0x720] sm:$0xff] }
 0x288   : > { %v1461_v25 = vadd.f32 %v1460_v43, %v3826_v15  ;;  %v1546_v43 = vld [vmem:[#allocation2 + $0x530] sm:$0xff] }
 0x289   : > { %v3872_v33 = vpop.f32.mrf.mxu0  ;;  %v3874_v29 = vadd.f32 %v1752_v51, %v1687_v54 }
 0x28a   : > { %v1576_v13 = vrot.slane %v1461_v25, 7  ;;  %v1706_v27 = vrot.slane %v1461_v25, 1  ;;  %v1560_v32 = vmul.f32 %v1544_v9, %v1461_v25  ;;  %v1611_v25 = vld [vmem:[#allocation2 + $0x5b0] sm:$0xff]  ;;  %v1658_v9 = vld [vmem:[#allocation2 + $0x620] sm:$0xff] }
 0x28c   : > { %v1599_v26 = vsel %vm534_vm3, %v1575_v5, %v1576_v13  ;;  %v3880_v46 = vsel %vm665_vm4, %v1705_v6, %v1706_v27  ;;  %v1787_v5 = vld [vmem:[#allocation2 + $0x718] sm:$0xff] }
 0x28d   : > { %v1625_v36 = vmul.f32 %v1609_v4, %v1599_v26  ;;  %v1672_v59 = vmul.f32 %v1656_v10, %v1599_v26  ;;  %v1803_v51 = vmul.f32 %v1787_v5, %v3858_v52 }
 0x28f   : > { %v1641_v61 = vadd.f32 %v1625_v36, %v1560_v32  ;;  %v1462_v16 = vpop.f32.mrf.mxu3  ;;  %v1688_v18 = vadd.f32 %v1672_v59, %v1639_v20  ;;  %v1738_v20 = vld [vmem:[#allocation2 + $0x698] sm:$0xff] }
 0x290   : > { %v1463_v17 = vadd.f32 %v1462_v16, %v3826_v15  ;;  %v1754_v49 = vmul.f32 %v1738_v20, %v3880_v46 }
 0x291   : > { %v3884_v38 = vpop.f32.mrf.mxu0  ;;  %v1769_v7 = vadd.f32 %v1753_v37, %v1688_v18 }
 0x292   : > { %v1577_v35 = vrot.slane %v1463_v17, 7  ;;  %v1707_v62 = vrot.slane %v1463_v17, 1  ;;  %v1561_v0 = vmul.f32 %v1545_v48, %v1463_v17 }
 0x293   : > { %v1818_v2 = vadd.f32 %v1802_v11, %v1769_v7 }
 0x294   : > { %v1598_v22 = vsel %vm534_vm3, %v1576_v13, %v1577_v35  ;;  %v3891_v31 = vsel %vm665_vm4, %v1706_v27, %v1707_v62  ;;  %v1739_v27 = vld [vmem:[#allocation2 + $0x6a0] sm:$0xff] }
 0x295   : > { %v1626_v14 = vmul.f32 %v1610_v53, %v1598_v22  ;;  %v1673_v58 = vmul.f32 %v1657_v39, %v1598_v22  ;;  %v1834_v10 = vadd.f32 %v1818_v2, %v1505_v47  ;;  %v1755_v59 = vmul.f32 %v1739_v27, %v3891_v31  ;;  %v1547_v53 = vld [vmem:[#allocation2 + $0x538] sm:$0xff]  ;;  %v1659_v2 = vld [vmem:[#allocation2 + $0x628] sm:$0xff] }
 0x296   : > { %v1512_v27 = vadd.f32 %v3872_v33, %v3894_v50 }
 0x297   : > { %v1642_v3 = vadd.f32 %v1626_v14, %v1561_v0  ;;  %v1465_v6 = vpop.f32.mrf.mxu3  ;;  %v1689_v45 = vadd.f32 %v1673_v58, %v1640_v55  ;;  %v1507_v55 = vadd.f32 %v3850_v21, %v3894_v50  ;;  %v1850_v21 = vmax.f32 %v1834_v10, 0.0  ;;  %v1740_v58 = vld [vmem:[#allocation2 + $0x6a8] sm:$0xff] }
 0x298   : > { %v1466_v23 = vadd.f32 %v1465_v6, %v3826_v15 }
 0x299   : > { %v1770_v19 = vadd.f32 %v1754_v49, %v1689_v45  ;;  %v3901_v40 = vpop.f32.mrf.mxu0 }
 0x29a   : > { %v1578_v54 = vrot.slane %v1466_v23, 7  ;;  %v1708_v13 = vrot.slane %v1466_v23, 1  ;;  %v1562_v52 = vmul.f32 %v1546_v43, %v1466_v23  ;;  %v1510_v43 = vadd.f32 %v3862_v60, %v3894_v50 }
 0x29b   : > { %v1819_v4 = vadd.f32 %v1803_v51, %v1770_v19 }
 0x29c   : > { %v1597_v26 = vsel %vm534_vm3, %v1577_v35, %v1578_v54  ;;  %v3909_v28 = vsel %vm665_vm4, %v1707_v62, %v1708_v13  ;;  %v1804_v35 = vmul.f32 %v1788_v12, %v3868_v44  ;;  %v1612_v62 = vld [vmem:[#allocation2 + $0x5b8] sm:$0xff]  ;;  %v1789_v44 = vld [vmem:[#allocation2 + $0x728] sm:$0xff] }
 0x29d   : > { %v1627_v56 = vmul.f32 %v1611_v25, %v1597_v26  ;;  %v1674_v32 = vmul.f32 %v1658_v9, %v1597_v26  ;;  %v1835_v36 = vadd.f32 %v1819_v4, %v1507_v55  ;;  %v1756_v19 = vmul.f32 %v1740_v58, %v3909_v28  ;;  %v1548_v9 = vld [vmem:[#allocation2 + $0x540] sm:$0xff]  ;;  %v1660_v4 = vld [vmem:[#allocation2 + $0x630] sm:$0xff] }
 0x29e   : > { %v1805_v25 = vmul.f32 %v1789_v44, %v3880_v46  ;;  %v1613_v55 = vld [vmem:[#allocation2 + $0x5c0] sm:$0xff] }
 0x29f   : > { %v1643_v16 = vadd.f32 %v1627_v56, %v1562_v52  ;;  %v1467_v18 = vpop.f32.mrf.mxu3  ;;  %v1851_v37 = vmax.f32 %v1835_v36, 0.0  ;;  %v1690_v17 = vadd.f32 %v1674_v32, %v1641_v61  ;;  %v1741_v52 = vld [vmem:[#allocation2 + $0x6b0] sm:$0xff] }
 0x2a0   : > { %v1468_v7 = vadd.f32 %v1467_v18, %v3826_v15 }
 0x2a1   : > { %v3913_v11 = vpack.c.bf16 %v1851_v37, %v1850_v21  ;;  %v1771_v48 = vadd.f32 %v1755_v59, %v1690_v17  ;;  %v3922_v61 = vpop.f32.mrf.mxu0  ;;  %v1790_v21 = vld [vmem:[#allocation2 + $0x730] sm:$0xff] }
 0x2a2   : > { %v1579_v39 = vrot.slane %v1468_v7, 7  ;;  %v1709_v22 = vrot.slane %v1468_v7, 1  ;;  %v1563_v5 = vmul.f32 %v1547_v53, %v1468_v7 }
 0x2a3   : > { %v1820_v20 = vadd.f32 %v1804_v35, %v1771_v48 }
 0x2a4   : > { %v1596_v0 = vsel %vm534_vm3, %v1578_v54, %v1579_v39  ;;  %v3920_v14 = vsel %vm665_vm4, %v1708_v13, %v1709_v22 }
 0x2a5   : > { %v1628_v6 = vmul.f32 %v1612_v62, %v1596_v0  ;;  %v1675_v45 = vmul.f32 %v1659_v2, %v1596_v0  ;;  %v1757_v18 = vmul.f32 %v1741_v52, %v3920_v14  ;;  %v1806_v62 = vmul.f32 %v1790_v21, %v3891_v31  ;;  %v1549_v2 = vld [vmem:[#allocation2 + $0x548] sm:$0xff]  ;;  %v1661_v0 = vld [vmem:[#allocation2 + $0x638] sm:$0xff] }
 0x2a6   : > { %v1515_v31 = vadd.f32 %v3884_v38, %v3894_v50 }
 0x2a7   : > { %v1644_v49 = vadd.f32 %v1628_v6, %v1563_v5  ;;  %v1470_v23 = vpop.f32.mrf.mxu3  ;;  %v1691_v47 = vadd.f32 %v1675_v45, %v1642_v3  ;;  %v1836_v3 = vadd.f32 %v1820_v20, %v1510_v43  ;;  %v1614_v20 = vld [vmem:[#allocation2 + $0x5c8] sm:$0xff] }
 0x2a8   : > { %v1471_v51 = vadd.f32 %v1470_v23, %v3826_v15 }
 0x2a9   : > { %v1772_v54 = vadd.f32 %v1756_v19, %v1691_v47  ;;  %v3937_v12 = vpop.f32.mrf.mxu0  ;;  %v1852_v17 = vmax.f32 %v1836_v3, 0.0  ;;  %v1791_v19 = vld [vmem:[#allocation2 + $0x738] sm:$0xff] }
 0x2aa   : > { %v1580_v13 = vrot.slane %v1471_v51, 7  ;;  %v1710_v10 = vrot.slane %v1471_v51, 1  ;;  %v1564_v32 = vmul.f32 %v1548_v9, %v1471_v51  ;;  %v1807_v38 = vmul.f32 %v1791_v19, %v3909_v28  ;;  %v2733_v19 = vld [vmem:[#allocation9 + $0x150] sm:$0xf] }
 0x2ab   : > { %v1821_v26 = vadd.f32 %v1805_v25, %v1772_v54  ;;  %v2749_v54 = vld [vmem:[#allocation9 + $0x170] sm:$0xf] }
 0x2ac   : > { %v1595_v56 = vsel %vm534_vm3, %v1579_v39, %v1580_v13  ;;  %v3935_v60 = vsel %vm665_vm4, %v1709_v22, %v1710_v10 }
 0x2ad   : > { %v1629_v46 = vmul.f32 %v1613_v55, %v1595_v56  ;;  %v1676_v36 = vmul.f32 %v1660_v4, %v1595_v56  ;;  %v1837_v59 = vadd.f32 %v1821_v26, %v1512_v27  ;;  %v2804_v4 = vld [vmem:[#allocation9 + $0x174] sm:$0xf0]  ;;  %v2751_v27 = vld [vmem:[#allocation9 + $0x178] sm:$0xf0] }
 0x2ae   : > { %v2750_v3 = vor.u32 %v2804_v4, %v2749_v54  ;;  %v2799_v54 = vld [vmem:[#allocation9 + $0x154] sm:$0xf] }
 0x2af   : > { %v3940_v33 = vadd.f32 %v1629_v46, %v1564_v32  ;;  %v1472_v37 = vpop.f32.mrf.mxu3  ;;  %v1853_v7 = vmax.f32 %v1837_v59, 0.0  ;;  %v1692_v48 = vadd.f32 %v1676_v36, %v1643_v16  ;;  %v1742_v16 = vld [vmem:[#allocation2 + $0x6b8] sm:$0xff]  ;;  %v1550_v32 = vld [vmem:[#allocation2 + $0x550] sm:$0xff]  ;;  %v1662_v59 = vld [vmem:[#allocation2 + $0x640] sm:$0xff] }
 0x2b0   : > { %v1473_v35 = vadd.f32 %v1472_v37, %v3826_v15  ;;  %v1758_v9 = vmul.f32 %v1742_v16, %v3935_v60  ;;  %v1615_v36 = vld [vmem:[#allocation2 + $0x5d0] sm:$0xff]  ;;  %1976 = vmatpush.bf16.msrb.mxu1 %v2750_v3  ;;  %v1743_v37 = vld [vmem:[#allocation2 + $0x6c0] sm:$0xff]  ;;  %v1616_v3 = vld [vmem:[#allocation2 + $0x5d8] sm:$0xff] }
 0x2b1   : > { %v3943_v53 = vpack.c.bf16 %v1853_v7, %v1852_v17  ;;  %v1773_v39 = vadd.f32 %v1757_v18, %v1692_v48  ;;  %v1517_v18 = vadd.f32 %v3901_v40, %v3894_v50  ;;  %v2801_v40 = vld [vmem:[#allocation9 + $0x164] sm:$0xf] }
 0x2b2   : > { %v1581_v22 = vrot.slane %v1473_v35, 7  ;;  %v1711_v58 = vrot.slane %v1473_v35, 1  ;;  %v1565_v44 = vmul.f32 %v1549_v2, %v1473_v35  ;;  %v1792_v2 = vld [vmem:[#allocation2 + $0x740] sm:$0xff] }
 0x2b3   : > { %v1822_v5 = vadd.f32 %v1806_v62, %v1773_v39 }
 0x2b4   : > { %v1594_v6 = vsel %vm534_vm3, %v1580_v13, %v1581_v22  ;;  %v3950_v45 = vsel %vm665_vm4, %v1710_v10, %v1711_v58  ;;  %v3957_v13 = vpop.f32.mrf.mxu0  ;;  %v2803_v10 = vld [vmem:[#allocation9 + $0x174] sm:$0xf] }
 0x2b5   : > { %v1630_v23 = vmul.f32 %v1614_v20, %v1594_v6  ;;  %v1677_v47 = vmul.f32 %v1661_v0, %v1594_v6  ;;  %v1838_v26 = vadd.f32 %v1822_v5, %v1515_v31  ;;  %v2754_v52 = vor.u32 %v2803_v10, %v2751_v27  ;;  %v2741_v20 = vld [vmem:[#allocation9 + $0x160] sm:$0xf]  ;;  %v2802_v0 = vld [vmem:[#allocation9 + $0x164] sm:$0xf0] }
 0x2b6   : > { %v1759_v5 = vmul.f32 %v1743_v37, %v3950_v45  ;;  %v1808_v10 = vmul.f32 %v1792_v2, %v3920_v14  ;;  %v1744_v14 = vld [vmem:[#allocation2 + $0x6c8] sm:$0xff] }
 0x2b7   : > { %v3954_v51 = vadd.f32 %v1630_v23, %v1565_v44  ;;  %v1475_v43 = vpop.f32.mrf.mxu3  ;;  %v1693_v25 = vadd.f32 %v1677_v47, %v1644_v49  ;;  %2025 = vmatpush.bf16.msrb.mxu2 %v2754_v52  ;;  %v1854_v28 = vmax.f32 %v1838_v26, 0.0  ;;  %v2742_v44 = vor.u32 %v2802_v0, %v2741_v20  ;;  %v1551_v26 = vld [vmem:[#allocation2 + $0x558] sm:$0xff]  ;;  %v1663_v52 = vld [vmem:[#allocation2 + $0x648] sm:$0xff] }
 0x2b8   : > { %v1476_v55 = vadd.f32 %v1475_v43, %v3826_v15  ;;  %v2800_v43 = vld [vmem:[#allocation9 + $0x154] sm:$0xf0] }
 0x2b9   : > { %v1774_v56 = vadd.f32 %v1758_v9, %v1693_v25  ;;  %1977 = vmatpush.bf16.msrb.mxu1 %v2742_v44  ;;  %v2734_v25 = vor.u32 %v2800_v43, %v2733_v19  ;;  %v2735_v9 = vld [vmem:[#allocation9 + $0x158] sm:$0xf0]  ;;  %v2796_v43 = vld [vmem:[#allocation9 + $0x134] sm:$0xf0] }
 0x2ba   : > { %v1582_v46 = vrot.slane %v1476_v55, 7  ;;  %v1712_v49 = vrot.slane %v1476_v55, 1  ;;  %v1566_v48 = vmul.f32 %v1550_v32, %v1476_v55  ;;  %v1617_v44 = vld [vmem:[#allocation2 + $0x5e0] sm:$0xff] }
 0x2bb   : > { %v1823_v21 = vadd.f32 %v1807_v38, %v1774_v56  ;;  %v2738_v38 = vor.u32 %v2799_v54, %v2735_v9  ;;  %v2795_v54 = vld [vmem:[#allocation9 + $0x134] sm:$0xf] }
 0x2bc   : > { %v1593_v17 = vsel %vm534_vm3, %v1581_v22, %v1582_v46  ;;  %v3967_v7 = vsel %vm665_vm4, %v1711_v58, %v1712_v49  ;;  %v2743_v22 = vld [vmem:[#allocation9 + $0x168] sm:$0xf0]  ;;  %v3979_v27 = vpop.f32.mrf.mxu0 }
 0x2bd   : > { %v1631_v35 = vmul.f32 %v1615_v36, %v1593_v17  ;;  %v1678_v39 = vmul.f32 %v1662_v59, %v1593_v17  ;;  %v1839_v62 = vadd.f32 %v1823_v21, %v1517_v18  ;;  %v2746_v31 = vor.u32 %v2801_v40, %v2743_v22  ;;  %1978 = vmatpush.bf16.msrb.mxu1 %v2734_v25  ;;  %v1793_v17 = vld [vmem:[#allocation2 + $0x748] sm:$0xff]  ;;  %v1552_v40 = vld [vmem:[#allocation2 + $0x560] sm:$0xff]  ;;  %v1664_v22 = vld [vmem:[#allocation2 + $0x650] sm:$0xff] }
 0x2be   : > { %v1522_v25 = vadd.f32 %v3937_v12, %v3894_v50  ;;  %v2711_v12 = vld [vmem:[#allocation9 + $0x128] sm:$0xf0] }
 0x2bf   : > { %v3970_v6 = vadd.f32 %v1631_v35, %v1566_v48  ;;  %v1477_v16 = vpop.f32.mrf.mxu3  ;;  %v1855_v23 = vmax.f32 %v1839_v62, 0.0  ;;  %v1694_v58 = vadd.f32 %v1678_v39, %v3940_v33  ;;  %2026 = vmatpush.bf16.msrb.mxu2 %v2746_v31  ;;  %v2798_v48 = vld [vmem:[#allocation9 + $0x144] sm:$0xf0]  ;;  %v2797_v35 = vld [vmem:[#allocation9 + $0x144] sm:$0xf] }
 0x2c0   : > { %v3974_v47 = vadd.f32 %v1477_v16, %v3826_v15  ;;  %v1520_v16 = vadd.f32 %v3922_v61, %v3894_v50  ;;  %v1745_v31 = vld [vmem:[#allocation2 + $0x6d0] sm:$0xff]  ;;  %v2719_v61 = vld [vmem:[#allocation9 + $0x138] sm:$0xf0] }
 0x2c1   : > { %v3976_v55 = vpack.c.bf16 %v1855_v23, %v1854_v28  ;;  %v1775_v4 = vadd.f32 %v1759_v5, %v1694_v58  ;;  %v2725_v28 = vld [vmem:[#allocation9 + $0x140] sm:$0xf]  ;;  %v2717_v23 = vld [vmem:[#allocation9 + $0x130] sm:$0xf] }
 0x2c2   : > { %v1583_v33 = vrot.slane %v3974_v47, 7  ;;  %v1713_v56 = vrot.slane %v3974_v47, 1  ;;  %v1567_v18 = vmul.f32 %v1551_v26, %v3974_v47  ;;  %v2726_v2 = vor.u32 %v2798_v48, %v2725_v28  ;;  %v2701_v48 = vld [vmem:[#allocation9 + $0x110] sm:$0xf] }
 0x2c3   : > { %v1824_v32 = vadd.f32 %v1808_v10, %v1775_v4  ;;  %2027 = vmatpush.bf16.msrb.mxu2 %v2738_v38  ;;  %v1809_v47 = vmul.f32 %v1793_v17, %v3935_v60  ;;  %v2718_v9 = vor.u32 %v2796_v43, %v2717_v23  ;;  %v2709_v4 = vld [vmem:[#allocation9 + $0x120] sm:$0xf]  ;;  %v2794_v10 = vld [vmem:[#allocation9 + $0x124] sm:$0xf0] }
 0x2c4   : > { %v1592_v36 = vsel %vm534_vm3, %v1582_v46, %v1583_v33  ;;  %v3987_v59 = vsel %vm665_vm4, %v1712_v49, %v1713_v56  ;;  %v2727_v46 = vld [vmem:[#allocation9 + $0x148] sm:$0xf0]  ;;  %v1760_v49 = vmul.f32 %v1744_v14, %v3967_v7  ;;  %1979 = vmatpush.bf16.msrb.mxu1 %v2726_v2  ;;  %v2722_v14 = vor.u32 %v2795_v54, %v2719_v61  ;;  %v2790_v61 = vld [vmem:[#allocation9 + $0x104] sm:$0xf0] }
 0x2c5   : > { %v1632_v21 = vmul.f32 %v1616_v3, %v1592_v36  ;;  %v1679_v37 = vmul.f32 %v1663_v52, %v1592_v36  ;;  %v2730_v5 = vor.u32 %v2797_v35, %v2727_v46  ;;  %v1840_v3 = vadd.f32 %v1824_v32, %v1520_v16  ;;  %v4004_v52 = vpop.f32.mrf.mxu0  ;;  %v2792_v35 = vld [vmem:[#allocation9 + $0x114] sm:$0xf0]  ;;  %v1794_v2 = vld [vmem:[#allocation2 + $0x750] sm:$0xff]  ;;  %v1553_v16 = vld [vmem:[#allocation2 + $0x568] sm:$0xff] }
 0x2c6   : > { %v2710_v17 = vor.u32 %v2794_v10, %v2709_v4  ;;  %v2702_v23 = vor.u32 %v2792_v35, %v2701_v48  ;;  %v2789_v4 = vld [vmem:[#allocation9 + $0x104] sm:$0xf]  ;;  %v1525_v48 = vadd.f32 %v3957_v13, %v3894_v50 }
 0x2c7   : > { %v3990_v39 = vadd.f32 %v1632_v21, %v1567_v18  ;;  %v1480_v62 = vpop.f32.mrf.mxu3  ;;  %v1695_v20 = vadd.f32 %v1679_v37, %v3954_v51  ;;  %2028 = vmatpush.bf16.msrb.mxu2 %v2730_v5  ;;  %v2793_v18 = vld [vmem:[#allocation9 + $0x124] sm:$0xf] }
 0x2c8   : > { %v3995_v0 = vadd.f32 %v1480_v62, %v3826_v15  ;;  %1980 = vmatpush.bf16.msrb.mxu1 %v2718_v9  ;;  %v2714_v32 = vor.u32 %v2793_v18, %v2711_v12  ;;  %v1761_v62 = vmul.f32 %v1745_v31, %v3987_v59  ;;  %v1810_v31 = vmul.f32 %v1794_v2, %v3950_v45  ;;  %v2693_v9 = vld [vmem:[#allocation9 + $0x100] sm:$0xf]  ;;  %v1554_v2 = vld [vmem:[#allocation2 + $0x570] sm:$0xff] }
 0x2c9   : > { %v1776_v58 = vadd.f32 %v1760_v49, %v1695_v20  ;;  %v2703_v20 = vld [vmem:[#allocation9 + $0x118] sm:$0xf0]  ;;  %v1856_v49 = vmax.f32 %v1840_v3, 0.0  ;;  %v2694_v18 = vor.u32 %v2790_v61, %v2693_v9 }
 0x2ca   : > { %v1584_v51 = vrot.slane %v3995_v0, 7  ;;  %v1714_v19 = vrot.slane %v3995_v0, 1  ;;  %v1568_v60 = vmul.f32 %v1552_v40, %v3995_v0 }
 0x2cb   : > { %v1825_v26 = vadd.f32 %v1809_v47, %v1776_v58  ;;  %2029 = vmatpush.bf16.msrb.mxu2 %v2722_v14 }
 0x2cc   : > { %v1591_v38 = vsel %vm534_vm3, %v1583_v33, %v1584_v51  ;;  %v4011_v36 = vsel %vm665_vm4, %v1713_v56, %v1714_v19  ;;  %v2791_v56 = vld [vmem:[#allocation9 + $0x114] sm:$0xf]  ;;  %1981 = vmatpush.bf16.msrb.mxu1 %v2710_v17 }
 0x2cd   : > { %v1633_v21 = vmul.f32 %v1617_v44, %v1591_v38  ;;  %v1680_v37 = vmul.f32 %v1664_v22, %v1591_v38  ;;  %v1841_v28 = vadd.f32 %v1825_v26, %v1522_v25  ;;  %v1618_v44 = vld [vmem:[#allocation2 + $0x5e8] sm:$0xff]  ;;  %v1665_v22 = vld [vmem:[#allocation2 + $0x658] sm:$0xff]  ;;  %v2706_v25 = vor.u32 %v2791_v56, %v2703_v20  ;;  %v4027_v12 = vpop.f32.mrf.mxu0  ;;  %v1619_v56 = vld [vmem:[#allocation2 + $0x5f0] sm:$0xff] }
 0x2ce   : > { %v1666_v20 = vld [vmem:[#allocation2 + $0x660] sm:$0xff] }
 0x2cf   : > { %v4014_v33 = vadd.f32 %v1633_v21, %v1568_v60  ;;  %v1482_v46 = vpop.f32.mrf.mxu3  ;;  %v1857_v0 = vmax.f32 %v1841_v28, 0.0  ;;  %v1696_v40 = vadd.f32 %v1680_v37, %v3970_v6  ;;  %2030 = vmatpush.bf16.msrb.mxu2 %v2714_v32  ;;  %v2695_v6 = vld [vmem:[#allocation9 + $0x108] sm:$0xf0]  ;;  %v1746_v60 = vld [vmem:[#allocation2 + $0x6d8] sm:$0xff] }
 0x2d0   : > { %v1483_v5 = vadd.f32 %v1482_v46, %v3826_v15  ;;  %1982 = vmatpush.bf16.msrb.mxu1 %v2702_v23  ;;  %v2698_v21 = vor.u32 %v2789_v4, %v2695_v6  ;;  %v1795_v37 = vld [vmem:[#allocation2 + $0x758] sm:$0xff]  ;;  %v1762_v32 = vmul.f32 %v1746_v60, %v4011_v36 }
 0x2d1   : > { %v4018_v58 = vpack.c.bf16 %v1857_v0, %v1856_v49  ;;  %v1777_v47 = vadd.f32 %v1761_v62, %v1696_v40  ;;  %v1811_v62 = vmul.f32 %v1795_v37, %v3967_v7  ;;  %v1747_v0 = vld [vmem:[#allocation2 + $0x6e0] sm:$0xff]  ;;  %v1555_v60 = vld [vmem:[#allocation2 + $0x578] sm:$0xff]  ;;  %v1502_v37 = vadd.f32 %v3823_v30, %v3894_v50 }
 0x2d2   : > { %v1585_v43 = vrot.slane %v1483_v5, 7  ;;  %v1715_v54 = vrot.slane %v1483_v5, 1  ;;  %v1569_v38 = vmul.f32 %v1553_v16, %v1483_v5 }
 0x2d3   : > { %v1826_v10 = vadd.f32 %v1810_v31, %v1777_v47  ;;  %2031 = vmatpush.bf16.msrb.mxu2 %v2706_v25  ;;  %v1796_v31 = vld [vmem:[#allocation2 + $0x760] sm:$0xff] }
 0x2d4   : > { %v1590_v26 = vsel %vm534_vm3, %v1584_v51, %v1585_v43  ;;  %v4025_v3 = vsel %vm665_vm4, %v1714_v19, %v1715_v54  ;;  %1983 = vmatpush.bf16.msrb.mxu1 %v2694_v18  ;;  %v1540_v25 = vld [vmem:[#allocation2 + $0x500] sm:$0xff]  ;;  %v1812_v18 = vmul.f32 %v1796_v31, %v3987_v59 }
 0x2d5   : > { %v1634_v14 = vmul.f32 %v1618_v44, %v1590_v26  ;;  %v1681_v45 = vmul.f32 %v1665_v22, %v1590_v26  ;;  %v1842_v5 = vadd.f32 %v1826_v10, %v1525_v48  ;;  %v1763_v47 = vmul.f32 %v1747_v0, %v4025_v3  ;;  %v1669_v10 = vld [vmem:[#allocation2 + $0x678] sm:$0xff]  ;;  %v1534_v26 = vpop.f32.mrf.mxu0 }
 0x2d6   : > { %v1685_v48 = vmul.f32 %v1669_v10, %v3840_v63 }
 0x2d7   : > { %v4029_v17 = vadd.f32 %v1634_v14, %v1569_v38  ;;  %v1485_v28 = vpop.f32.mrf.mxu3  ;;  %v1697_v51 = vadd.f32 %v1681_v45, %v3990_v39  ;;  %2032 = vmatpush.bf16.msrb.mxu2 %v2698_v21  ;;  %v1527_v39 = vadd.f32 %v3979_v27, %v3894_v50  ;;  %v1858_v61 = vmax.f32 %v1842_v5, 0.0  ;;  %v1605_v38 = vld [vmem:[#allocation2 + $0x580] sm:$0xff] }
 0x2d8   : > { %v1486_v19 = vadd.f32 %v1485_v28, %v3826_v15  ;;  %v1556_v21 = vmul.f32 %v1540_v25, %v3829_v1  ;;  %v1798_v25 = vld [vmem:[#allocation2 + $0x770] sm:$0xff] }
 0x2d9   : > { %v1778_v35 = vadd.f32 %v1762_v32, %v1697_v51  ;;  %v1620_v51 = vld [vmem:[#allocation2 + $0x5f8] sm:$0xff]  ;;  %v1668_v32 = vld [vmem:[#allocation2 + $0x670] sm:$0xff] }
 0x2da   : > { %v1586_v46 = vrot.slane %v1486_v19, 7  ;;  %v1716_v49 = vrot.slane %v1486_v19, 1  ;;  %v1570_v7 = vmul.f32 %v1554_v2, %v1486_v19  ;;  %v1785_v2 = vld [vmem:[#allocation2 + $0x708] sm:$0xff] }
 0x2db   : > { %v1827_v40 = vadd.f32 %v1811_v62, %v1778_v35  ;;  %v1654_v35 = vld [vmem:[#allocation2 + $0x600] sm:$0xff] }
 0x2dc   : > { %v1589_v16 = vsel %vm534_vm3, %v1585_v43, %v1586_v46  ;;  %v4043_v13 = vsel %vm665_vm4, %v1715_v54, %v1716_v49  ;;  %v1735_v43 = vld [vmem:[#allocation2 + $0x680] sm:$0xff] }
 0x2dd   : > { %v1635_v44 = vmul.f32 %v1619_v56, %v1589_v16  ;;  %v1682_v22 = vmul.f32 %v1666_v20, %v1589_v16  ;;  %v1843_v23 = vadd.f32 %v1827_v40, %v1527_v39  ;;  %v1748_v20 = vld [vmem:[#allocation2 + $0x6e8] sm:$0xff]  ;;  %v1749_v16 = vld [vmem:[#allocation2 + $0x6f0] sm:$0xff] }
 0x2de   : > { %v1764_v1 = vmul.f32 %v1748_v20, %v4043_v13 }
 0x2df   : > { %v1651_v9 = vadd.f32 %v1635_v44, %v1570_v7  ;;  %v1487_v27 = vpop.f32.mrf.mxu3  ;;  %v1859_v4 = vmax.f32 %v1843_v23, 0.0  ;;  %v1698_v6 = vadd.f32 %v1682_v22, %v4014_v33  ;;  %v1667_v33 = vld [vmem:[#allocation2 + $0x668] sm:$0xff]  ;;  %v1530_v44 = vadd.f32 %v4004_v52, %v3894_v50 }
 0x2e0   : > { %v1488_v54 = vadd.f32 %v1487_v27, %v3826_v15  ;;  %v1751_v15 = vmul.f32 %v1735_v43, %v3846_v57  ;;  %v1797_v7 = vld [vmem:[#allocation2 + $0x768] sm:$0xff]  ;;  %v1799_v27 = vld [vmem:[#allocation2 + $0x778] sm:$0xff] }
 0x2e1   : > { %v4048_v14 = vpack.c.bf16 %v1859_v4, %v1858_v61  ;;  %v1779_v45 = vadd.f32 %v1763_v47, %v1698_v6  ;;  %v1784_v47 = vld [vmem:[#allocation2 + $0x700] sm:$0xff]  ;;  %v1813_v4 = vmul.f32 %v1797_v7, %v4011_v36  ;;  %v1535_v36 = vadd.f32 %v1534_v26, %v3894_v50 }
 0x2e2   : > { %v1587_v28 = vrot.slane %v1488_v54, 7  ;;  %v1717_v19 = vrot.slane %v1488_v54, 1  ;;  %v1571_v62 = vmul.f32 %v1555_v60, %v1488_v54  ;;  %v1536_v54 = vpop.f32.mrf.mxu0 }
 0x2e3   : > { %v1828_v56 = vadd.f32 %v1812_v18, %v1779_v45  ;;  %v1814_v45 = vmul.f32 %v1798_v25, %v4025_v3  ;;  %v1815_v18 = vmul.f32 %v1799_v27, %v4043_v13 }
 0x2e4   : > { %v1588_v59 = vsel %vm534_vm3, %v1586_v46, %v1587_v28  ;;  %v1603_v30 = vsel %vm534_vm3, %v1587_v28, %v1572_v42  ;;  %v1718_v39 = vsel %vm665_vm4, %v1716_v49, %v1717_v19  ;;  %v1733_v63 = vsel %vm665_vm4, %v1717_v19, %v1702_v8  ;;  %v1750_v49 = vld [vmem:[#allocation2 + $0x6f8] sm:$0xff] }
 0x2e5   : > { %v1621_v57 = vmul.f32 %v1605_v38, %v1603_v30  ;;  %v1636_v0 = vmul.f32 %v1620_v51, %v1588_v59  ;;  %v1683_v40 = vmul.f32 %v1667_v33, %v1588_v59  ;;  %v1684_v5 = vmul.f32 %v1668_v32, %v1603_v30 }
 0x2e6   : > { %v1670_v46 = vmul.f32 %v1654_v35, %v3854_v41  ;;  %v1532_v42 = vadd.f32 %v4027_v12, %v3894_v50  ;;  %v1801_v22 = vmul.f32 %v1785_v2, %v1733_v63  ;;  %v1765_v61 = vmul.f32 %v1749_v16, %v1718_v39 }
 0x2e7   : > { %v1637_v23 = vadd.f32 %v1621_v57, %v1556_v21  ;;  %v1652_v8 = vadd.f32 %v1636_v0, %v1571_v62  ;;  %v1699_v31 = vadd.f32 %v1683_v40, %v4029_v17  ;;  %v1700_v52 = vadd.f32 %v1684_v5, %v1651_v9  ;;  %v2076_v0 = vld [vmem:[#allocation2 + $0x788] sm:$0xff] }
 0x2e8   : > { %v1817_v41 = vadd.f32 %v1801_v22, %v3874_v29  ;;  %v1766_v10 = vmul.f32 %v1750_v49, %v1733_v63  ;;  %v1800_v60 = vmul.f32 %v1784_v47, %v1718_v39  ;;  %v1844_v28 = vadd.f32 %v1828_v56, %v1530_v44  ;;  %v2141_v5 = vld [vmem:[#allocation2 + $0x808] sm:$0xff] }
 0x2e9   : > { %v1701_v6 = vadd.f32 %v1685_v48, %v1652_v8  ;;  %v1686_v12 = vadd.f32 %v1670_v46, %v1637_v23  ;;  %v1780_v43 = vadd.f32 %v1764_v1, %v1699_v31  ;;  %v1781_v38 = vadd.f32 %v1765_v61, %v1700_v52  ;;  %v2077_v8 = vld [vmem:[#allocation2 + $0x790] sm:$0xff] }
 0x2ea   : > { %v1500_v29 = vadd.f32 %v3819_v24, %v3894_v50  ;;  %v1833_v9 = vadd.f32 %v1817_v41, %v1502_v37  ;;  %v1537_v32 = vadd.f32 %v1536_v54, %v3894_v50  ;;  %v1860_v2 = vmax.f32 %v1844_v28, 0.0  ;;  %v4093_v50 = vld [vmem:[#allocation10 + $0x4] sm:$0x3]  ;;  %v2142_v31 = vld [vmem:[#allocation2 + $0x810] sm:$0xff] }
 0x2eb   : > { %v1767_v17 = vadd.f32 %v1751_v15, %v1686_v12  ;;  %v1829_v21 = vadd.f32 %v1813_v4, %v1780_v43  ;;  %v1782_v51 = vadd.f32 %v1766_v10, %v1701_v6  ;;  %v1830_v33 = vadd.f32 %v1814_v45, %v1781_v38  ;;  %v2078_v43 = vld [vmem:[#allocation2 + $0x798] sm:$0xff]  ;;  %v2190_v38 = vld [vmem:[#allocation2 + $0x888] sm:$0xff] }
 0x2ec   : > { %v1849_v20 = vmax.f32 %v1833_v9, 0.0 }
 0x2ed   : > { %v1816_v19 = vadd.f32 %v1800_v60, %v1767_v17  ;;  %v1845_v48 = vadd.f32 %v1829_v21, %v1532_v42  ;;  %v1831_v35 = vadd.f32 %v1815_v18, %v1782_v51  ;;  %v1846_v62 = vadd.f32 %v1830_v33, %v1535_v36  ;;  %v2143_v60 = vld [vmem:[#allocation2 + $0x818] sm:$0xff]  ;;  %v2271_v18 = vld [vmem:[#allocation2 + $0x908] sm:$0xff] }
 0x2ef   : > { %v1832_v3 = vadd.f32 %v1816_v19, %v1500_v29  ;;  %v1861_v13 = vmax.f32 %v1845_v48, 0.0  ;;  %v1847_v15 = vadd.f32 %v1831_v35, %v1537_v32  ;;  %v1862_v30 = vmax.f32 %v1846_v62, 0.0  ;;  %v2079_v62 = vld [vmem:[#allocation2 + $0x7a0] sm:$0xff] }
 0x2f1   : > { %v1848_v56 = vmax.f32 %v1832_v3, 0.0  ;;  %v1870_v59 = vpack.c.bf16 %v1861_v13, %v1860_v2  ;;  %v1863_v39 = vmax.f32 %v1847_v15, 0.0  ;;  %v2144_v2 = vld [vmem:[#allocation2 + $0x820] sm:$0xff]  ;;  %v2191_v13 = vld [vmem:[#allocation2 + $0x890] sm:$0xff] }
 0x2f3   : > { %v1864_v24 = vpack.c.bf16 %v1849_v20, %v1848_v56  ;;  %v1871_v63 = vpack.c.bf16 %v1863_v39, %v1862_v30  ;;  %v2272_v20 = vld [vmem:[#allocation2 + $0x910] sm:$0xff] }
 0x2f5   : > { %1984 = vmatmul.bf16.vlgmr.msrb.gmra.mxu1 %v1864_v24  ;;  %2033 = vmatmul.bf16.vlgmr.msrb.gmra.mxu2 %v1864_v24 }
 0x305   : > { %1989 = vmatmul.bf16.gmra.mxu1 %v3913_v11  ;;  %2038 = vmatmul.bf16.gmra.mxu2 %v3913_v11 }
 0x315   : > { %1994 = vmatmul.bf16.gmra.mxu1 %v3943_v53  ;;  %2043 = vmatmul.bf16.gmra.mxu2 %v3943_v53  ;;  %v4096_v53 = vperm.slane %v4093_v50, 0 }
 0x325   : > { %1999 = vmatmul.bf16.gmra.mxu1 %v3976_v55  ;;  %2048 = vmatmul.bf16.gmra.mxu2 %v3976_v55 }
 0x335   : > { %2004 = vmatmul.bf16.gmra.mxu1 %v4018_v58  ;;  %2053 = vmatmul.bf16.gmra.mxu2 %v4018_v58 }
 0x345   : > { %2009 = vmatmul.bf16.gmra.mxu1 %v4048_v14  ;;  %2058 = vmatmul.bf16.gmra.mxu2 %v4048_v14 }
 0x355   : > { %2014 = vmatmul.bf16.gmra.mxu1 %v1870_v59  ;;  %2063 = vmatmul.bf16.gmra.mxu2 %v1870_v59 }
 0x365   : > { %2019 = vmatmul.bf16.gmra.mxu1 %v1871_v63  ;;  %2068 = vmatmul.bf16.gmra.mxu2 %v1871_v63 }
 0x372   : > { %v1985_v11 = vpop.f32.mrf.mxu1 }
 0x373   : > { %v4101_v55 = vadd.f32 %v1985_v11, %v4096_v53  ;;  %v2321_v11 = vld [vmem:[#allocation2 + $0x990] sm:$0xff] }
 0x375   : > { %v2107_v14 = vrot.slane %v4101_v55, 7  ;;  %v2237_v57 = vrot.slane %v4101_v55, 1 }
 0x378   : > { %v4098_v26 = vpop.f32.mrf.mxu2 }
 0x37a   : > { %v1987_v58 = vpop.f32.mrf.mxu1 }
 0x37b   : > { %v1988_v37 = vadd.f32 %v1987_v58, %v4096_v53 }
 0x37d   : > { %v2108_v40 = vrot.slane %v1988_v37, 7  ;;  %v2238_v16 = vrot.slane %v1988_v37, 1  ;;  %v2092_v44 = vmul.f32 %v2076_v0, %v1988_v37 }
 0x37f   : > { %v4110_v7 = vsel %vm534_vm3, %v2107_v14, %v2108_v40  ;;  %v4116_v46 = vsel %vm665_vm4, %v2237_v57, %v2238_v16 }
 0x380   : > { %v2157_v42 = vmul.f32 %v2141_v5, %v4110_v7  ;;  %v4119_v49 = vpop.f32.mrf.mxu2 }
 0x382   : > { %v2173_v22 = vadd.f32 %v2157_v42, %v2092_v44  ;;  %v1990_v1 = vpop.f32.mrf.mxu1  ;;  %v2337_v44 = vmul.f32 %v2321_v11, %v4116_v46  ;;  %v4154_v42 = vperm.slane %v4093_v50, 1 }
 0x383   : > { %v1991_v23 = vadd.f32 %v1990_v1, %v4096_v53 }
 0x385   : > { %v2109_v47 = vrot.slane %v1991_v23, 7  ;;  %v2239_v25 = vrot.slane %v1991_v23, 1  ;;  %v2093_v41 = vmul.f32 %v2077_v8, %v1991_v23  ;;  %v2145_v23 = vld [vmem:[#allocation2 + $0x828] sm:$0xff]  ;;  %v2192_v8 = vld [vmem:[#allocation2 + $0x898] sm:$0xff] }
 0x387   : > { %v4124_v27 = vsel %vm534_vm3, %v2108_v40, %v2109_v47  ;;  %v4128_v61 = vsel %vm665_vm4, %v2238_v16, %v2239_v25 }
 0x388   : > { %v2158_v4 = vmul.f32 %v2142_v31, %v4124_v27  ;;  %v2039_v52 = vpop.f32.mrf.mxu2  ;;  %v2287_v9 = vmul.f32 %v2271_v18, %v4128_v61 }
 0x38a   : > { %v2174_v6 = vadd.f32 %v2158_v4, %v2093_v41  ;;  %v1992_v10 = vpop.f32.mrf.mxu1  ;;  %v2273_v41 = vld [vmem:[#allocation2 + $0x918] sm:$0xff] }
 0x38b   : > { %v1993_v12 = vadd.f32 %v1992_v10, %v4096_v53 }
 0x38d   : > { %v2110_v54 = vrot.slane %v1993_v12, 7  ;;  %v2240_v45 = vrot.slane %v1993_v12, 1  ;;  %v2094_v28 = vmul.f32 %v2078_v43, %v1993_v12 }
 0x38f   : > { %v2135_v17 = vsel %vm534_vm3, %v2109_v47, %v2110_v54  ;;  %v4136_v21 = vsel %vm665_vm4, %v2239_v25, %v2240_v45  ;;  %v2040_v25 = vadd.f32 %v2039_v52, %v4154_v42 }
 0x390   : > { %v2159_v51 = vmul.f32 %v2143_v60, %v2135_v17  ;;  %v2206_v29 = vmul.f32 %v2190_v38, %v2135_v17  ;;  %v2041_v36 = vpop.f32.mrf.mxu2  ;;  %v2288_v58 = vmul.f32 %v2272_v20, %v4136_v21 }
 0x392   : > { %v2175_v33 = vadd.f32 %v2159_v51, %v2094_v28  ;;  %v1995_v32 = vpop.f32.mrf.mxu1  ;;  %v2222_v19 = vadd.f32 %v2206_v29, %v2173_v22  ;;  %v2080_v22 = vld [vmem:[#allocation2 + $0x7a8] sm:$0xff]  ;;  %v2081_v29 = vld [vmem:[#allocation2 + $0x7b0] sm:$0xff] }
 0x393   : > { %v1996_v48 = vadd.f32 %v1995_v32, %v4096_v53  ;;  %v2146_v32 = vld [vmem:[#allocation2 + $0x830] sm:$0xff] }
 0x394   : > { %v4140_v35 = vadd.f32 %v2287_v9, %v2222_v19  ;;  %v2193_v19 = vld [vmem:[#allocation2 + $0x8a0] sm:$0xff] }
 0x395   : > { %v2111_v3 = vrot.slane %v1996_v48, 7  ;;  %v2241_v15 = vrot.slane %v1996_v48, 1  ;;  %v2095_v30 = vmul.f32 %v2079_v62, %v1996_v48 }
 0x397   : > { %v2134_v56 = vsel %vm534_vm3, %v2110_v54, %v2111_v3  ;;  %v4146_v59 = vsel %vm665_vm4, %v2240_v45, %v2241_v15  ;;  %v2322_v54 = vld [vmem:[#allocation2 + $0x998] sm:$0xff] }
 0x398   : > { %v2160_v39 = vmul.f32 %v2144_v2, %v2134_v56  ;;  %v2207_v24 = vmul.f32 %v2191_v13, %v2134_v56  ;;  %v4148_v63 = vpop.f32.mrf.mxu2  ;;  %v2289_v38 = vmul.f32 %v2273_v41, %v4146_v59  ;;  %v2338_v51 = vmul.f32 %v2322_v54, %v4128_v61  ;;  %v2274_v2 = vld [vmem:[#allocation2 + $0x920] sm:$0xff] }
 0x399   : > { %v2045_v41 = vadd.f32 %v4148_v63, %v4154_v42 }
 0x39a   : > { %v2176_v37 = vadd.f32 %v2160_v39, %v2095_v30  ;;  %v1997_v0 = vpop.f32.mrf.mxu1  ;;  %v2223_v40 = vadd.f32 %v2207_v24, %v2174_v6  ;;  %v2323_v30 = vld [vmem:[#allocation2 + $0x9a0] sm:$0xff] }
 0x39b   : > { %v1998_v5 = vadd.f32 %v1997_v0, %v4096_v53 }
 0x39c   : > { %v2304_v16 = vadd.f32 %v2288_v58, %v2223_v40 }
 0x39d   : > { %v2112_v1 = vrot.slane %v1998_v5, 7  ;;  %v2242_v47 = vrot.slane %v1998_v5, 1  ;;  %v2096_v10 = vmul.f32 %v2080_v22, %v1998_v5  ;;  %v2082_v22 = vld [vmem:[#allocation2 + $0x7b8] sm:$0xff] }
 0x39e   : > { %v2353_v31 = vadd.f32 %v2337_v44, %v2304_v16  ;;  %v2339_v44 = vmul.f32 %v2323_v30, %v4136_v21 }
 0x39f   : > { %v2133_v4 = vsel %vm534_vm3, %v2111_v3, %v2112_v1  ;;  %v4161_v6 = vsel %vm665_vm4, %v2241_v15, %v2242_v47  ;;  %v2042_v3 = vadd.f32 %v2041_v36, %v4154_v42 }
 0x3a0   : > { %v2161_v12 = vmul.f32 %v2145_v23, %v2133_v4  ;;  %v2208_v50 = vmul.f32 %v2192_v8, %v2133_v4  ;;  %v4163_v43 = vpop.f32.mrf.mxu2  ;;  %v2369_v60 = vadd.f32 %v2353_v31, %v2040_v25  ;;  %v2290_v24 = vmul.f32 %v2274_v2, %v4161_v6  ;;  %v2147_v23 = vld [vmem:[#allocation2 + $0x838] sm:$0xff]  ;;  %v2194_v8 = vld [vmem:[#allocation2 + $0x8a8] sm:$0xff] }
 0x3a1   : > { %v2275_v4 = vld [vmem:[#allocation2 + $0x928] sm:$0xff]  ;;  %v2047_v2 = vadd.f32 %v4163_v43, %v4154_v42 }
 0x3a2   : > { %v2177_v45 = vadd.f32 %v2161_v12, %v2096_v10  ;;  %v2000_v18 = vpop.f32.mrf.mxu1  ;;  %v2224_v52 = vadd.f32 %v2208_v50, %v2175_v33  ;;  %v2385_v40 = vmax.f32 %v2369_v60, 0.0  ;;  %v2324_v60 = vld [vmem:[#allocation2 + $0x9a8] sm:$0xff] }
 0x3a3   : > { %v2001_v17 = vadd.f32 %v2000_v18, %v4096_v53 }
 0x3a4   : > { %v2305_v28 = vadd.f32 %v2289_v38, %v2224_v52 }
 0x3a5   : > { %v2113_v9 = vrot.slane %v2001_v17, 7  ;;  %v2243_v48 = vrot.slane %v2001_v17, 1  ;;  %v2097_v15 = vmul.f32 %v2081_v29, %v2001_v17  ;;  %v2340_v29 = vmul.f32 %v2324_v60, %v4146_v59 }
 0x3a6   : > { %v2354_v62 = vadd.f32 %v2338_v51, %v2305_v28 }
 0x3a7   : > { %v2132_v13 = vsel %vm534_vm3, %v2112_v1, %v2113_v9  ;;  %v4173_v33 = vsel %vm665_vm4, %v2242_v47, %v2243_v48 }
 0x3a8   : > { %v2162_v20 = vmul.f32 %v2146_v32, %v2132_v13  ;;  %v2209_v56 = vmul.f32 %v2193_v19, %v2132_v13  ;;  %v4175_v61 = vpop.f32.mrf.mxu2  ;;  %v2370_v39 = vadd.f32 %v2354_v62, %v2042_v3  ;;  %v2291_v18 = vmul.f32 %v2275_v4, %v4173_v33  ;;  %v2148_v19 = vld [vmem:[#allocation2 + $0x840] sm:$0xff]  ;;  %v2276_v13 = vld [vmem:[#allocation2 + $0x930] sm:$0xff] }
 0x3aa   : > { %v2178_v11 = vadd.f32 %v2162_v20, %v2097_v15  ;;  %v2002_v58 = vpop.f32.mrf.mxu1  ;;  %v2225_v36 = vadd.f32 %v2209_v56, %v2176_v37  ;;  %v2386_v5 = vmax.f32 %v2370_v39, 0.0  ;;  %v2325_v39 = vld [vmem:[#allocation2 + $0x9b0] sm:$0xff] }
 0x3ab   : > { %v2003_v0 = vadd.f32 %v2002_v58, %v4096_v53 }
 0x3ac   : > { %v2306_v16 = vadd.f32 %v2290_v24, %v2225_v36  ;;  %v4180_v31 = vpack.c.bf16 %v2386_v5, %v2385_v40 }
 0x3ad   : > { %v2114_v1 = vrot.slane %v2003_v0, 7  ;;  %v2244_v47 = vrot.slane %v2003_v0, 1  ;;  %v2098_v21 = vmul.f32 %v2082_v22, %v2003_v0  ;;  %v2341_v22 = vmul.f32 %v2325_v39, %v4161_v6 }
 0x3ae   : > { %v2355_v25 = vadd.f32 %v2339_v44, %v2306_v16 }
 0x3af   : > { %v2131_v37 = vsel %vm534_vm3, %v2113_v9, %v2114_v1  ;;  %v4188_v10 = vsel %vm665_vm4, %v2243_v48, %v2244_v47  ;;  %v2083_v9 = vld [vmem:[#allocation2 + $0x7c0] sm:$0xff]  ;;  %v2195_v48 = vld [vmem:[#allocation2 + $0x8b0] sm:$0xff] }
 0x3b0   : > { %v2163_v12 = vmul.f32 %v2147_v23, %v2131_v37  ;;  %v2210_v50 = vmul.f32 %v2194_v8, %v2131_v37  ;;  %v2051_v54 = vpop.f32.mrf.mxu2  ;;  %v2371_v38 = vadd.f32 %v2355_v25, %v2045_v41  ;;  %v2292_v58 = vmul.f32 %v2276_v13, %v4188_v10  ;;  %v2196_v23 = vld [vmem:[#allocation2 + $0x8b8] sm:$0xff] }
 0x3b1   : > { %v2050_v25 = vadd.f32 %v4175_v61, %v4154_v42  ;;  %v2277_v41 = vld [vmem:[#allocation2 + $0x938] sm:$0xff] }
 0x3b2   : > { %v2179_v52 = vadd.f32 %v2163_v12, %v2098_v21  ;;  %v2005_v17 = vpop.f32.mrf.mxu1  ;;  %v2226_v28 = vadd.f32 %v2210_v50, %v2177_v45  ;;  %v2387_v5 = vmax.f32 %v2371_v38, 0.0  ;;  %v2326_v21 = vld [vmem:[#allocation2 + $0x9b8] sm:$0xff] }
 0x3b3   : > { %v2006_v63 = vadd.f32 %v2005_v17, %v4096_v53 }
 0x3b4   : > { %v2307_v51 = vadd.f32 %v2291_v18, %v2226_v28  ;;  %v2342_v28 = vmul.f32 %v2326_v21, %v4173_v33 }
 0x3b5   : > { %v2115_v32 = vrot.slane %v2006_v63, 7  ;;  %v2245_v62 = vrot.slane %v2006_v63, 1  ;;  %v2099_v20 = vmul.f32 %v2083_v9, %v2006_v63  ;;  %v2197_v63 = vld [vmem:[#allocation2 + $0x8c0] sm:$0xff] }
 0x3b6   : > { %v2356_v3 = vadd.f32 %v2340_v29, %v2307_v51  ;;  %v2052_v29 = vadd.f32 %v2051_v54, %v4154_v42 }
 0x3b7   : > { %v2130_v15 = vsel %vm534_vm3, %v2114_v1, %v2115_v32  ;;  %v4199_v45 = vsel %vm665_vm4, %v2244_v47, %v2245_v62 }
 0x3b8   : > { %v2164_v56 = vmul.f32 %v2148_v19, %v2130_v15  ;;  %v2211_v59 = vmul.f32 %v2195_v48, %v2130_v15  ;;  %v2054_v30 = vpop.f32.mrf.mxu2  ;;  %v2372_v24 = vadd.f32 %v2356_v3, %v2047_v2  ;;  %v2293_v50 = vmul.f32 %v2277_v41, %v4199_v45  ;;  %v2149_v3 = vld [vmem:[#allocation2 + $0x848] sm:$0xff]  ;;  %v2327_v2 = vld [vmem:[#allocation2 + $0x9c0] sm:$0xff] }
 0x3ba   : > { %v2180_v36 = vadd.f32 %v2164_v56, %v2099_v20  ;;  %v2007_v0 = vpop.f32.mrf.mxu1  ;;  %v2227_v40 = vadd.f32 %v2211_v59, %v2178_v11  ;;  %v2388_v16 = vmax.f32 %v2372_v24, 0.0  ;;  %v2084_v56 = vld [vmem:[#allocation2 + $0x7c8] sm:$0xff] }
 0x3bb   : > { %v2008_v43 = vadd.f32 %v2007_v0, %v4096_v53  ;;  %v2343_v0 = vmul.f32 %v2327_v2, %v4188_v10  ;;  %v2328_v10 = vld [vmem:[#allocation2 + $0x9c8] sm:$0xff]  ;;  %v2270_v2 = vld [vmem:[#allocation2 + $0x900] sm:$0xff] }
 0x3bc   : > { %v2308_v44 = vadd.f32 %v2292_v58, %v2227_v40  ;;  %v4204_v8 = vpack.c.bf16 %v2388_v16, %v2387_v5  ;;  %v2198_v5 = vld [vmem:[#allocation2 + $0x8c8] sm:$0xff] }
 0x3bd   : > { %v2116_v1 = vrot.slane %v2008_v43, 7  ;;  %v2246_v38 = vrot.slane %v2008_v43, 1 }
 0x3be   : > { %v2357_v47 = vadd.f32 %v2341_v22, %v2308_v44  ;;  %v2100_v44 = vmul.f32 %v2084_v56, %v2008_v43 }
 0x3bf   : > { %v2129_v4 = vsel %vm534_vm3, %v2115_v32, %v2116_v1  ;;  %v4219_v9 = vsel %vm665_vm4, %v2245_v62, %v2246_v38  ;;  %v2278_v32 = vld [vmem:[#allocation2 + $0x940] sm:$0xff] }
 0x3c0   : > { %v2212_v11 = vmul.f32 %v2196_v23, %v2129_v4  ;;  %v2056_v37 = vpop.f32.mrf.mxu2  ;;  %v2373_v12 = vadd.f32 %v2357_v47, %v2050_v25  ;;  %v2294_v13 = vmul.f32 %v2278_v32, %v4219_v9  ;;  %v2165_v24 = vmul.f32 %v2149_v3, %v2129_v4  ;;  %v2279_v23 = vld [vmem:[#allocation2 + $0x948] sm:$0xff]  ;;  %v2150_v3 = vld [vmem:[#allocation2 + $0x850] sm:$0xff] }
 0x3c2   : > { %v2010_v60 = vpop.f32.mrf.mxu1  ;;  %v2228_v6 = vadd.f32 %v2212_v11, %v2179_v52  ;;  %v2389_v59 = vmax.f32 %v2373_v12, 0.0  ;;  %v2181_v25 = vadd.f32 %v2165_v24, %v2100_v44  ;;  %v4263_v24 = vadd.f32 %v4098_v26, %v4154_v42  ;;  %v2330_v44 = vld [vmem:[#allocation2 + $0x9d8] sm:$0xff] }
 0x3c3   : > { %v4212_v18 = vadd.f32 %v2010_v60, %v4096_v53  ;;  %v2344_v60 = vmul.f32 %v2328_v10, %v4199_v45 }
 0x3c4   : > { %v2309_v17 = vadd.f32 %v2293_v50, %v2228_v6  ;;  %v2057_v6 = vadd.f32 %v2056_v37, %v4154_v42 }
 0x3c5   : > { %v2117_v61 = vrot.slane %v4212_v18, 7  ;;  %v2247_v54 = vrot.slane %v4212_v18, 1 }
 0x3c6   : > { %v2358_v51 = vadd.f32 %v2342_v28, %v2309_v17 }
 0x3c7   : > { %v2128_v52 = vsel %vm534_vm3, %v2116_v1, %v2117_v61  ;;  %v2258_v1 = vsel %vm665_vm4, %v2246_v38, %v2247_v54 }
 0x3c8   : > { %v2213_v19 = vmul.f32 %v2197_v63, %v2128_v52  ;;  %v4223_v48 = vpop.f32.mrf.mxu2  ;;  %v2374_v33 = vadd.f32 %v2358_v51, %v2052_v29  ;;  %v2295_v21 = vmul.f32 %v2279_v23, %v2258_v1 }
 0x3ca   : > { %v2012_v15 = vpop.f32.mrf.mxu1  ;;  %v2229_v20 = vadd.f32 %v2213_v19, %v2180_v36  ;;  %v2390_v39 = vmax.f32 %v2374_v33, 0.0  ;;  %v2055_v36 = vadd.f32 %v2054_v30, %v4154_v42  ;;  %v2075_v19 = vld [vmem:[#allocation2 + $0x780] sm:$0xff] }
 0x3cb   : > { %v4228_v62 = vadd.f32 %v2012_v15, %v4096_v53  ;;  %v2085_v15 = vld [vmem:[#allocation2 + $0x7d0] sm:$0xff] }
 0x3cc   : > { %v2310_v58 = vadd.f32 %v2294_v13, %v2229_v20  ;;  %v4232_v16 = vpack.c.bf16 %v2390_v39, %v2389_v59  ;;  %v2204_v13 = vld [vmem:[#allocation2 + $0x8f8] sm:$0xff]  ;;  %v4259_v39 = vmul.f32 %v2075_v19, %v4101_v55  ;;  %v2101_v26 = vmul.f32 %v2085_v15, %v4212_v18  ;;  %v2319_v55 = vld [vmem:[#allocation2 + $0x980] sm:$0xff] }
 0x3cd   : > { %v2118_v40 = vrot.slane %v4228_v62, 7  ;;  %v2248_v45 = vrot.slane %v4228_v62, 1  ;;  %v2151_v20 = vld [vmem:[#allocation2 + $0x858] sm:$0xff]  ;;  %v4275_v10 = vmul.f32 %v2204_v13, %v4110_v7 }
 0x3ce   : > { %v2359_v22 = vadd.f32 %v2343_v0, %v2310_v58  ;;  %v2189_v58 = vld [vmem:[#allocation2 + $0x880] sm:$0xff]  ;;  %v2166_v0 = vmul.f32 %v2150_v3, %v2128_v52  ;;  %v2200_v18 = vld [vmem:[#allocation2 + $0x8d8] sm:$0xff] }
 0x3cf   : > { %v2127_v47 = vsel %vm534_vm3, %v2117_v61, %v2118_v40  ;;  %v2257_v23 = vsel %vm665_vm4, %v2247_v54, %v2248_v45  ;;  %v4286_v54 = vmul.f32 %v2189_v58, %v4124_v27  ;;  %v2201_v27 = vld [vmem:[#allocation2 + $0x8e0] sm:$0xff]  ;;  %v2281_v3 = vld [vmem:[#allocation2 + $0x958] sm:$0xff] }
 0x3d0   : > { %v2214_v41 = vmul.f32 %v2198_v5, %v2127_v47  ;;  %v4239_v4 = vpop.f32.mrf.mxu2  ;;  %v2375_v11 = vadd.f32 %v2359_v22, %v2055_v36  ;;  %v4269_v22 = vmul.f32 %v2270_v2, %v4116_v46  ;;  %v2086_v36 = vld [vmem:[#allocation2 + $0x7d8] sm:$0xff]  ;;  %v2167_v52 = vmul.f32 %v2151_v20, %v2127_v47  ;;  %v2331_v47 = vld [vmem:[#allocation2 + $0x9e0] sm:$0xff]  ;;  %v2088_v2 = vld [vmem:[#allocation2 + $0x7e8] sm:$0xff] }
 0x3d1   : > { %v2089_v20 = vld [vmem:[#allocation2 + $0x7f0] sm:$0xff] }
 0x3d2   : > { %v2015_v12 = vpop.f32.mrf.mxu1  ;;  %v2230_v50 = vadd.f32 %v2214_v41, %v2181_v25  ;;  %v2391_v61 = vmax.f32 %v2375_v11, 0.0  ;;  %v2280_v25 = vld [vmem:[#allocation2 + $0x950] sm:$0xff] }
 0x3d3   : > { %v4246_v51 = vadd.f32 %v2015_v12, %v4096_v53  ;;  %v2199_v12 = vld [vmem:[#allocation2 + $0x8d0] sm:$0xff] }
 0x3d4   : > { %v2311_v43 = vadd.f32 %v2295_v21, %v2230_v50  ;;  %v2152_v21 = vld [vmem:[#allocation2 + $0x860] sm:$0xff]  ;;  %v4283_v50 = vadd.f32 %v4119_v49, %v4154_v42 }
 0x3d5   : > { %v2119_v37 = vrot.slane %v4246_v51, 7  ;;  %v2249_v41 = vrot.slane %v4246_v51, 1 }
 0x3d6   : > { %v2360_v30 = vadd.f32 %v2344_v60, %v2311_v43  ;;  %v2153_v43 = vld [vmem:[#allocation2 + $0x868] sm:$0xff]  ;;  %v4290_v60 = vmul.f32 %v2330_v44, %v2258_v1 }
 0x3d7   : > { %v2126_v11 = vsel %vm534_vm3, %v2118_v40, %v2119_v37  ;;  %v2182_v40 = vadd.f32 %v2166_v0, %v2101_v26  ;;  %v2256_v19 = vsel %vm665_vm4, %v2248_v45, %v2249_v41 }
 0x3d8   : > { %v4243_v38 = vpop.f32.mrf.mxu2  ;;  %v2376_v17 = vadd.f32 %v2360_v30, %v2057_v6  ;;  %v2102_v30 = vmul.f32 %v2086_v36, %v4228_v62  ;;  %v4293_v6 = vmul.f32 %v2280_v25, %v2257_v23  ;;  %v2297_v25 = vmul.f32 %v2281_v3, %v2256_v19  ;;  %v2333_v3 = vld [vmem:[#allocation2 + $0x9f0] sm:$0xff] }
 0x3da   : > { %v2017_v28 = vpop.f32.mrf.mxu1  ;;  %v2392_v63 = vmax.f32 %v2376_v17, 0.0  ;;  %v2087_v17 = vld [vmem:[#allocation2 + $0x7e0] sm:$0xff]  ;;  %v2183_v13 = vadd.f32 %v2167_v52, %v2102_v30 }
 0x3db   : > { %v4251_v32 = vadd.f32 %v2017_v28, %v4096_v53  ;;  %v2154_v28 = vld [vmem:[#allocation2 + $0x870] sm:$0xff] }
 0x3dc   : > { %v4248_v29 = vpack.c.bf16 %v2392_v63, %v2391_v61  ;;  %v2168_v61 = vmul.f32 %v2152_v21, %v2126_v11  ;;  %v2215_v63 = vmul.f32 %v2199_v12, %v2126_v11  ;;  %v2090_v21 = vld [vmem:[#allocation2 + $0x7f8] sm:$0xff] }
 0x3dd   : > { %v2120_v56 = vrot.slane %v4251_v32, 7  ;;  %v2250_v1 = vrot.slane %v4251_v32, 1  ;;  %v2104_v45 = vmul.f32 %v2088_v2, %v4251_v32 }
 0x3df   : > { %v2125_v7 = vsel %vm534_vm3, %v2119_v37, %v2120_v56  ;;  %v2332_v37 = vld [vmem:[#allocation2 + $0x9e8] sm:$0xff] }
 0x3e0   : > { %v4255_v33 = vpop.f32.mrf.mxu2  ;;  %v2169_v62 = vmul.f32 %v2153_v43, %v2125_v7  ;;  %v2216_v15 = vmul.f32 %v2200_v18, %v2125_v7  ;;  %v2348_v52 = vmul.f32 %v2332_v37, %v2256_v19  ;;  %v2282_v7 = vld [vmem:[#allocation2 + $0x960] sm:$0xff]  ;;  %v2231_v18 = vadd.f32 %v2215_v63, %v2182_v40  ;;  %v2284_v19 = vld [vmem:[#allocation2 + $0x970] sm:$0xff] }
 0x3e1   : > { %v2140_v43 = vld [vmem:[#allocation2 + $0x800] sm:$0xff] }
 0x3e2   : > { %v2020_v59 = vpop.f32.mrf.mxu1 }
 0x3e3   : > { %v4266_v5 = vadd.f32 %v2020_v59, %v4096_v53  ;;  %v4300_v59 = vmul.f32 %v2331_v47, %v2257_v23  ;;  %v2255_v23 = vsel %vm665_vm4, %v2249_v41, %v2250_v1  ;;  %v2185_v47 = vadd.f32 %v2169_v62, %v2104_v45  ;;  %v2283_v41 = vld [vmem:[#allocation2 + $0x968] sm:$0xff] }
 0x3e5   : > { %v2121_v46 = vrot.slane %v4266_v5, 7  ;;  %v2251_v44 = vrot.slane %v4266_v5, 1 }
 0x3e7   : > { %v2124_v49 = vsel %vm534_vm3, %v2120_v56, %v2121_v46  ;;  %v2103_v56 = vmul.f32 %v2087_v17, %v4246_v51  ;;  %v2105_v51 = vmul.f32 %v2089_v20, %v4266_v5  ;;  %v2155_v17 = vld [vmem:[#allocation2 + $0x878] sm:$0xff] }
 0x3e8   : > { %v2170_v58 = vmul.f32 %v2154_v28, %v2124_v49  ;;  %v2217_v0 = vmul.f32 %v2201_v27, %v2124_v49  ;;  %v2069_v26 = vpop.f32.mrf.mxu2  ;;  %v2202_v49 = vld [vmem:[#allocation2 + $0x8e8] sm:$0xff]  ;;  %v2203_v28 = vld [vmem:[#allocation2 + $0x8f0] sm:$0xff]  ;;  %v2232_v27 = vadd.f32 %v2216_v15, %v2183_v13 }
 0x3e9   : > { %v2184_v12 = vadd.f32 %v2168_v61, %v2103_v56  ;;  %v2254_v61 = vsel %vm665_vm4, %v2250_v1, %v2251_v44  ;;  %v2285_v56 = vld [vmem:[#allocation2 + $0x978] sm:$0xff] }
 0x3ea   : > { %v2022_v36 = vpop.f32.mrf.mxu1  ;;  %v2299_v45 = vmul.f32 %v2283_v41, %v2254_v61 }
 0x3eb   : > { %v2023_v11 = vadd.f32 %v2022_v36, %v4096_v53  ;;  %v2186_v53 = vadd.f32 %v2170_v58, %v2105_v51  ;;  %v2233_v37 = vadd.f32 %v2217_v0, %v2184_v12  ;;  %v2320_v58 = vld [vmem:[#allocation2 + $0x988] sm:$0xff]  ;;  %v2349_v0 = vmul.f32 %v2333_v3, %v2255_v23 }
 0x3ed   : > { %v2122_v30 = vrot.slane %v2023_v11, 7  ;;  %v2252_v32 = vrot.slane %v2023_v11, 1  ;;  %v2106_v2 = vmul.f32 %v2090_v21, %v2023_v11 }
 0x3ef   : > { %v2123_v5 = vsel %vm534_vm3, %v2121_v46, %v2122_v30  ;;  %v2138_v40 = vsel %vm534_vm3, %v2122_v30, %v2107_v14  ;;  %v2253_v63 = vsel %vm665_vm4, %v2251_v44, %v2252_v32  ;;  %v2268_v13 = vsel %vm665_vm4, %v2252_v32, %v2237_v57  ;;  %v2334_v44 = vld [vmem:[#allocation2 + $0x9f8] sm:$0xff] }
 0x3f0   : > { %v2156_v62 = vmul.f32 %v2140_v43, %v2138_v40  ;;  %v2171_v1 = vmul.f32 %v2155_v17, %v2123_v5  ;;  %v2218_v15 = vmul.f32 %v2202_v49, %v2123_v5  ;;  %v2219_v20 = vmul.f32 %v2203_v28, %v2138_v40  ;;  %v2071_v28 = vpop.f32.mrf.mxu2 }
 0x3f1   : > { %v2298_v46 = vmul.f32 %v2282_v7, %v2255_v23  ;;  %v2300_v36 = vmul.f32 %v2284_v19, %v2253_v63  ;;  %v2301_v51 = vmul.f32 %v2285_v56, %v2268_v13  ;;  %v2313_v57 = vadd.f32 %v2297_v25, %v2232_v27  ;;  %v2329_v19 = vld [vmem:[#allocation2 + $0x9d0] sm:$0xff] }
 0x3f2   : > { %v2172_v14 = vadd.f32 %v2156_v62, %v4259_v39  ;;  %v2187_v11 = vadd.f32 %v2171_v1, %v2106_v2  ;;  %v2235_v21 = vadd.f32 %v2219_v20, %v2186_v53  ;;  %v2234_v12 = vadd.f32 %v2218_v15, %v2185_v47 }
 0x3f3   : > { %v2314_v34 = vadd.f32 %v2298_v46, %v2233_v37  ;;  %v2336_v43 = vmul.f32 %v2320_v58, %v2268_v13  ;;  %v2070_v23 = vadd.f32 %v2069_v26, %v4154_v42  ;;  %v2350_v32 = vmul.f32 %v2334_v44, %v2254_v61 }
 0x3f4   : > { %v2236_v30 = vadd.f32 %v4275_v10, %v2187_v11  ;;  %v2316_v17 = vadd.f32 %v2300_v36, %v2235_v21  ;;  %v2315_v49 = vadd.f32 %v2299_v45, %v2234_v12  ;;  %v2221_v7 = vadd.f32 %v4286_v54, %v2172_v14 }
 0x3f5   : > { %v2335_v39 = vmul.f32 %v2319_v55, %v2253_v63  ;;  %v2352_v3 = vadd.f32 %v2336_v43, %v4140_v35  ;;  %v2067_v10 = vadd.f32 %v4255_v33, %v4154_v42  ;;  %v2363_v27 = vadd.f32 %v4300_v59, %v2314_v34 }
 0x3f6   : > { %v2317_v53 = vadd.f32 %v2301_v51, %v2236_v30  ;;  %v2365_v47 = vadd.f32 %v2349_v0, %v2316_v17  ;;  %v2364_v2 = vadd.f32 %v2348_v52, %v2315_v49  ;;  %v2302_v25 = vadd.f32 %v4269_v22, %v2221_v7 }
 0x3f7   : > { %v2312_v54 = vadd.f32 %v4293_v6, %v2231_v18  ;;  %v2368_v26 = vadd.f32 %v2352_v3, %v4283_v50  ;;  %v2072_v61 = vadd.f32 %v2071_v28, %v4154_v42  ;;  %v2065_v52 = vadd.f32 %v4243_v38, %v4154_v42 }
 0x3f8   : > { %v2366_v41 = vadd.f32 %v2350_v32, %v2317_v53  ;;  %v2381_v37 = vadd.f32 %v2365_v47, %v2070_v23  ;;  %v2351_v35 = vadd.f32 %v2335_v39, %v2302_v25  ;;  %v2345_v5 = vmul.f32 %v2329_v19, %v4219_v9 }
 0x3f9   : > { %v2380_v40 = vadd.f32 %v2364_v2, %v2067_v10  ;;  %v2362_v33 = vadd.f32 %v4290_v60, %v2313_v57  ;;  %v2062_v6 = vadd.f32 %v4239_v4, %v4154_v42  ;;  %v2379_v50 = vadd.f32 %v2363_v27, %v2065_v52 }
 0x3fa   : > { %v2382_v22 = vadd.f32 %v2366_v41, %v2072_v61  ;;  %v2367_v59 = vadd.f32 %v2351_v35, %v4263_v24  ;;  %v2361_v18 = vadd.f32 %v2345_v5, %v2312_v54  ;;  %v2397_v63 = vmax.f32 %v2381_v37, 0.0 }
 0x3fb   : > { %v2384_v1 = vmax.f32 %v2368_v26, 0.0  ;;  %v2060_v38 = vadd.f32 %v4223_v48, %v4154_v42  ;;  %v2396_v9 = vmax.f32 %v2380_v40, 0.0  ;;  %v2378_v20 = vadd.f32 %v2362_v33, %v2062_v6  ;;  %v2399_v42 = vld [vmem:[#allocation4] sm:$0xf] }
 0x3fc   : > { %v2398_v13 = vmax.f32 %v2382_v22, 0.0  ;;  %v2383_v62 = vmax.f32 %v2367_v59, 0.0  ;;  %v2395_v60 = vmax.f32 %v2379_v50, 0.0 }
 0x3fd   : > { %v2377_v24 = vadd.f32 %v2361_v18, %v2060_v38  ;;  %v2394_v4 = vmax.f32 %v2378_v20, 0.0 }
 0x3fe   : > { %v2407_v15 = vpack.c.bf16 %v2398_v13, %v2397_v63  ;;  %v2400_v56 = vpack.c.bf16 %v2384_v1, %v2383_v62  ;;  %v2406_v58 = vpack.c.bf16 %v2396_v9, %v2395_v60 }
 0x3ff   : > { %v2393_v46 = vmax.f32 %v2377_v24, 0.0 }
 0x400   : > { %2408 = vmatpush.bf16.msrb.mxu3 %v2407_v15 }
 0x401   : > { %v2405_v0 = vpack.c.bf16 %v2394_v4, %v2393_v46 }
 0x404   : > { %2409 = vmatpush.bf16.msrb.mxu3 %v2406_v58 }
 0x408   : > { %2410 = vmatpush.bf16.msrb.mxu3 %v2405_v0 }
 0x40c   : > { %2411 = vmatpush.bf16.msrb.mxu3 %v4248_v29 }
 0x410   : > { %2412 = vmatpush.bf16.msrb.mxu3 %v4232_v16 }
 0x414   : > { %2413 = vmatpush.bf16.msrb.mxu3 %v4204_v8 }
 0x418   : > { %2414 = vmatpush.bf16.msrb.mxu3 %v4180_v31 }
 0x41c   : > { %2415 = vmatpush.bf16.msrb.mxu3 %v2400_v56 }
 0x41f   : > { %2416 = vmatmul.bf16.vlgmr.msrb.gmra.mxu3 %v2399_v42 }
 0x4a2   : > { %v2417_v48 = vpop.f32.mrf.mxu3 }
 0x4a3   : > { %2421 = vst [vmem:[%s372_s30] sm:$0xff] %v2417_v48 }
 0x4aa   : > { %v2419_v36 = vpop.f32.mrf.mxu3 }
 0x4ab PF: > { %s21_s24 = sadd.s32 1, %s3098_s24  }
 0x4ac   : > { %p18_p8 = scmp.ge.s32.totalorder %s21_s24, 6  }
 0x4ae   :  { %20 = sbr.rel (!%p18_p8) target bundleno = 4 (0x4), region = 126 }
 0x4b3   :  { %2441 = vsyncpa [#allocation3], 1 }
 0x4b4   :  { %2443 = vsyncpa [#allocation3 + $0x1], 1 }
 0x4b5   :  { %2444 = vsyncpa [#allocation5], 1 }
 0x4b6   :  { %2445 = vsyncpa [#allocation8], 1 }
 0x4b7   :  { %2446 = vsyncpa [#allocation11], 1 }

</bundles_post_ra>
